<compile_context>
chip_gen: v5e
topology: v5e:2x2
jax: 0.10.0
libtpu: 0.0.40
codegen_flags: <defaults>
</compile_context>

<pallas_src>
import jax
import jax.numpy as jnp
from jax.experimental import pallas as pl
from jax.experimental.pallas import tpu as pltpu


# -------------------------------- wrapper --------------------------------------
def voice_cnn_forward(x_ncl, params, *, block_b=None, mxu_dtype=jnp.bfloat16):
    """x_ncl: (N, Cin, L0) float32 (PyTorch Conv1d layout); returns (N, num_classes)."""
    (w1, b1, s1, t1, w2, b2, s2, t2, w3, b3, wf1, bf1, wf2, bf2) = params
    n, c_in, l0 = x_ncl.shape
    c1, c2, c3 = w1.shape[2], w2.shape[2], w3.shape[2]
    f1 = wf1.shape[1]
    num_classes = wf2.shape[1]

    # Valid lengths through the net (PyTorch 'valid' convs + floor pooling).
    l1 = l0 - 2
    l1p = l1 // 2
    l2 = l1p - 2
    l2p = l2 // 2
    l3 = l2p - 2
    assert l3 >= 1, "input length too short for VoiceCNN"

    # Per-sample padded stride of the kernel input (conv1 activations).  Multiple
    # of 32 so p1 (pool1) / p2 (pool2) are multiples of 16 / 8 -> aligned
    # sublane-strided loads.
    p0 = ((l1 + 31) // 32) * 32
    p1, p2 = p0 // 2, p0 // 4
    # Row-consumption invariants: circular rolls / strided reads never let a
    # *valid* output row consume a row beyond its own sample's valid region.
    assert l1p <= p1 and l2 + 2 <= p1, "pool1/conv2 rows must stay in-sample"
    assert l2p <= p2 and l3 + 2 <= p2, "pool2/conv3 rows must stay in-sample"
    assert c2 <= 128 and c3 <= 128 and f1 <= 128, "vector slab assumes <=128 ch"

    # ---- VMEM budget & batch tile --------------------------------------------
    try:
        vmem_cap = int(pltpu.get_tpu_info().vmem_capacity_bytes)
    except Exception:
        vmem_cap = 64 << 20                      # v7x per-core capacity (lower bound)
    vmem_limit = int(min((3 * vmem_cap) // 4, 96 << 20))

    n8 = max(8, ((n + 7) // 8) * 8)
    if block_b is None:
        row_bytes = 4 * 128                      # one 128-lane f32 tile row
        per_sample = row_bytes * (2 * p0 + 3 * p1 + 3 * p2)  # dbuf in + taps/act + scr
        block_b = int(max(vmem_limit // 2, 4 << 20) // per_sample)
        block_b = max(8, min(128, n8, (block_b // 8) * 8))
        # Keep >=2 grid steps when possible: v7x has 2 TensorCores; one extra
        # ~0.35us step is noise on single-core v5e/v6e.
        if n8 >= 16 and block_b >= n8:
            block_b = max(8, ((n8 // 2) // 8) * 8)
    block_b = max(8, ((block_b + 7) // 8) * 8)
    n_pad = ((n + block_b - 1) // block_b) * block_b
    grid = (n_pad // block_b,)
    bsz = block_b

    # ---- XLA-side prologue: Conv1d(Cin,64,3) -> ReLU -> BatchNorm1d(64) --------
    # Hoisted out of the kernel (perf review): Cin=4 would occupy full 128-lane
    # vregs/VMEM tiles (~32x padding) and feed a K=12 matmul using <10% of the
    # MXU.  The kernel instead receives a 64-lane (B*P0, 64) activation tensor.
    x_nlc = jnp.transpose(x_ncl, (0, 2, 1)).astype(jnp.float32)     # (N, L0, Cin)
    h1 = sum(jnp.einsum('nlc,co->nlo', x_nlc[:, t:t + l1, :], w1[t])
             for t in range(3)) + b1
    h1 = jnp.maximum(h1, 0.0) * s1 + t1                             # ReLU -> BN1
    h1 = jnp.pad(h1, ((0, n_pad - n), (0, p0 - l1), (0, 0)))        # zero padding
    x_flat = h1.reshape(n_pad * p0, c1)

    # ---- weight prep -----------------------------------------------------------
    w2f = w2.reshape(3 * c1, c2).astype(mxu_dtype)
    w3f = w3.reshape(3 * c2, c3).astype(mxu_dtype)
    wf1s = (wf1 / float(l3)).astype(mxu_dtype)       # AdaptiveAvgPool 1/l3 folded in
    ncp = ((num_classes + 127) // 128) * 128         # lane-dense logits slab
    wf2p = jnp.pad(wf2, ((0, 0), (0, ncp - num_classes))).astype(mxu_dtype)
    bf2p = jnp.pad(bf2, ((0, 0), (0, ncp - num_classes))).astype(jnp.float32)

    def pad128(v):
        return jnp.pad(v, ((0, 0), (0, 128 - v.shape[1])))

    # One (8,128) slab holding all per-channel vectors: rows = b2,s2,t2,b3,bf1.
    vec_slab = jnp.concatenate(
        [pad128(b2), pad128(s2), pad128(t2), pad128(b3), pad128(bf1),
         jnp.zeros((3, 128), jnp.float32)], axis=0).astype(jnp.float32)

    # ------------------------------- kernel -----------------------------------
    def kernel(x_ref, w2_ref, w3_ref, wf1_ref, wf2_ref, vec_ref, bf2_ref,
               out_ref, scr2):
        vecs = vec_ref[...]                                   # (8, 128) f32
        b2v, s2v, t2v = vecs[0:1, :c2], vecs[1:2, :c2], vecs[2:3, :c2]
        b3v, bf1v = vecs[3:4, :c3], vecs[4:5, :f1]

        def conv3x(v, w_ref, bias):
            # 'valid' Conv1d(k=3) as ONE im2col matmul; taps via circular
            # sublane rolls (XLU slot).  Rows that wrap across a sample
            # boundary only feed rows beyond that sample's valid length
            # (invariants asserted in the wrapper).
            m = v.shape[0]
            taps = jnp.concatenate(
                [v, pltpu.roll(v, m - 1, axis=0), pltpu.roll(v, m - 2, axis=0)],
                axis=-1).astype(mxu_dtype)
            return jnp.dot(taps, w_ref[...],
                           preferred_element_type=jnp.float32) + bias

        # MaxPool1d(2) #1: input block already resident in VMEM -> two aligned
        # stride-2 sublane reads, no scratch store.
        half0 = bsz * p0 // 2
        h = jnp.maximum(x_ref[pl.ds(0, half0, stride=2), :],
                        x_ref[pl.ds(1, half0, stride=2), :])          # (B*P1, 64)

        # Block 2: Conv1d(64,128,3) -> ReLU -> BatchNorm1d(128) -> MaxPool1d(2)
        h = conv3x(h, w2_ref, b2v)
        h = jnp.maximum(h, 0.0) * s2v + t2v                           # (B*P1, 128)
        m1 = bsz * p1
        # pairwise max first (roll = XLU), one store, ONE stride-2 read.
        scr2[...] = jnp.maximum(h, pltpu.roll(h, m1 - 1, axis=0))
        h = scr2[pl.ds(0, m1 // 2, stride=2), :]                      # (B*P2, 128)

        # Block 3: Conv1d(128,128,3) -> ReLU -> AdaptiveAvgPool1d(1)
        h = jnp.maximum(conv3x(h, w3_ref, b3v), 0.0)                  # (B*P2, 128)
        h3 = h.reshape(bsz, p2, c3)                                   # p2 % 8 == 0
        ridx = jax.lax.broadcasted_iota(jnp.int32, (bsz, p2, c3), 1)
        pooled = jnp.sum(jnp.where(ridx < l3, h3, 0.0), axis=1)       # (B, 128)

        # Head: Linear(128,128) -> ReLU -> [Dropout: identity] -> Linear(128, ncp)
        fc = jnp.maximum(
            jnp.dot(pooled.astype(mxu_dtype), wf1_ref[...],
                    preferred_element_type=jnp.float32) + bf1v, 0.0)
        out_ref[...] = jnp.dot(fc.astype(mxu_dtype), wf2_ref[...],
                               preferred_element_type=jnp.float32) + bf2_ref[...]

    in_specs = [
        pl.BlockSpec((bsz * p0, c1), lambda i: (i, 0)),
        pl.BlockSpec(w2f.shape, lambda i: (0, 0)),
        pl.BlockSpec(w3f.shape, lambda i: (0, 0)),
        pl.BlockSpec(wf1s.shape, lambda i: (0, 0)),
        pl.BlockSpec(wf2p.shape, lambda i: (0, 0)),
        pl.BlockSpec(vec_slab.shape, lambda i: (0, 0)),
        pl.BlockSpec(bf2p.shape, lambda i: (0, 0)),
    ]
    out_specs = pl.BlockSpec((bsz, ncp), lambda i: (i, 0))

    out = pl.pallas_call(
        kernel,
        grid=grid,
        in_specs=in_specs,
        out_specs=out_specs,
        out_shape=jax.ShapeDtypeStruct((n_pad, ncp), jnp.float32),
        scratch_shapes=[pltpu.VMEM((bsz * p1, c2), jnp.float32)],
        compiler_params=pltpu.CompilerParams(
            dimension_semantics=("parallel",),
            vmem_limit_bytes=vmem_limit),
    )(x_flat, w2f, w3f, wf1s, wf2p, vec_slab, bf2p)

    return out[:n, :num_classes]


# --------------------------- parameter initialization ---------------------------
def init_params(key, c_in, num_classes, eps=1e-5):
    ks = list(jax.random.split(key, 24))
    nk = iter(ks)

    def nrm(shape, scale=0.1):
        return scale * jax.random.normal(next(nk), shape, jnp.float32)

    def bn_scale_bias(c):
        gamma = 1.0 + nrm((1, c))
        beta = nrm((1, c))
        mean = nrm((1, c))
        var = jax.random.uniform(next(nk), (1, c), jnp.float32, 0.5, 1.5)
        scale = gamma / jnp.sqrt(var + eps)
        bias = beta - mean * scale
        return scale, bias

    w1, b1 = nrm((3, c_in, 64)), nrm((1, 64))
    s1, t1 = bn_scale_bias(64)
    w2, b2 = nrm((3, 64, 128)), nrm((1, 128))
    s2, t2 = bn_scale_bias(128)
    w3, b3 = nrm((3, 128, 128)), nrm((1, 128))
    wf1, bf1 = nrm((128, 128)), nrm((1, 128))
    wf2, bf2 = nrm((128, num_classes)), nrm((1, num_classes))
    return (w1, b1, s1, t1, w2, b2, s2, t2, w3, b3, wf1, bf1, wf2, bf2)


# ------------------------------ pure-JAX reference ------------------------------
def ref_forward(x_ncl, params):
    w1, b1, s1, t1, w2, b2, s2, t2, w3, b3, wf1, bf1, wf2, bf2 = params
    x = jnp.transpose(x_ncl, (0, 2, 1))

    def conv(x, w, b):
        lout = x.shape[1] - 2
        y = sum(jnp.einsum('nlc,co->nlo', x[:, t:t + lout, :], w[t]) for t in range(3))
        return y + b

    def mp(x):
        nb, l, c = x.shape
        lp = l // 2
        return x[:, :2 * lp].reshape(nb, lp, 2, c).max(axis=2)

    h = jnp.maximum(conv(x, w1, b1), 0.0) * s1 + t1
    h = mp(h)
    h = jnp.maximum(conv(h, w2, b2), 0.0) * s2 + t2
    h = mp(h)
    h = jnp.maximum(conv(h, w3, b3), 0.0)
    h = h.mean(axis=1)                                    # (N, 128)
    h = jnp.maximum(h @ wf1 + bf1, 0.0)
    return h @ wf2 + bf2


# ----------------------------------- main ---------------------------------------
if __name__ == "__main__":
    # Exact f32 matmuls everywhere so the reference comparison is meaningful.
    jax.config.update("jax_default_matmul_precision", "highest")

    key = jax.random.PRNGKey(0)
    n, c_in, l0, num_classes = 16, 4, 32, 5

    kx, kp = jax.random.split(key)
    x_ncl = jax.random.normal(kx, (n, c_in, l0), jnp.float32)   # PyTorch (N, C, L)
    params = init_params(kp, c_in, num_classes)

    ref = ref_forward(x_ncl, params)

    # f32 MXU path (v5e-safe): tight check.  block_b=8 -> grid=(2,): batched
    # tiles AND >=2 parallel steps for v7x megacore.
    out32 = voice_cnn_forward(x_ncl, params, block_b=8, mxu_dtype=jnp.float32)
    out32 = jax.block_until_ready(out32)
    assert out32.shape == (n, num_classes), out32.shape
    assert jnp.allclose(out32, ref, atol=1e-3, rtol=1e-3), (out32, ref)

    # bf16 MXU path (v6e/v7x default): looser tolerance (precision, not a bug).
    outbf = voice_cnn_forward(x_ncl, params, block_b=8, mxu_dtype=jnp.bfloat16)
    outbf = jax.block_until_ready(outbf)
    assert outbf.shape == (n, num_classes), outbf.shape
    assert jnp.allclose(outbf, ref, atol=5e-2, rtol=5e-2), (outbf, ref)

    print("KERNEL_OK")
</pallas_src>

<mosaic_0001>
module attributes {stable_mosaic.version = 11 : i64} {
  func.func @kernel(%arg0: i32, %arg1: memref<256x64xf32, #tpu.memory_space<vmem>>, %arg2: memref<192x128xf32, #tpu.memory_space<vmem>>, %arg3: memref<384x128xf32, #tpu.memory_space<vmem>>, %arg4: memref<128x128xf32, #tpu.memory_space<vmem>>, %arg5: memref<128x128xf32, #tpu.memory_space<vmem>>, %arg6: memref<8x128xf32, #tpu.memory_space<vmem>>, %arg7: memref<1x128xf32, #tpu.memory_space<vmem>>, %arg8: memref<8x128xf32, #tpu.memory_space<vmem>>, %arg9: memref<128x128xf32, #tpu.memory_space<vmem>>) attributes {dimension_semantics = [#tpu.dimension_semantics<parallel>], iteration_bounds = array<i64: 2>, scalar_prefetch = 0 : i64, scratch_operands = 1 : i64, tpu.core_type = #tpu.core_type<tc>, window_params = [{transform_indices = @transform_0, window_bounds = array<i64: 256, 64>}, {pipeline_mode = #tpu.pipeline_mode<synchronous>, transform_indices = @transform_1, window_bounds = array<i64: 192, 128>}, {pipeline_mode = #tpu.pipeline_mode<synchronous>, transform_indices = @transform_2, window_bounds = array<i64: 384, 128>}, {pipeline_mode = #tpu.pipeline_mode<synchronous>, transform_indices = @transform_3, window_bounds = array<i64: 128, 128>}, {pipeline_mode = #tpu.pipeline_mode<synchronous>, transform_indices = @transform_4, window_bounds = array<i64: 128, 128>}, {pipeline_mode = #tpu.pipeline_mode<synchronous>, transform_indices = @transform_5, window_bounds = array<i64: 8, 128>}, {pipeline_mode = #tpu.pipeline_mode<synchronous>, transform_indices = @transform_6, window_bounds = array<i64: 1, 128>}, {transform_indices = @transform_7, window_bounds = array<i64: 8, 128>}]} {
    %c0 = arith.constant 0 : index
    %c0_0 = arith.constant 0 : index
    %0 = vector.load %arg6[%c0, %c0_0] : memref<8x128xf32, #tpu.memory_space<vmem>>, vector<8x128xf32>
    %1 = vector.extract_strided_slice %0 {offsets = [0, 0], sizes = [1, 128], strides = [1, 1]} : vector<8x128xf32> to vector<1x128xf32>
    %2 = vector.extract_strided_slice %0 {offsets = [1, 0], sizes = [1, 128], strides = [1, 1]} : vector<8x128xf32> to vector<1x128xf32>
    %3 = vector.extract_strided_slice %0 {offsets = [2, 0], sizes = [1, 128], strides = [1, 1]} : vector<8x128xf32> to vector<1x128xf32>
    %4 = vector.extract_strided_slice %0 {offsets = [3, 0], sizes = [1, 128], strides = [1, 1]} : vector<8x128xf32> to vector<1x128xf32>
    %5 = vector.extract_strided_slice %0 {offsets = [4, 0], sizes = [1, 128], strides = [1, 1]} : vector<8x128xf32> to vector<1x128xf32>
    %c0_1 = arith.constant 0 : index
    %c0_2 = arith.constant 0 : index
    %6 = tpu.strided_load %arg1[%c0_1, %c0_2] {strides = array<i32: 2, 1>} : memref<256x64xf32, #tpu.memory_space<vmem>>, vector<128x64xf32>
    %c1 = arith.constant 1 : index
    %c0_3 = arith.constant 0 : index
    %7 = tpu.strided_load %arg1[%c1, %c0_3] {strides = array<i32: 2, 1>} : memref<256x64xf32, #tpu.memory_space<vmem>>, vector<128x64xf32>
    %8 = arith.maximumf %6, %7 : vector<128x64xf32>
    %c127_i32 = arith.constant 127 : i32
    %9 = tpu.dynamic_rotate %8 by %c127_i32 dim 0 : vector<128x64xf32>, i32 -> vector<128x64xf32>
    %c126_i32 = arith.constant 126 : i32
    %10 = tpu.dynamic_rotate %8 by %c126_i32 dim 0 : vector<128x64xf32>, i32 -> vector<128x64xf32>
    %11 = tpu.concatenate %8, %9, %10 in 1 : vector<128x64xf32>, vector<128x64xf32>, vector<128x64xf32> -> vector<128x192xf32>
    %c0_4 = arith.constant 0 : index
    %c0_5 = arith.constant 0 : index
    %12 = vector.load %arg2[%c0_4, %c0_5] : memref<192x128xf32, #tpu.memory_space<vmem>>, vector<192x128xf32>
    %cst = arith.constant dense<0.000000e+00> : vector<128x128xf32>
    %13 = tpu.matmul %11, %12, %cst {dimension_numbers = #tpu.dot_dimension_numbers<[1], [0], [0], [1], [0, 0, 1, 1], [], []>, precision = #tpu.contract_precision<fp32>} : vector<128x192xf32>, vector<192x128xf32>, vector<128x128xf32> -> vector<128x128xf32>
    %14 = vector.broadcast %1 : vector<1x128xf32> to vector<128x128xf32>
    %15 = arith.addf %13, %14 : vector<128x128xf32>
    %cst_6 = arith.constant 0.000000e+00 : f32
    %16 = vector.broadcast %cst_6 : f32 to vector<128x128xf32>
    %17 = arith.maximumf %15, %16 : vector<128x128xf32>
    %18 = vector.broadcast %2 : vector<1x128xf32> to vector<128x128xf32>
    %19 = arith.mulf %17, %18 : vector<128x128xf32>
    %20 = vector.broadcast %3 : vector<1x128xf32> to vector<128x128xf32>
    %21 = arith.addf %19, %20 : vector<128x128xf32>
    %c127_i32_7 = arith.constant 127 : i32
    %22 = tpu.dynamic_rotate %21 by %c127_i32_7 dim 0 : vector<128x128xf32>, i32 -> vector<128x128xf32>
    %23 = arith.maximumf %21, %22 : vector<128x128xf32>
    %c0_8 = arith.constant 0 : index
    %c0_9 = arith.constant 0 : index
    %24 = vector.load %arg9[%c0_8, %c0_9] : memref<128x128xf32, #tpu.memory_space<vmem>>, vector<128x128xf32>
    tpu.vector_store %arg9[%c0_8, %c0_9], %23 {strides = array<i32>} : memref<128x128xf32, #tpu.memory_space<vmem>>, vector<128x128xf32>,
    %c0_10 = arith.constant 0 : index
    %c0_11 = arith.constant 0 : index
    %25 = tpu.strided_load %arg9[%c0_10, %c0_11] {strides = array<i32: 2, 1>} : memref<128x128xf32, #tpu.memory_space<vmem>>, vector<64x128xf32>
    %c63_i32 = arith.constant 63 : i32
    %26 = tpu.dynamic_rotate %25 by %c63_i32 dim 0 : vector<64x128xf32>, i32 -> vector<64x128xf32>
    %c62_i32 = arith.constant 62 : i32
    %27 = tpu.dynamic_rotate %25 by %c62_i32 dim 0 : vector<64x128xf32>, i32 -> vector<64x128xf32>
    %28 = tpu.concatenate %25, %26, %27 in 1 : vector<64x128xf32>, vector<64x128xf32>, vector<64x128xf32> -> vector<64x384xf32>
    %c0_12 = arith.constant 0 : index
    %c0_13 = arith.constant 0 : index
    %29 = vector.load %arg3[%c0_12, %c0_13] : memref<384x128xf32, #tpu.memory_space<vmem>>, vector<384x128xf32>
    %cst_14 = arith.constant dense<0.000000e+00> : vector<64x128xf32>
    %30 = tpu.matmul %28, %29, %cst_14 {dimension_numbers = #tpu.dot_dimension_numbers<[1], [0], [0], [1], [0, 0, 1, 1], [], []>, precision = #tpu.contract_precision<fp32>} : vector<64x384xf32>, vector<384x128xf32>, vector<64x128xf32> -> vector<64x128xf32>
    %31 = vector.broadcast %4 : vector<1x128xf32> to vector<64x128xf32>
    %32 = arith.addf %30, %31 : vector<64x128xf32>
    %cst_15 = arith.constant 0.000000e+00 : f32
    %33 = vector.broadcast %cst_15 : f32 to vector<64x128xf32>
    %34 = arith.maximumf %32, %33 : vector<64x128xf32>
    %35 = vector.shape_cast %34 : vector<64x128xf32> to vector<8x8x128xf32>
    %36 = tpu.iota {dimensions = array<i32: 1>} : vector<8x8x128xi32>
    %c4_i32 = arith.constant 4 : i32
    %37 = vector.broadcast %c4_i32 : i32 to vector<8x8x128xi32>
    %38 = arith.cmpi slt, %36, %37 : vector<8x8x128xi32>
    %cst_16 = arith.constant 0.000000e+00 : f32
    %39 = vector.broadcast %cst_16 : f32 to vector<8x8x128xf32>
    %40 = arith.select %38, %35, %39 : vector<8x8x128xi1>, vector<8x8x128xf32>
    %cst_17 = arith.constant dense<0.000000e+00> : vector<8x128xf32>
    %41 = vector.multi_reduction <add>, %40, %cst_17 [1] : vector<8x8x128xf32> to vector<8x128xf32>
    %c0_18 = arith.constant 0 : index
    %c0_19 = arith.constant 0 : index
    %42 = vector.load %arg4[%c0_18, %c0_19] : memref<128x128xf32, #tpu.memory_space<vmem>>, vector<128x128xf32>
    %cst_20 = arith.constant dense<0.000000e+00> : vector<8x128xf32>
    %43 = tpu.matmul %41, %42, %cst_20 {dimension_numbers = #tpu.dot_dimension_numbers<[1], [0], [0], [1], [0, 0, 1, 1], [], []>, precision = #tpu.contract_precision<fp32>} : vector<8x128xf32>, vector<128x128xf32>, vector<8x128xf32> -> vector<8x128xf32>
    %44 = vector.broadcast %5 : vector<1x128xf32> to vector<8x128xf32>
    %45 = arith.addf %43, %44 : vector<8x128xf32>
    %cst_21 = arith.constant 0.000000e+00 : f32
    %46 = vector.broadcast %cst_21 : f32 to vector<8x128xf32>
    %47 = arith.maximumf %45, %46 : vector<8x128xf32>
    %c0_22 = arith.constant 0 : index
    %c0_23 = arith.constant 0 : index
    %48 = vector.load %arg5[%c0_22, %c0_23] : memref<128x128xf32, #tpu.memory_space<vmem>>, vector<128x128xf32>
    %cst_24 = arith.constant dense<0.000000e+00> : vector<8x128xf32>
    %49 = tpu.matmul %47, %48, %cst_24 {dimension_numbers = #tpu.dot_dimension_numbers<[1], [0], [0], [1], [0, 0, 1, 1], [], []>, precision = #tpu.contract_precision<fp32>} : vector<8x128xf32>, vector<128x128xf32>, vector<8x128xf32> -> vector<8x128xf32>
    %c0_25 = arith.constant 0 : index
    %c0_26 = arith.constant 0 : index
    %50 = vector.load %arg7[%c0_25, %c0_26] : memref<1x128xf32, #tpu.memory_space<vmem>>, vector<1x128xf32>
    %51 = vector.broadcast %50 : vector<1x128xf32> to vector<8x128xf32>
    %52 = arith.addf %49, %51 : vector<8x128xf32>
    %c0_27 = arith.constant 0 : index
    %c0_28 = arith.constant 0 : index
    %53 = vector.load %arg8[%c0_27, %c0_28] : memref<8x128xf32, #tpu.memory_space<vmem>>, vector<8x128xf32>
    tpu.vector_store %arg8[%c0_27, %c0_28], %52 {strides = array<i32>} : memref<8x128xf32, #tpu.memory_space<vmem>>, vector<8x128xf32>,
    return
  }
  func.func @transform_0(%arg0: i32) -> (i32, i32) {
    %c0_i32 = arith.constant 0 : i32
    %c0_i32_0 = arith.constant 0 : i32
    return %arg0, %c0_i32 : i32, i32
  }
  func.func @transform_1(%arg0: i32) -> (i32, i32) {
    %c0_i32 = arith.constant 0 : i32
    %c0_i32_0 = arith.constant 0 : i32
    %c0_i32_1 = arith.constant 0 : i32
    return %c0_i32, %c0_i32_0 : i32, i32
  }
  func.func @transform_2(%arg0: i32) -> (i32, i32) {
    %c0_i32 = arith.constant 0 : i32
    %c0_i32_0 = arith.constant 0 : i32
    %c0_i32_1 = arith.constant 0 : i32
    return %c0_i32, %c0_i32_0 : i32, i32
  }
  func.func @transform_3(%arg0: i32) -> (i32, i32) {
    %c0_i32 = arith.constant 0 : i32
    %c0_i32_0 = arith.constant 0 : i32
    %c0_i32_1 = arith.constant 0 : i32
    return %c0_i32, %c0_i32_0 : i32, i32
  }
  func.func @transform_4(%arg0: i32) -> (i32, i32) {
    %c0_i32 = arith.constant 0 : i32
    %c0_i32_0 = arith.constant 0 : i32
    %c0_i32_1 = arith.constant 0 : i32
    return %c0_i32, %c0_i32_0 : i32, i32
  }
  func.func @transform_5(%arg0: i32) -> (i32, i32) {
    %c0_i32 = arith.constant 0 : i32
    %c0_i32_0 = arith.constant 0 : i32
    %c0_i32_1 = arith.constant 0 : i32
    return %c0_i32, %c0_i32_0 : i32, i32
  }
  func.func @transform_6(%arg0: i32) -> (i32, i32) {
    %c0_i32 = arith.constant 0 : i32
    %c0_i32_0 = arith.constant 0 : i32
    %c0_i32_1 = arith.constant 0 : i32
    return %c0_i32, %c0_i32_0 : i32, i32
  }
  func.func @transform_7(%arg0: i32) -> (i32, i32) {
    %c0_i32 = arith.constant 0 : i32
    %c0_i32_0 = arith.constant 0 : i32
    return %arg0, %c0_i32 : i32, i32
  }
}

</mosaic_0001>

<bundles_post_ra>
// kernel: tpu_custom_call.1
= control target key start
LH: loop header
LB: loop body
LE: loop exit
PB: predicated region body
PF: predicated region fallthrough
CT: control target
= control target key end

     0   :  { %12 = vsyncpa [#allocation4], 0  ;;  %s8417_s0 = inlined_call_operand.vmem [shape: f32[512,64], index: 0, kind: input, shape index: {}]   ;;  %s8418_s1 = inlined_call_operand.vmem [shape: f32[192,128], index: 1, kind: input, shape index: {}]   ;;  %s8419_s2 = inlined_call_operand.vmem [shape: f32[384,128], index: 2, kind: input, shape index: {}]   ;;  %s8420_s3 = inlined_call_operand.vmem [shape: f32[128,128], index: 3, kind: input, shape index: {}]   ;;  %s8421_s4 = inlined_call_operand.hbm [shape: f32[128,128], index: 4, kind: input, shape index: {}]   ;;  %s8422_s5 = inlined_call_operand.vmem [shape: f32[8,128], index: 5, kind: input, shape index: {}]   ;;  %s8423_s6 = inlined_call_operand.vmem [shape: f32[1,128], index: 6, kind: input, shape index: {}]   ;;  %s8424_s7 = inlined_call_operand.hbm [shape: f32[16,128], index: 7, kind: output, shape index: {}]  }
   0x1   :  { %13 = vsyncpa [#allocation5], 0 }
   0x2   :  { %15 = vsyncpa [#allocation5 + $0x1], 0  ;;  %s5129_s24 = smov 0   ;;  %s5131_s25 = smov 0  }
   0x3   :  { %s5133_s26 = smov 0   ;;  %s5135_s27 = smov 0  }
   0x4 LB: > { %s5150_s28 = sadd.s32 4294967295, %s5083_s27   ;;  %s4886_s29 = sadd.s32 4294967294, %s5083_s27   ;;  %s5083_s27 = sphi %s5135_s27, %s8715_s27   ;;  %s5079_s26 = sphi %s5133_s26, %s8714_s26   ;;  %s5075_s25 = sphi %s5131_s25, %s8713_s25   ;;  %s5071_s24 = sphi %s5129_s24, %s8712_s24  }
   0x5   : > { %s5154_s30 = sadd.s32 1, %s5083_s27   ;;  %s180_s8 = sadd.s32 1, %s5079_s26 }
   0x6   : > { %s177_s9 = ssub.s32 %s5083_s27, %s5154_s30  ;;  %p190_p0 = scmp.ne.s32.totalorder %s5079_s26, %s5075_s25 }
   0x7   : > { %p178_p1 = scmp.eq.s32.totalorder %s177_s9, 0  ;;  %p191_p2 = scmp.eq.s32.totalorder %s5150_s28, 1 }
   0x8   : > { %p196_p3 = scmp.ne.s32.totalorder %s5075_s25, %s5071_s24  ;;  %p197_p4 = scmp.eq.s32.totalorder %s4886_s29, 1 }
   0x9   : > { %s5165_s10 = scalar_select %p178_p1, %s5079_s26, %s180_s8  }
   0xa   : > { %p5167_p5 = por %p191_p2, %p190_p0  ;;  %p5171_p6 = por %p197_p4, %p196_p3 }
   0xb   : > { %p4887_p7 = scmp.ge.s32.totalorder %s5083_s27, 1  ;;  %p204_p8 = scmp.lt.s32.totalorder %s5083_s27, 3 }
   0xc   : > { %p4944_p9 = scmp.eq.s32.totalorder %s5150_s28, 0  ;;  %s224_s15 = sshll.u32 %s8421_s4, 4  ;;  %s225_s15 = int_to_ptr.hbm [resolvable:$true] %s224_s15 }
   0xd   : > { %p205_p10 = pnand %p4887_p7, %p204_p8  ;;  %s5085_s16 = smov [#allocation3]  }
   0xe   : > { %s226_s17 = sshll.u32 %s5085_s16, 4  ;;  %s5086_s18 = smov 128   ;;  %s227_s17 = int_to_ptr.vmem [resolvable:$true] %s226_s17 }
   0xf   : > { %p4936_p11 = pneg %p205_p10  ;;  %s5087_s19 = smov 8  }
  0x10   : > { %257 = sbr.rel (%p205_p10) target bundleno = 1421 (0x58d), region = 48 }
  0x11   : > { %p4937_p12 = pnand %p4944_p9, %p4936_p11 }
  0x13   : > { %4939 = dma.hbm_to_vmem [thread:$0]  (!%p4937_p12), %s225_s15, 2048, %s227_s17, [#allocation4], %s5086_s18, %s5086_s18, %s5087_s19  }
  0x15   : > { %5062 = dma.done.wait (%p4944_p9), [#allocation4], 2048  }
  0x16   : > { %5064 = vsyncadd (%p4944_p9), [#allocation4], 4294965248  ;;  %s4893_s20 = sshll.u32 %s5150_s28, 5  ;;  %v392_v0 = vlaneseq  ;;  %v540_v21 = vld [vmem:[%s8418_s1 + $0x78] sm:$0xff]  ;;  %v539_v30 = vld [vmem:[%s8418_s1 + $0x70] sm:$0xff]  ;;  %s5088_s15 = smov 64  }
  0x17   : > { %p291_p13 = scmp.lt.s32.totalorder %s4893_s20, 63  ;;  %v5227_v26 = vand.u32 4294901760, %v540_v21  ;;  %v5253_v38 = vand.u32 4294901760, %v539_v30  ;;  %v538_v49 = vld [vmem:[%s8418_s1 + $0x68] sm:$0xff]  ;;  %v537_v60 = vld [vmem:[%s8418_s1 + $0x60] sm:$0xff]  ;;  %vm508_vm1 = vcmask 523264  }
  0x18   : > { %v5193_v1 = vshrl.u32 %v392_v0, 7  ;;  %v5294_v59 = vand.u32 4294901760, %v538_v49  ;;  %v536_v0 = vld [vmem:[%s8418_s1 + $0x58] sm:$0xff]  ;;  %vm4080_vm4 = vcmask 1041409   ;;  %vm4082_vm5 = vcmask 1042434   ;;  %s5037_s19 = scalar_lea.hbm %s8424_s7, 16 }
  0x19   : > { %s8717_s20 = smov (!%p291_p13, %s4893_s20), 63  ;;  %v5246_v35 = vsub.f32 %v540_v21, %v5227_v26  ;;  %1050 = vmatpush.msra.mxu3 %v5227_v26  ;;  %599 = vmatpush.msra.mxu0 %v5227_v26  ;;  %v5268_v47 = vsub.f32 %v539_v30, %v5253_v38  ;;  %v5338_v21 = vand.u32 4294901760, %v536_v0  ;;  %vm4084_vm6 = vcmask 1043459  }
  0x1a   : > { %s4894_s21 = sshll.u32 %s8717_s20, 3  ;;  %8521 = vst [vmem:[#allocation9_spill] sm:$0xff] %v5193_v1  ;;  %vm394_vm0 = vcmp.lt.s32.totalorder %v5193_v1, 7  ;;  %vm427_vm2 = vcmp.lt.s32.totalorder %v5193_v1, 6  ;;  %vm4086_vm7 = vcmask 1044484   ;;  %vm4088_vm8 = vcmask 1045509  }
  0x1b   : > { %s5191_s29 = scalar_lea.vmem %s8417_s0, %s4894_s21  ;;  %922 = vmatpush.msra.mxu2 %v5246_v35  ;;  %v761_v46 = vand.u32 4294901760, %v5246_v35  ;;  %1052 = vmatpush.msra.mxu3 %v5253_v38  ;;  %v767_v57 = vand.u32 4294901760, %v5268_v47  ;;  %v5357_v30 = vsub.f32 %v536_v0, %v5338_v21  ;;  %vm4090_vm9 = vcmask 1046534  }
  0x1c   : > { %v297_v2 = vld [vmem:[%s5191_s29] ss:$2 sm:$0xff]  ;;  %v4895_v3 = vld [vmem:[%s5191_s29 + $0x10] ss:$2 sm:$0xff]  ;;  %v4910_v4 = vld [vmem:[%s5191_s29 + $0x1] ss:$2 sm:$0xff]  ;;  %601 = vmatpush.msra.mxu0 %v5253_v38 }
  0x1d   : > { %v4911_v5 = vld [vmem:[%s5191_s29 + $0x11] ss:$2 sm:$0xff]  ;;  %v5199_v6 = vmax.f32 %v297_v2, %v4910_v4  ;;  %v4896_v7 = vld [vmem:[%s5191_s29 + $0x20] ss:$2 sm:$0xff]  ;;  %v4912_v8 = vld [vmem:[%s5191_s29 + $0x21] ss:$2 sm:$0xff]  ;;  %925 = vmatpush.msra.mxu2 %v5268_v47  ;;  %v762_v56 = vsub.f32 %v5246_v35, %v761_v46  ;;  %v768_v63 = vsub.f32 %v5268_v47, %v767_v57  ;;  %1054 = vmatpush.msra.mxu3 %v5294_v59 }
  0x1e   : > { %v5203_v9 = vmax.f32 %v4895_v3, %v4911_v5  ;;  %v5205_v10 = vmax.f32 %v4896_v7, %v4912_v8  ;;  %v4897_v11 = vld [vmem:[%s5191_s29 + $0x30] ss:$2 sm:$0xff]  ;;  %v4913_v12 = vld [vmem:[%s5191_s29 + $0x31] ss:$2 sm:$0xff]  ;;  %v4898_v13 = vld [vmem:[%s5191_s29 + $0x40] ss:$2 sm:$0xff]  ;;  %v5316_v7 = vsub.f32 %v538_v49, %v5294_v59  ;;  %603 = vmatpush.msra.mxu0 %v5294_v59 }
  0x1f   : > { %v376_v14 = vrot.slane %v5199_v6, 1  ;;  %v5212_v15 = vmax.f32 %v4897_v11, %v4913_v12  ;;  %v4914_v16 = vld [vmem:[%s5191_s29 + $0x41] ss:$2 sm:$0xff]  ;;  %v4900_v17 = vld [vmem:[%s5191_s29 + $0x60] ss:$2 sm:$0xff]  ;;  %v763_v62 = vand.u32 4294901760, %v762_v56 }
  0x20   : > { %v377_v18 = vrot.slane %v5203_v9, 1  ;;  %v378_v19 = vrot.slane %v5205_v10, 1  ;;  %v4901_v20 = vld [vmem:[%s5191_s29 + $0x70] ss:$2 sm:$0xff]  ;;  %v5223_v23 = vmax.f32 %v4898_v13, %v4914_v16  ;;  %v4916_v24 = vld [vmem:[%s5191_s29 + $0x61] ss:$2 sm:$0xff]  ;;  %928 = vmatpush.msra.mxu2 %v5316_v7 }
  0x21   : > { %v379_v22 = vrot.slane %v5212_v15, 1  ;;  %v4917_v25 = vld [vmem:[%s5191_s29 + $0x71] ss:$2 sm:$0xff]  ;;  %v4899_v28 = vld [vmem:[%s5191_s29 + $0x50] ss:$2 sm:$0xff]  ;;  %v5249_v36 = vmax.f32 %v4900_v17, %v4916_v24  ;;  %v534_v8 = vld [vmem:[%s8418_s1 + $0x48] sm:$0xff]  ;;  %764 = vmatpush.msra.mxu1 %v763_v62 }
  0x22   : > { %v409_v27 = vsel %vm394_vm0, %v376_v14, %v377_v18  ;;  %v4915_v29 = vld [vmem:[%s5191_s29 + $0x51] ss:$2 sm:$0xff]  ;;  %v4902_v33 = vld [vmem:[%s5191_s29 + $0x80] ss:$2 sm:$0xff]  ;;  %v4918_v34 = vld [vmem:[%s5191_s29 + $0x81] ss:$2 sm:$0xff]  ;;  %v5251_v37 = vmax.f32 %v4901_v20, %v4917_v25  ;;  %v408_v50 = vsel %vm394_vm0, %v377_v18, %v378_v19 }
  0x23   : > { %460 = vrot.lane.b32.xlu0 %v409_v27, %s5088_s15  ;;  %v407_v31 = vsel %vm394_vm0, %v378_v19, %v379_v22  ;;  %v5241_v32 = vmax.f32 %v4899_v28, %v4915_v29  ;;  %v380_v39 = vrot.slane %v5223_v23, 1  ;;  %v4903_v41 = vld [vmem:[%s5191_s29 + $0x90] ss:$2 sm:$0xff]  ;;  %v4919_v42 = vld [vmem:[%s5191_s29 + $0x91] ss:$2 sm:$0xff]  ;;  %v5262_v43 = vmax.f32 %v4902_v33, %v4918_v34  ;;  %v533_v11 = vld [vmem:[%s8418_s1 + $0x40] sm:$0xff] }
  0x24   : > { %464 = vrot.lane.b32.xlu1 %v407_v31, %s5088_s15  ;;  %v4904_v44 = vld [vmem:[%s5191_s29 + $0xa0] ss:$2 sm:$0xff]  ;;  %v4920_v45 = vld [vmem:[%s5191_s29 + $0xa1] ss:$2 sm:$0xff]  ;;  %v382_v51 = vrot.slane %v5249_v36, 1  ;;  %v383_v52 = vrot.slane %v5251_v37, 1  ;;  %v5282_v53 = vmax.f32 %v4903_v41, %v4919_v42 }
  0x25   : > { %v381_v40 = vrot.slane %v5241_v32, 1  ;;  %v406_v54 = vsel %vm394_vm0, %v379_v22, %v380_v39  ;;  %v5287_v55 = vmax.f32 %v4904_v44, %v4920_v45  ;;  %v384_v58 = vrot.slane %v5262_v43, 1  ;;  %v4905_v61 = vld [vmem:[%s5191_s29 + $0xb0] ss:$2 sm:$0xff]  ;;  %v4921_v5 = vld [vmem:[%s5191_s29 + $0xb1] ss:$2 sm:$0xff] }
  0x26   : > { %v535_v2 = vld [vmem:[%s8418_s1 + $0x50] sm:$0xff]  ;;  %v403_v3 = vsel %vm394_vm0, %v382_v51, %v383_v52  ;;  %v385_v4 = vrot.slane %v5282_v53, 1  ;;  %v769_v16 = vand.u32 4294901760, %v768_v63  ;;  %v5328_v17 = vand.u32 4294901760, %v537_v60  ;;  %v532_v18 = vld [vmem:[%s8418_s1 + $0x38] sm:$0xff] }
  0x27   : > { %v405_v48 = vsel %vm394_vm0, %v380_v39, %v381_v40  ;;  %v404_v12 = vsel %vm394_vm0, %v381_v40, %v382_v51  ;;  %v386_v13 = vrot.slane %v5287_v55, 1  ;;  %v402_v19 = vsel %vm394_vm0, %v383_v52, %v384_v58  ;;  %v4906_v40 = vld [vmem:[%s5191_s29 + $0xc0] ss:$2 sm:$0xff]  ;;  %v531_v44 = vld [vmem:[%s8418_s1 + $0x30] sm:$0xff]  ;;  %v4922_v56 = vld [vmem:[%s5191_s29 + $0xc1] ss:$2 sm:$0xff] }
  0x28   : > { %468 = vrot.lane.b32.xlu2 %v405_v48, %s5088_s15  ;;  %v773_v20 = vand.u32 4294901760, %v5316_v7  ;;  %v5340_v22 = vand.u32 4294901760, %v535_v2  ;;  %v5342_v24 = vmax.f32 %v4905_v61, %v4921_v5  ;;  %770 = vmatpush.msra.mxu1 %v769_v16  ;;  %v5345_v25 = vsub.f32 %v537_v60, %v5328_v17  ;;  %v4907_v48 = vld [vmem:[%s5191_s29 + $0xd0] ss:$2 sm:$0xff]  ;;  %v530_v52 = vld [vmem:[%s8418_s1 + $0x28] sm:$0xff] }
  0x29   : > { %1056 = vmatpush.msra.mxu3 %v5328_v17  ;;  %v5348_v27 = vand.u32 4294901760, %v534_v8  ;;  %v5350_v28 = vand.u32 4294901760, %v533_v11  ;;  %605 = vmatpush.msra.mxu0 %v5328_v17  ;;  %v5363_v33 = vand.u32 4294901760, %v532_v18  ;;  %v5369_v34 = vsel %vm394_vm0, %v385_v4, %v386_v13 }
  0x2a   : > { %v774_v29 = vsub.f32 %v5316_v7, %v773_v20  ;;  %v5360_v31 = vsub.f32 %v535_v2, %v5340_v22  ;;  %v401_v39 = vsel %vm394_vm0, %v384_v58, %v385_v4  ;;  %v779_v41 = vand.u32 4294901760, %v5345_v25  ;;  %931 = vmatpush.msra.mxu2 %v5345_v25  ;;  %v4923_v58 = vld [vmem:[%s5191_s29 + $0xd1] ss:$2 sm:$0xff]  ;;  %v4908_v2 = vld [vmem:[%s5191_s29 + $0xe0] ss:$2 sm:$0xff] }
  0x2b   : > { %462 = vrot.lane.b32.xlu0 %v408_v50, %s5088_s15  ;;  %v5377_v42 = vsub.f32 %v534_v8, %v5348_v27  ;;  %1058 = vmatpush.msra.mxu3 %v5338_v21  ;;  %v8429_v49 = vand.u32 4294901760, %v5357_v30  ;;  %v5387_v51 = vsub.f32 %v533_v11, %v5350_v28  ;;  %v5403_v62 = vsub.f32 %v532_v18, %v5363_v33  ;;  %v529_v18 = vld [vmem:[%s8418_s1 + $0x20] sm:$0xff] }
  0x2c   : > { %466 = vrot.lane.b32.xlu1 %v406_v54, %s5088_s15  ;;  %v775_v45 = vand.u32 4294901760, %v774_v29  ;;  %v8426_v50 = vand.u32 4294901760, %v5360_v31  ;;  %607 = vmatpush.msra.mxu0 %v5338_v21  ;;  %v387_v54 = vrot.slane %v5342_v24, 1  ;;  %v780_v60 = vsub.f32 %v5345_v25, %v779_v41 }
  0x2d   : > { %934 = vmatpush.msra.mxu2 %v5357_v30  ;;  %v8425_v61 = vand.u32 4294901760, %v5377_v42  ;;  %v786_v63 = vsub.f32 %v5357_v30, %v8429_v49  ;;  %v8427_v4 = vand.u32 4294901760, %v5387_v51  ;;  %v5415_v5 = vand.u32 4294901760, %v531_v44  ;;  %1060 = vmatpush.msra.mxu3 %v5340_v22 }
  0x2e   : > { %776 = vmatpush.msra.mxu1 %v775_v45  ;;  %v792_v0 = vsub.f32 %v5360_v31, %v8426_v50  ;;  %v781_v8 = vand.u32 4294901760, %v780_v60  ;;  %v5423_v16 = vand.u32 4294901760, %v530_v52  ;;  %v5431_v29 = vmax.f32 %v4906_v40, %v4922_v56  ;;  %609 = vmatpush.msra.mxu0 %v5340_v22  ;;  %v527_v50 = vld [vmem:[%s8418_s1 + $0x10] sm:$0xff] }
  0x2f   : > { %v798_v11 = vsub.f32 %v5377_v42, %v8425_v61  ;;  %937 = vmatpush.msra.mxu2 %v5360_v31  ;;  %v5433_v45 = vmax.f32 %v4907_v48, %v4923_v58  ;;  %v787_v60 = vand.u32 4294901760, %v786_v63  ;;  %v5437_v61 = vsub.f32 %v531_v44, %v5415_v5  ;;  %1062 = vmatpush.msra.mxu3 %v5348_v27 }
  0x30   : > { %470 = vrot.lane.b32.xlu2 %v404_v12, %s5088_s15  ;;  %v8428_v12 = vand.u32 4294901760, %v5403_v62  ;;  %v399_v40 = vsel %vm394_vm0, %v386_v13, %v387_v54  ;;  %782 = vmatpush.msra.mxu1 %v781_v8  ;;  %v793_v48 = vand.u32 4294901760, %v792_v0  ;;  %v804_v56 = vsub.f32 %v5387_v51, %v8427_v4 }
  0x31   : > { %940 = vmatpush.msra.mxu2 %v5377_v42  ;;  %v5453_v44 = vsub.f32 %v530_v52, %v5423_v16  ;;  %v8431_v63 = vand.u32 4294901760, %v5437_v61  ;;  %v5460_v13 = vand.u32 4294901760, %v529_v18  ;;  %v799_v8 = vand.u32 4294901760, %v798_v11  ;;  %1064 = vmatpush.msra.mxu3 %v5350_v28 }
  0x32   : > { %788 = vmatpush.msra.mxu1 %v787_v60  ;;  %v810_v4 = vsub.f32 %v5403_v62, %v8428_v12  ;;  %v5469_v52 = vand.u32 4294901760, %v527_v50  ;;  %611 = vmatpush.msra.mxu0 %v5348_v27  ;;  %v388_v11 = vrot.slane %v5431_v29, 1  ;;  %v805_v60 = vand.u32 4294901760, %v804_v56 }
  0x33   : > { %472 = vrot.lane.b32.xlu0 %v403_v3, %s5088_s15  ;;  %v4924_v3 = vld [vmem:[%s5191_s29 + $0xe1] ss:$2 sm:$0xff]  ;;  %943 = vmatpush.msra.mxu2 %v5387_v51  ;;  %v816_v12 = vsub.f32 %v5437_v61, %v8431_v63  ;;  %v8522_v35 = vand.u32 4294901760, %v5357_v30  ;;  %v8525_v47 = vand.u32 4294901760, %v5387_v51  ;;  %v8527_v7 = vand.u32 4294901760, %v5437_v61 }
  0x34   : > { %474 = vrot.lane.b32.xlu1 %v402_v19, %s5088_s15  ;;  %v528_v19 = vld [vmem:[%s8418_s1 + $0x18] sm:$0xff]  ;;  %v5456_v58 = vmax.f32 %v4908_v2, %v4924_v3  ;;  %v5474_v2 = vsub.f32 %v529_v18, %v5460_v13  ;;  %794 = vmatpush.msra.mxu1 %v793_v48  ;;  %v5486_v49 = vsub.f32 %v527_v50, %v5469_v52  ;;  %v389_v18 = vrot.slane %v5433_v45, 1 }
  0x35   : > { %v5462_v0 = vand.u32 4294901760, %v528_v19  ;;  %946 = vmatpush.msra.mxu2 %v5403_v62  ;;  %v811_v48 = vand.u32 4294901760, %v810_v4  ;;  %1066 = vmatpush.msra.mxu3 %v5363_v33  ;;  %v398_v50 = vsel %vm394_vm0, %v387_v54, %v388_v11  ;;  %vm4092_vm10 = vcmask 1047559  }
  0x36   : > { %800 = vmatpush.msra.mxu1 %v799_v8  ;;  %613 = vmatpush.msra.mxu0 %v5350_v28  ;;  %v817_v8 = vand.u32 4294901760, %v816_v12  ;;  %v397_v63 = vsel %vm394_vm0, %v388_v11, %v389_v18  ;;  %v8529_v25 = vand.u32 4294901760, %v5474_v2 }
  0x37   : > { %v5477_v3 = vsub.f32 %v528_v19, %v5462_v0  ;;  %v390_v19 = vrot.slane %v5456_v58, 1  ;;  %949 = vmatpush.msra.mxu2 %v5437_v61  ;;  %1068 = vmatpush.msra.mxu3 %v5415_v5 }
  0x38   : > { %476 = vrot.lane.b32.xlu2 %v401_v39, %s5088_s15  ;;  %v8430_v39 = vand.u32 4294901760, %v5453_v44  ;;  %806 = vmatpush.msra.mxu1 %v805_v60 }
  0x39   : > { %952 = vmatpush.msra.mxu2 %v5453_v44  ;;  %v396_v54 = vsel %vm394_vm0, %v389_v18, %v390_v19  ;;  %615 = vmatpush.msra.mxu0 %v5363_v33 }
  0x3a   : > { %v822_v56 = vsub.f32 %v5453_v44, %v8430_v39  ;;  %v8432_v39 = vand.u32 4294901760, %v5486_v49  ;;  %812 = vmatpush.msra.mxu1 %v811_v48  ;;  %1070 = vmatpush.msra.mxu3 %v5423_v16 }
  0x3b   : > { %478 = vrot.lane.b32.xlu0 %v5369_v34, %s5088_s15  ;;  %v8434_v34 = vand.u32 4294901760, %v5474_v2  ;;  %955 = vmatpush.msra.mxu2 %v5474_v2 }
  0x3c   : > { %480 = vrot.lane.b32.xlu1 %v399_v40, %s5088_s15  ;;  %v8433_v40 = vand.u32 4294901760, %v5477_v3  ;;  %v823_v12 = vand.u32 4294901760, %v822_v56  ;;  %818 = vmatpush.msra.mxu1 %v817_v8  ;;  %v840_v18 = vsub.f32 %v5486_v49, %v8432_v39  ;;  %v526_v56 = vld [vmem:[%s8418_s1 + $0x8] sm:$0xff]  ;;  %v525_v8 = vld [vmem:[%s8418_s1] sm:$0xff] }
  0x3d   : > { %v828_v4 = vsub.f32 %v5474_v2, %v8434_v34  ;;  %617 = vmatpush.msra.mxu0 %v5415_v5  ;;  %958 = vmatpush.msra.mxu2 %v5477_v3  ;;  %v546_v2 = vld [vmem:[%s8418_s1 + $0xa8] sm:$0xff] }
  0x3e   : > { %v834_v60 = vsub.f32 %v5477_v3, %v8433_v40  ;;  %824 = vmatpush.msra.mxu1 %v823_v12  ;;  %1072 = vmatpush.msra.mxu3 %v5460_v13 }
  0x3f   : > { %v829_v11 = vand.u32 4294901760, %v828_v4  ;;  %619 = vmatpush.msra.mxu0 %v5423_v16  ;;  %961 = vmatpush.msra.mxu2 %v5486_v49 }
  0x40   : > { %482 = vrot.lane.b32.xlu2 %v398_v50, %s5088_s15  ;;  %v835_v48 = vand.u32 4294901760, %v834_v60  ;;  %1074 = vmatpush.msra.mxu3 %v5462_v0  ;;  %v5541_v50 = vand.u32 4294901760, %v526_v56 }
  0x41   : > { %830 = vmatpush.msra.mxu1 %v829_v11  ;;  %621 = vmatpush.msra.mxu0 %v5460_v13  ;;  %v4909_v11 = vld [vmem:[%s5191_s29 + $0xf0] ss:$2 sm:$0xff] }
  0x42   : > { %1076 = vmatpush.msra.mxu3 %v5469_v52  ;;  %v844_v4 = vsub.f32 %v526_v56, %v5541_v50 }
  0x43   : > { %484 = vrot.lane.b32.xlu0 %v397_v63, %s5088_s15  ;;  %v841_v63 = vand.u32 4294901760, %v840_v18  ;;  %836 = vmatpush.msra.mxu1 %v835_v48  ;;  %v4925_v18 = vld [vmem:[%s5191_s29 + $0xf1] ss:$2 sm:$0xff]  ;;  %s287_s29 = sand.u32 1, %s5075_s25  }
  0x44   : > { %486 = vrot.lane.b32.xlu1 %v396_v54, %s5088_s15  ;;  %623 = vmatpush.msra.mxu0 %v5462_v0  ;;  %v5547_v54 = vand.u32 4294901760, %v525_v8  ;;  %v845_v12 = vand.u32 4294901760, %v844_v4  ;;  %s4892_s20 = sshll.u32 %s287_s29, 3 }
  0x45   : > { %842 = vmatpush.msra.mxu1 %v841_v63  ;;  %1078 = vmatpush.msra.mxu3 %v5541_v50  ;;  %v5556_v63 = vmax.f32 %v4909_v11, %v4925_v18  ;;  %s289_s8 = scalar_lea.vmem [#allocation6], %s4892_s20 }
  0x46   : > { %625 = vmatpush.msra.mxu0 %v5469_v52  ;;  %v850_v60 = vsub.f32 %v525_v8, %v5547_v54  ;;  %964 = vmatpush.msra.mxu2 %v844_v4  ;;  %v846_v48 = vsub.f32 %v844_v4, %v845_v12  ;;  %s4812_s9 = sshll.u32 %s289_s8, 4  ;;  %s4813_s9 = int_to_ptr.vmem [resolvable:$true] %s4812_s9 }
  0x47   : > { %1080 = vmatpush.msra.mxu3 %v5547_v54  ;;  %v391_v40 = vrot.slane %v5556_v63, 1 }
  0x48   : > { %627 = vmatpush.msra.mxu0 %v5541_v50  ;;  %v851_v56 = vand.u32 4294901760, %v850_v60  ;;  %967 = vmatpush.msra.mxu2 %v850_v60  ;;  %v847_v39 = vand.u32 4294901760, %v846_v48 }
  0x49   : > { %v410_v8 = vsel %vm394_vm0, %v391_v40, %v376_v14  ;;  %v8524_v14 = vand.u32 4294901760, %v5377_v42 }
  0x4a   : > { %629 = vmatpush.msra.mxu0 %v5547_v54  ;;  %v852_v34 = vsub.f32 %v850_v60, %v851_v56  ;;  %848 = vmatpush.msra.mxu1 %v847_v39 }
  0x4b   : > { %490 = vrot.lane.b32.xlu0 %v410_v8, %s5088_s15 }
  0x4c   : > { %1181 = vmatpush.msrb.mxu0 %v761_v46  ;;  %v853_v4 = vand.u32 4294901760, %v852_v34  ;;  %v8523_v46 = vand.u32 4294901760, %v5360_v31  ;;  %v8531_v31 = vand.u32 4294901760, %v5486_v49 }
  0x4e   : > { %1185 = vmatpush.msrb.mxu0 %v767_v57  ;;  %854 = vmatpush.msra.mxu1 %v853_v4  ;;  %v8526_v57 = vand.u32 4294901760, %v5403_v62 }
  0x50   : > { %1189 = vmatpush.msrb.mxu0 %v773_v20  ;;  %1308 = vmatpush.msrb.mxu1 %v5227_v26  ;;  %v548_v26 = vld [vmem:[%s8418_s1 + $0xb8] sm:$0xff] }
  0x52   : > { %1193 = vmatpush.msrb.mxu0 %v779_v41  ;;  %1310 = vmatpush.msrb.mxu1 %v5253_v38  ;;  %v5588_v38 = vand.u32 4294901760, %v548_v26 }
  0x54   : > { %1197 = vmatpush.msrb.mxu0 %v8522_v35  ;;  %1312 = vmatpush.msrb.mxu1 %v5294_v59  ;;  %v5595_v59 = vsub.f32 %v548_v26, %v5588_v38 }
  0x55   : > { %1413 = vmatpush.msrb.mxu2 %v5588_v38 }
  0x56   : > { %1201 = vmatpush.msrb.mxu0 %v8523_v46  ;;  %1314 = vmatpush.msrb.mxu1 %v5328_v17  ;;  %v395_v17 = vsel %vm394_vm0, %v390_v19, %v391_v40  ;;  %v1567_v20 = vand.u32 4294901760, %v5595_v59  ;;  %v5654_v19 = vand.u32 4294901760, %v546_v2 }
  0x57   : > { %488 = vrot.lane.b32.xlu2 %v395_v17, %s5088_s15  ;;  %s4927_s15 = sshll.u32 %s5150_s28, 3  ;;  %s4800_s28 = scalar_lea.sflag [#allocation5], %s287_s29 }
  0x58   : > { %1205 = vmatpush.msrb.mxu0 %v8524_v14  ;;  %1316 = vmatpush.msrb.mxu1 %v5338_v21  ;;  %v8528_v21 = vand.u32 4294901760, %v5453_v44  ;;  %v5665_v60 = vsub.f32 %v546_v2, %v5654_v19  ;;  %s4810_s23 = scalar_lea.hbm %s8424_s7, %s4927_s15 }
  0x59   : > { %s4814_s13 = sshll.u32 %s4810_s23, 4  ;;  %s4815_s13 = int_to_ptr.hbm [resolvable:$true] %s4814_s13 }
  0x5a   : > { %1209 = vmatpush.msrb.mxu0 %v8525_v47  ;;  %1318 = vmatpush.msrb.mxu1 %v5340_v22  ;;  %v1568_v22 = vsub.f32 %v5595_v59, %v1567_v20  ;;  %v1579_v48 = vand.u32 4294901760, %v5665_v60  ;;  %s5031_s14 = sshra.s32 %s4815_s13, 4  ;;  %s5032_s14 = int_to_ptr.hbm [resolvable:$true] %s5031_s14 }
  0x5b   : > { %s5033_s16 = scalar_lea.hbm %s5032_s14, 8  ;;  %p5038_p3 = scmp.lt.s32.totalorder %s5032_s14, %s8424_s7 }
  0x5c   : > { %1213 = vmatpush.msrb.mxu0 %v8526_v57  ;;  %1320 = vmatpush.msrb.mxu1 %v5348_v27  ;;  %v1569_v30 = vand.u32 4294901760, %v1568_v22  ;;  %v8530_v27 = vand.u32 4294901760, %v5477_v3  ;;  %v1580_v4 = vsub.f32 %v5665_v60, %v1579_v48  ;;  %p5034_p0 = scmp.ne.s32.totalorder %s5032_s14, %s5033_s16  ;;  %p5039_p4 = scmp.lt.s32.totalorder %s5037_s19, %s5033_s16 }
  0x5e   : > { %1217 = vmatpush.msrb.mxu0 %v8527_v7  ;;  %1322 = vmatpush.msrb.mxu1 %v5350_v28  ;;  %v547_v28 = vld [vmem:[%s8418_s1 + $0xb0] sm:$0xff]  ;;  %v1581_v26 = vand.u32 4294901760, %v1580_v4  ;;  %p5035_p1 = pnand %p5034_p0, %p5167_p5  ;;  %p5040_p7 = por %p5039_p4, %p5038_p3 }
  0x5f   : > { %1570 = vmatpush.msrb.mxu3 %v1569_v30  ;;  %v5624_v41 = vand.u32 4294901760, %v547_v28 }
  0x60   : > { %1221 = vmatpush.msrb.mxu0 %v8528_v21  ;;  %1324 = vmatpush.msrb.mxu1 %v5363_v33  ;;  %v545_v21 = vld [vmem:[%s8418_s1 + $0xa0] sm:$0xff]  ;;  %p5036_p2 = pneg %p5035_p1 }
  0x61   : > { %1415 = vmatpush.msrb.mxu2 %v5624_v41  ;;  %v5629_v33 = vsub.f32 %v547_v28, %v5624_v41  ;;  %v5686_v22 = vand.u32 4294901760, %v545_v21 }
  0x62   : > { %1225 = vmatpush.msrb.mxu0 %v8529_v25  ;;  %1326 = vmatpush.msrb.mxu1 %v5415_v5  ;;  %p5041_p8 = pnand %p5040_p7, %p5036_p2 }
  0x63   : > { %v1573_v42 = vand.u32 4294901760, %v5629_v33  ;;  %1417 = vmatpush.msrb.mxu2 %v5654_v19 }
  0x64   : > { %1229 = vmatpush.msrb.mxu0 %v8530_v27  ;;  %1328 = vmatpush.msrb.mxu1 %v5423_v16 }
  0x65   : > { %v1574_v49 = vsub.f32 %v5629_v33, %v1573_v42  ;;  %1419 = vmatpush.msrb.mxu2 %v5686_v22 }
  0x66   : > { %1233 = vmatpush.msrb.mxu0 %v8531_v31  ;;  %1330 = vmatpush.msrb.mxu1 %v5460_v13  ;;  %v5692_v31 = vsub.f32 %v545_v21, %v5686_v22 }
  0x67   : > { %v1575_v62 = vand.u32 4294901760, %v1574_v49 }
  0x68   : > { %1237 = vmatpush.msrb.mxu0 %v845_v12  ;;  %1332 = vmatpush.msrb.mxu1 %v5462_v0  ;;  %v1585_v49 = vand.u32 4294901760, %v5692_v31 }
  0x69   : > { %1576 = vmatpush.msrb.mxu3 %v1575_v62 }
  0x6a   : > { %1241 = vmatpush.msrb.mxu0 %v851_v56  ;;  %1334 = vmatpush.msrb.mxu1 %v5469_v52 }
  0x6b   : > { %1582 = vmatpush.msrb.mxu3 %v1581_v26 }
  0x6c   : > { %1336 = vmatpush.msrb.mxu1 %v5541_v50 }
  0x6e   : > { %1338 = vmatpush.msrb.mxu1 %v5547_v54 }
  0x82   : > { %v469_v47 = vpop.permute.xlu2 %468 }
  0x83   : > { %v513_v17 = vsel %vm508_vm1, %v5223_v23, %v469_v47 }
  0x84   : > { %v5688_v25 = vand.u32 4294901760, %v513_v17 }
  0x8a   : > { %v471_v28 = vpop.permute.xlu2 %470 }
  0x8b   : > { %v514_v62 = vsel %vm508_vm1, %v5241_v32, %v471_v28 }
  0x95   : > { %v461_v51 = vpop.permute.xlu0 %460 }
  0x96   : > { %v509_v61 = vsel %vm508_vm1, %v5199_v6, %v461_v51  ;;  %v465_v16 = vpop.permute.xlu1 %464  ;;  %v663_v51 = vsub.f32 %v513_v17, %v5688_v25 }
  0x97   : > { %v5640_v5 = vand.u32 4294901760, %v509_v61  ;;  %v511_v0 = vsel %vm508_vm1, %v5205_v10, %v465_v16  ;;  %v1586_v16 = vsub.f32 %v5692_v31, %v1585_v49 }
  0x98   : > { %v5658_v40 = vand.u32 4294901760, %v511_v0 }
  0x99   : > { %v631_v44 = vsub.f32 %v509_v61, %v5640_v5  ;;  %856 = vmatmul.f32.vlgmr.msra.gmra.mxu1 %v5640_v5 }
  0x9a   : > { %1800 = vmatpush.msra.mxu1 %v5588_v38  ;;  %v647_v11 = vsub.f32 %v511_v0, %v5658_v40 }
  0x9b   : > { %970 = vmatmul.f32.vlgmr.msra.gmra.mxu2 %v631_v44  ;;  %v632_v13 = vand.u32 4294901760, %v631_v44 }
  0x9c   : > { %1802 = vmatpush.msra.mxu1 %v5624_v41  ;;  %v648_v14 = vand.u32 4294901760, %v647_v11 }
  0x9d   : > { %1084 = vmatmul.f32.vlgmr.msra.gmra.mxu3 %v632_v13  ;;  %v463_v39 = vpop.permute.xlu0 %462  ;;  %v633_v52 = vsub.f32 %v631_v44, %v632_v13  ;;  %v1587_v44 = vand.u32 4294901760, %v1586_v16  ;;  %v5704_v13 = vand.u32 4294901760, %v514_v62 }
  0x9e   : > { %v510_v3 = vsel %vm508_vm1, %v5203_v9, %v463_v39  ;;  %1804 = vmatpush.msra.mxu1 %v5654_v19  ;;  %v467_v12 = vpop.permute.xlu1 %466  ;;  %v649_v7 = vsub.f32 %v647_v11, %v648_v14  ;;  %v664_v39 = vand.u32 4294901760, %v663_v51 }
  0x9f   : > { %v5656_v34 = vand.u32 4294901760, %v510_v3  ;;  %v634_v50 = vand.u32 4294901760, %v633_v52  ;;  %v512_v56 = vsel %vm508_vm1, %v5212_v15, %v467_v12  ;;  %1588 = vmatpush.msrb.mxu3 %v1587_v44  ;;  %v671_v2 = vsub.f32 %v514_v62, %v5704_v13  ;;  %v543_v62 = vld [vmem:[%s8418_s1 + $0x90] sm:$0xff] }
  0xa0   : > { %v5677_v35 = vand.u32 4294901760, %v512_v56  ;;  %v650_v30 = vand.u32 4294901760, %v649_v7  ;;  %1806 = vmatpush.msra.mxu1 %v5686_v22  ;;  %v5740_v16 = vand.u32 4294901760, %v543_v62 }
  0xa1   : > { %v639_v54 = vsub.f32 %v510_v3, %v5656_v34  ;;  %635 = vmatmul.f32.vlgmr.msra.gmra.mxu0 %v634_v50  ;;  %860 = vmatmul.f32.gmra.mxu1 %v5656_v34  ;;  %v665_v3 = vsub.f32 %v663_v51, %v664_v39 }
  0xa2   : > { %1688 = vmatpush.msra.mxu0 %v5595_v59  ;;  %v655_v57 = vsub.f32 %v512_v56, %v5677_v35  ;;  %v672_v56 = vand.u32 4294901760, %v671_v2 }
  0xa3   : > { %975 = vmatmul.f32.gmra.mxu2 %v639_v54  ;;  %v640_v18 = vand.u32 4294901760, %v639_v54 }
  0xa4   : > { %1691 = vmatpush.msra.mxu0 %v5629_v33  ;;  %v656_v27 = vand.u32 4294901760, %v655_v57  ;;  %v673_v47 = vsub.f32 %v671_v2, %v672_v56 }
  0xa5   : > { %1090 = vmatmul.f32.gmra.mxu3 %v640_v18  ;;  %v641_v8 = vsub.f32 %v639_v54, %v640_v18  ;;  %v473_v52 = vpop.permute.xlu0 %472  ;;  %v544_v54 = vld [vmem:[%s8418_s1 + $0x98] sm:$0xff] }
  0xa6   : > { %1694 = vmatpush.msra.mxu0 %v5665_v60  ;;  %v657_v61 = vsub.f32 %v655_v57, %v656_v27  ;;  %v515_v50 = vsel %vm508_vm1, %v5249_v36, %v473_v52  ;;  %v5713_v12 = vand.u32 4294901760, %v544_v54  ;;  %v475_v4 = vpop.permute.xlu1 %474  ;;  %v674_v21 = vand.u32 4294901760, %v673_v47 }
  0xa7   : > { %v642_v46 = vand.u32 4294901760, %v641_v8  ;;  %v5715_v18 = vand.u32 4294901760, %v515_v50  ;;  %v516_v26 = vsel %vm508_vm1, %v5251_v37, %v475_v4 }
  0xa8   : > { %1697 = vmatpush.msra.mxu0 %v5692_v31  ;;  %v658_v0 = vand.u32 4294901760, %v657_v61  ;;  %1421 = vmatpush.msrb.mxu2 %v5713_v12  ;;  %v5719_v8 = vsub.f32 %v544_v54, %v5713_v12  ;;  %v5731_v17 = vand.u32 4294901760, %v516_v26  ;;  %v412_v31 = vrot.slane %v5203_v9, 2 }
  0xa9   : > { %643 = vmatmul.f32.gmra.mxu0 %v642_v46  ;;  %864 = vmatmul.f32.gmra.mxu1 %v5658_v40 }
  0xaa   : > { %1808 = vmatpush.msra.mxu1 %v5713_v12  ;;  %v1591_v46 = vand.u32 4294901760, %v5719_v8  ;;  %1700 = vmatpush.msra.mxu0 %v5719_v8  ;;  %v687_v28 = vsub.f32 %v516_v26, %v5731_v17 }
  0xab   : > { %980 = vmatmul.f32.gmra.mxu2 %v647_v11  ;;  %v666_v11 = vand.u32 4294901760, %v665_v3 }
  0xac   : > { %1423 = vmatpush.msrb.mxu2 %v5740_v16  ;;  %1810 = vmatpush.msra.mxu1 %v5740_v16 }
  0xad   : > { %1096 = vmatmul.f32.gmra.mxu3 %v648_v14  ;;  %v679_v14 = vsub.f32 %v515_v50, %v5715_v18  ;;  %v479_v52 = vpop.permute.xlu0 %478 }
  0xb1   : > { %651 = vmatmul.f32.gmra.mxu0 %v650_v30  ;;  %868 = vmatmul.f32.gmra.mxu1 %v5677_v35  ;;  %v680_v30 = vand.u32 4294901760, %v679_v14 }
  0xb3   : > { %985 = vmatmul.f32.gmra.mxu2 %v655_v57  ;;  %v1592_v57 = vsub.f32 %v5719_v8, %v1591_v46 }
  0xb5   : > { %1102 = vmatmul.f32.gmra.mxu3 %v656_v27  ;;  %v1593_v7 = vand.u32 4294901760, %v1592_v57  ;;  %v477_v27 = vpop.permute.xlu2 %476  ;;  %v481_v57 = vpop.permute.xlu1 %480 }
  0xb6   : > { %v517_v61 = vsel %vm508_vm1, %v5262_v43, %v477_v27  ;;  %v542_v27 = vld [vmem:[%s8418_s1 + $0x88] sm:$0xff] }
  0xb7   : > { %1594 = vmatpush.msrb.mxu3 %v1593_v7  ;;  %v5742_v44 = vand.u32 4294901760, %v517_v61 }
  0xb9   : > { %659 = vmatmul.f32.gmra.mxu0 %v658_v0  ;;  %872 = vmatmul.f32.gmra.mxu1 %v5688_v25  ;;  %v695_v3 = vsub.f32 %v517_v61, %v5742_v44 }
  0xbb   : > { %990 = vmatmul.f32.gmra.mxu2 %v663_v51  ;;  %v681_v51 = vsub.f32 %v679_v14, %v680_v30  ;;  %v696_v47 = vand.u32 4294901760, %v695_v3 }
  0xbd   : > { %1108 = vmatmul.f32.gmra.mxu3 %v664_v39  ;;  %v682_v0 = vand.u32 4294901760, %v681_v51  ;;  %v688_v39 = vand.u32 4294901760, %v687_v28 }
  0xbf   : > { %v689_v50 = vsub.f32 %v687_v28, %v688_v39 }
  0xc1   : > { %667 = vmatmul.f32.gmra.mxu0 %v666_v11  ;;  %876 = vmatmul.f32.gmra.mxu1 %v5704_v13  ;;  %v518_v11 = vsel %vm508_vm1, %v5282_v53, %v479_v52  ;;  %v690_v4 = vand.u32 4294901760, %v689_v50 }
  0xc3   : > { %995 = vmatmul.f32.gmra.mxu2 %v671_v2  ;;  %v5748_v2 = vsub.f32 %v543_v62, %v5740_v16 }
  0xc5   : > { %1114 = vmatmul.f32.gmra.mxu3 %v672_v56  ;;  %v1597_v54 = vand.u32 4294901760, %v5748_v2  ;;  %1703 = vmatpush.msra.mxu0 %v5748_v2 }
  0xc7   : > { %v1598_v56 = vsub.f32 %v5748_v2, %v1597_v54 }
  0xc9   : > { %675 = vmatmul.f32.gmra.mxu0 %v674_v21  ;;  %880 = vmatmul.f32.gmra.mxu1 %v5715_v18  ;;  %v1599_v26 = vand.u32 4294901760, %v1598_v56  ;;  %v697_v21 = vsub.f32 %v695_v3, %v696_v47 }
  0xcb   : > { %1000 = vmatmul.f32.gmra.mxu2 %v679_v14  ;;  %v5758_v14 = vand.u32 4294901760, %v518_v11  ;;  %1600 = vmatpush.msrb.mxu3 %v1599_v26  ;;  %v698_v61 = vand.u32 4294901760, %v697_v21  ;;  %v485_v21 = vpop.permute.xlu0 %484 }
  0xcd   : > { %1120 = vmatmul.f32.gmra.mxu3 %v680_v30  ;;  %v703_v7 = vsub.f32 %v518_v11, %v5758_v14  ;;  %v519_v30 = vsel %vm508_vm1, %v5287_v55, %v481_v57 }
  0xce   : > { %v5769_v51 = vand.u32 4294901760, %v519_v30 }
  0xcf   : > { %v704_v62 = vand.u32 4294901760, %v703_v7 }
  0xd1   : > { %683 = vmatmul.f32.gmra.mxu0 %v682_v0  ;;  %884 = vmatmul.f32.gmra.mxu1 %v5731_v17  ;;  %v705_v50 = vsub.f32 %v703_v7, %v704_v62 }
  0xd3   : > { %1005 = vmatmul.f32.gmra.mxu2 %v687_v28  ;;  %v5767_v28 = vand.u32 4294901760, %v542_v27  ;;  %v706_v26 = vand.u32 4294901760, %v705_v50 }
  0xd5   : > { %1126 = vmatmul.f32.gmra.mxu3 %v688_v39  ;;  %1425 = vmatpush.msrb.mxu2 %v5767_v28  ;;  %v5773_v0 = vsub.f32 %v542_v27, %v5767_v28  ;;  %v483_v39 = vpop.permute.xlu2 %482  ;;  %v521_v27 = vsel %vm508_vm1, %v5431_v29, %v485_v21 }
  0xd6   : > { %1812 = vmatpush.msra.mxu1 %v5767_v28  ;;  %v520_v11 = vsel %vm508_vm1, %v5342_v24, %v483_v39  ;;  %v5796_v50 = vand.u32 4294901760, %v521_v27 }
  0xd7   : > { %v1603_v52 = vand.u32 4294901760, %v5773_v0  ;;  %1706 = vmatpush.msra.mxu0 %v5773_v0 }
  0xd9   : > { %691 = vmatmul.f32.gmra.mxu0 %v690_v4  ;;  %888 = vmatmul.f32.gmra.mxu1 %v5742_v44  ;;  %v1604_v56 = vsub.f32 %v5773_v0, %v1603_v52  ;;  %v413_v0 = vrot.slane %v5205_v10, 2 }
  0xdb   : > { %1010 = vmatmul.f32.gmra.mxu2 %v695_v3  ;;  %v711_v3 = vsub.f32 %v519_v30, %v5769_v51  ;;  %v1605_v4 = vand.u32 4294901760, %v1604_v56 }
  0xdd   : > { %1132 = vmatmul.f32.gmra.mxu3 %v696_v47  ;;  %v5785_v47 = vand.u32 4294901760, %v520_v11  ;;  %v712_v57 = vand.u32 4294901760, %v711_v3 }
  0xde   : > { %1606 = vmatpush.msrb.mxu3 %v1605_v4  ;;  %v727_v4 = vsub.f32 %v521_v27, %v5796_v50 }
  0xdf   : > { %v713_v30 = vsub.f32 %v711_v3, %v712_v57 }
  0xe1   : > { %699 = vmatmul.f32.gmra.mxu0 %v698_v61  ;;  %892 = vmatmul.f32.gmra.mxu1 %v5758_v14  ;;  %v541_v61 = vld [vmem:[%s8418_s1 + $0x80] sm:$0xff]  ;;  %v714_v39 = vand.u32 4294901760, %v713_v30 }
  0xe3   : > { %1015 = vmatmul.f32.gmra.mxu2 %v703_v7  ;;  %v719_v7 = vsub.f32 %v520_v11, %v5785_v47 }
  0xe5   : > { %1138 = vmatmul.f32.gmra.mxu3 %v704_v62  ;;  %v5794_v62 = vand.u32 4294901760, %v541_v61  ;;  %v720_v56 = vand.u32 4294901760, %v719_v7 }
  0xe7   : > { %1427 = vmatpush.msrb.mxu2 %v5794_v62  ;;  %1814 = vmatpush.msra.mxu1 %v5794_v62  ;;  %v1608_v11 = vsub.f32 %v541_v61, %v5794_v62 }
  0xe9   : > { %707 = vmatmul.f32.gmra.mxu0 %v706_v26  ;;  %896 = vmatmul.f32.gmra.mxu1 %v5769_v51  ;;  %v721_v26 = vsub.f32 %v719_v7, %v720_v56 }
  0xea   : > { %1923 = vmatpush.msra.mxu2 %v1567_v20  ;;  %1709 = vmatpush.msra.mxu0 %v1608_v11  ;;  %v728_v20 = vand.u32 4294901760, %v727_v4 }
  0xeb   : > { %1020 = vmatmul.f32.gmra.mxu2 %v711_v3  ;;  %v487_v3 = vpop.permute.xlu1 %486  ;;  %v722_v59 = vand.u32 4294901760, %v721_v26 }
  0xec   : > { %v522_v21 = vsel %vm508_vm1, %v5433_v45, %v487_v3  ;;  %1927 = vmatpush.msra.mxu2 %v1573_v42  ;;  %v729_v42 = vsub.f32 %v727_v4, %v728_v20  ;;  %v441_v3 = vsel %vm427_vm2, %v412_v31, %v413_v0 }
  0xed   : > { %1144 = vmatmul.f32.gmra.mxu3 %v712_v57  ;;  %v1609_v57 = vand.u32 4294901760, %v1608_v11  ;;  %v5811_v61 = vand.u32 4294901760, %v522_v21 }
  0xee   : > { %1931 = vmatpush.msra.mxu2 %v1579_v48  ;;  %v8448_v48 = vrot.slane %v5199_v6, 2 }
  0xef   : > { %v1610_v30 = vsub.f32 %v1608_v11, %v1609_v57  ;;  %v735_v33 = vsub.f32 %v522_v21, %v5811_v61  ;;  %v554_v11 = vsel %vm508_vm1, %v441_v3, 0 }
  0xf0   : > { %1935 = vmatpush.msra.mxu2 %v1585_v49  ;;  %v442_v9 = vsel %vm427_vm2, %v8448_v48, %v412_v31  ;;  %v5862_v21 = vand.u32 4294901760, %v554_v11 }
  0xf1   : > { %715 = vmatmul.f32.gmra.mxu0 %v714_v39  ;;  %900 = vmatmul.f32.gmra.mxu1 %v5785_v47  ;;  %v1611_v27 = vand.u32 4294901760, %v1610_v30  ;;  %v736_v8 = vand.u32 4294901760, %v735_v33 }
  0xf2   : > { %1939 = vmatpush.msra.mxu2 %v1591_v46  ;;  %v491_v46 = vpop.permute.xlu0 %490 }
  0xf3   : > { %1025 = vmatmul.f32.gmra.mxu2 %v719_v7  ;;  %v489_v7 = vpop.permute.xlu2 %488  ;;  %1612 = vmatpush.msrb.mxu3 %v1611_v27  ;;  %v737_v2 = vsub.f32 %v735_v33, %v736_v8  ;;  %v415_v27 = vrot.slane %v5223_v23, 2 }
  0xf4   : > { %v523_v60 = vsel %vm508_vm1, %v5456_v58, %v489_v7  ;;  %1943 = vmatpush.msra.mxu2 %v1597_v54  ;;  %v524_v54 = vsel %vm508_vm1, %v5556_v63, %v491_v46 }
  0xf5   : > { %1150 = vmatmul.f32.gmra.mxu3 %v720_v56  ;;  %v5830_v49 = vand.u32 4294901760, %v523_v60  ;;  %v5846_v39 = vand.u32 4294901760, %v524_v54 }
  0xf6   : > { %2026 = vmatpush.msra.mxu3 %v5588_v38  ;;  %1947 = vmatpush.msra.mxu2 %v1603_v52  ;;  %v730_v38 = vand.u32 4294901760, %v729_v42  ;;  %v738_v52 = vand.u32 4294901760, %v737_v2  ;;  %v416_v2 = vrot.slane %v5241_v32, 2 }
  0xf7   : > { %v751_v10 = vsub.f32 %v524_v54, %v5846_v39 }
  0xf8   : > { %2028 = vmatpush.msra.mxu3 %v5624_v41  ;;  %1951 = vmatpush.msra.mxu2 %v1609_v57  ;;  %v743_v41 = vsub.f32 %v523_v60, %v5830_v49 }
  0xf9   : > { %723 = vmatmul.f32.gmra.mxu0 %v722_v59  ;;  %904 = vmatmul.f32.gmra.mxu1 %v5796_v50  ;;  %v752_v26 = vand.u32 4294901760, %v751_v10 }
  0xfa   : > { %2030 = vmatpush.msra.mxu3 %v5654_v19  ;;  %v551_v19 = vsel %vm508_vm1, %v442_v9, 0 }
  0xfb   : > { %1030 = vmatmul.f32.gmra.mxu2 %v727_v4  ;;  %v5848_v56 = vand.u32 4294901760, %v551_v19  ;;  %v753_v30 = vsub.f32 %v751_v10, %v752_v26 }
  0xfc   : > { %2032 = vmatpush.msra.mxu3 %v5686_v22  ;;  %v744_v22 = vand.u32 4294901760, %v743_v41 }
  0xfd   : > { %1156 = vmatmul.f32.gmra.mxu3 %v728_v20 }
  0xfe   : > { %2034 = vmatpush.msra.mxu3 %v5713_v12  ;;  %v745_v12 = vsub.f32 %v743_v41, %v744_v22 }
 0x100   : > { %2036 = vmatpush.msra.mxu3 %v5740_v16  ;;  %v5857_v16 = vsub.f32 %v551_v19, %v5848_v56  ;;  %v746_v4 = vand.u32 4294901760, %v745_v12 }
 0x101   : > { %731 = vmatmul.f32.gmra.mxu0 %v730_v38  ;;  %908 = vmatmul.f32.gmra.mxu1 %v5811_v61  ;;  %v296_v38 = vld [vmem:[%s8422_s5] sm:$0xff] }
 0x102   : > { %2038 = vmatpush.msra.mxu3 %v5767_v28  ;;  %v414_v28 = vrot.slane %v5212_v15, 2  ;;  %v8446_v57 = vand.u32 4294901760, %v5857_v16  ;;  %v5871_v15 = vsub.f32 %v554_v11, %v5862_v21  ;;  %v5884_v46 = vperm.slane %v296_v38, 0 }
 0x103   : > { %1035 = vmatmul.f32.gmra.mxu2 %v735_v33  ;;  %v754_v33 = vand.u32 4294901760, %v753_v30 }
 0x104   : > { %2040 = vmatpush.msra.mxu3 %v5794_v62  ;;  %v440_v62 = vsel %vm427_vm2, %v413_v0, %v414_v28  ;;  %v1431_v59 = vsub.f32 %v5857_v16, %v8446_v57  ;;  %v8444_v60 = vand.u32 4294901760, %v5871_v15 }
 0x105   : > { %1162 = vmatmul.f32.gmra.mxu3 %v736_v8  ;;  %v557_v20 = vsel %vm508_vm1, %v440_v62, 0  ;;  %v439_v8 = vsel %vm427_vm2, %v414_v28, %v415_v27  ;;  %v438_v28 = vsel %vm427_vm2, %v415_v27, %v416_v2 }
 0x106   : > { %v1432_v42 = vand.u32 4294901760, %v1431_v59  ;;  %v5876_v31 = vand.u32 4294901760, %v557_v20  ;;  %v1439_v23 = vsub.f32 %v5871_v15, %v8444_v60  ;;  %v563_v62 = vsel %vm508_vm1, %v438_v28, 0 }
 0x107   : > { %v5916_v38 = vand.u32 4294901760, %v563_v62 }
 0x108   : > { %v5890_v9 = vsub.f32 %v557_v20, %v5876_v31 }
 0x109   : > { %739 = vmatmul.f32.gmra.mxu0 %v738_v52  ;;  %912 = vmatmul.f32.gmra.mxu1 %v5830_v49 }
 0x10a   : > { %v8442_v3 = vand.u32 4294901760, %v5890_v9 }
 0x10b   : > { %1040 = vmatmul.f32.gmra.mxu2 %v743_v41  ;;  %v560_v41 = vsel %vm508_vm1, %v439_v8, 0 }
 0x10d   : > { %1168 = vmatmul.f32.gmra.mxu3 %v744_v22  ;;  %v1440_v22 = vand.u32 4294901760, %v1439_v23 }
 0x111   : > { %747 = vmatmul.f32.gmra.mxu0 %v746_v4  ;;  %916 = vmatmul.f32.gmra.mxu1 %v5846_v39  ;;  %v1447_v4 = vsub.f32 %v5890_v9, %v8442_v3 }
 0x113   : > { %1045 = vmatmul.f32.gmra.mxu2 %v751_v10  ;;  %v5897_v10 = vand.u32 4294901760, %v560_v41 }
 0x115   : > { %1174 = vmatmul.f32.gmra.mxu3 %v752_v26  ;;  %v5907_v26 = vsub.f32 %v560_v41, %v5897_v10 }
 0x116   : > { %v857_v7 = vpop.f32.mrf.mxu1 }
 0x119   : > { %755 = vmatmul.f32.gmra.mxu0 %v754_v33  ;;  %1340 = vmatmul.f32.vlgmr.msrb.gmra.mxu1 %v5640_v5  ;;  %v1448_v33 = vand.u32 4294901760, %v1447_v4 }
 0x11b   : > { %1433 = vmatmul.f32.vlgmr.msrb.gmra.mxu2 %v1432_v42  ;;  %v8440_v42 = vand.u32 4294901760, %v5907_v26 }
 0x11d   : > { %1614 = vmatmul.f32.vlgmr.msrb.gmra.mxu3 %v5848_v56 }
 0x11e   : > { %v636_v54 = vpop.f32.mrf.mxu0  ;;  %v861_v19 = vpop.f32.mrf.mxu1 }
 0x11f   : > { %v637_v0 = vadd.f32 %v636_v54, %v5884_v46  ;;  %v971_v52 = vpop.f32.mrf.mxu2  ;;  %v1455_v54 = vsub.f32 %v5907_v26, %v8440_v42 }
 0x120   : > { %v1085_v12 = vpop.f32.mrf.mxu3 }
 0x121   : > { %v858_v11 = vadd.f32 %v857_v7, %v637_v0  ;;  %1243 = vmatmul.f32.vlgmr.msrb.gmra.mxu0 %v5640_v5  ;;  %1344 = vmatmul.f32.gmra.mxu1 %v5656_v34  ;;  %v417_v5 = vrot.slane %v5249_v36, 2  ;;  %v5926_v0 = vsub.f32 %v563_v62, %v5916_v38  ;;  %v1456_v28 = vand.u32 4294901760, %v1455_v54 }
 0x123   : > { %v972_v32 = vadd.f32 %v971_v52, %v858_v11  ;;  %1441 = vmatmul.f32.gmra.mxu2 %v1440_v22  ;;  %v437_v41 = vsel %vm427_vm2, %v416_v2, %v417_v5 }
 0x124   : > { %v566_v52 = vsel %vm508_vm1, %v437_v41, 0 }
 0x125   : > { %v5910_v30 = vadd.f32 %v1085_v12, %v972_v32  ;;  %1618 = vmatmul.f32.gmra.mxu3 %v5862_v21  ;;  %v8438_v32 = vand.u32 4294901760, %v5926_v0  ;;  %v5935_v4 = vand.u32 4294901760, %v566_v52 }
 0x126   : > { %v644_v59 = vpop.f32.mrf.mxu0  ;;  %v865_v20 = vpop.f32.mrf.mxu1 }
 0x127   : > { %v645_v27 = vadd.f32 %v644_v59, %v5884_v46  ;;  %v976_v7 = vpop.f32.mrf.mxu2 }
 0x128   : > { %v1091_v8 = vpop.f32.mrf.mxu3 }
 0x129   : > { %v862_v23 = vadd.f32 %v861_v19, %v645_v27  ;;  %1247 = vmatmul.f32.gmra.mxu0 %v5656_v34  ;;  %1348 = vmatmul.f32.gmra.mxu1 %v5658_v40  ;;  %v418_v34 = vrot.slane %v5251_v37, 2 }
 0x12b   : > { %v977_v36 = vadd.f32 %v976_v7, %v862_v23  ;;  %1449 = vmatmul.f32.gmra.mxu2 %v1448_v33  ;;  %v436_v27 = vsel %vm427_vm2, %v417_v5, %v418_v34  ;;  %v1463_v7 = vsub.f32 %v5926_v0, %v8438_v32  ;;  %v5945_v33 = vsub.f32 %v566_v52, %v5935_v4 }
 0x12d   : > { %v5929_v22 = vadd.f32 %v1091_v8, %v977_v36  ;;  %1622 = vmatmul.f32.gmra.mxu3 %v5876_v31  ;;  %v569_v8 = vsel %vm508_vm1, %v436_v27, 0  ;;  %v1464_v54 = vand.u32 4294901760, %v1463_v7 }
 0x12e   : > { %v652_v19 = vpop.f32.mrf.mxu0  ;;  %v869_v12 = vpop.f32.mrf.mxu1 }
 0x12f   : > { %v653_v2 = vadd.f32 %v652_v19, %v5884_v46  ;;  %v981_v11 = vpop.f32.mrf.mxu2  ;;  %v8436_v19 = vand.u32 4294901760, %v5945_v33 }
 0x130   : > { %v1097_v62 = vpop.f32.mrf.mxu3 }
 0x131   : > { %v866_v59 = vadd.f32 %v865_v20, %v653_v2  ;;  %1251 = vmatmul.f32.gmra.mxu0 %v5658_v40  ;;  %1352 = vmatmul.f32.gmra.mxu1 %v5677_v35  ;;  %v419_v40 = vrot.slane %v5262_v43, 2  ;;  %v5954_v2 = vand.u32 4294901760, %v569_v8 }
 0x133   : > { %v982_v37 = vadd.f32 %v981_v11, %v866_v59  ;;  %1457 = vmatmul.f32.gmra.mxu2 %v1456_v28  ;;  %v435_v28 = vsel %vm427_vm2, %v418_v34, %v419_v40  ;;  %v5964_v59 = vsub.f32 %v569_v8, %v5954_v2 }
 0x134   : > { %v572_v27 = vsel %vm508_vm1, %v435_v28, 0 }
 0x135   : > { %v5948_v23 = vadd.f32 %v1097_v62, %v982_v37  ;;  %1626 = vmatmul.f32.gmra.mxu3 %v5897_v10  ;;  %v1471_v62 = vsub.f32 %v5945_v33, %v8436_v19 }
 0x136   : > { %v660_v20 = vpop.f32.mrf.mxu0  ;;  %v873_v41 = vpop.f32.mrf.mxu1 }
 0x137   : > { %v661_v5 = vadd.f32 %v660_v20, %v5884_v46  ;;  %v986_v36 = vpop.f32.mrf.mxu2 }
 0x138   : > { %v1103_v52 = vpop.f32.mrf.mxu3 }
 0x139   : > { %v870_v11 = vadd.f32 %v869_v12, %v661_v5  ;;  %1255 = vmatmul.f32.gmra.mxu0 %v5677_v35  ;;  %1356 = vmatmul.f32.gmra.mxu1 %v5688_v25  ;;  %v420_v12 = vrot.slane %v5282_v53, 2  ;;  %v1472_v5 = vand.u32 4294901760, %v1471_v62 }
 0x13b   : > { %v987_v43 = vadd.f32 %v986_v36, %v870_v11  ;;  %1465 = vmatmul.f32.gmra.mxu2 %v1464_v54  ;;  %v8435_v36 = vand.u32 4294901760, %v5964_v59  ;;  %v5973_v54 = vand.u32 4294901760, %v572_v27  ;;  %v434_v53 = vsel %vm427_vm2, %v419_v40, %v420_v12 }
 0x13c   : > { %v575_v62 = vsel %vm508_vm1, %v434_v53, 0 }
 0x13d   : > { %v5968_v37 = vadd.f32 %v1103_v52, %v987_v43  ;;  %1630 = vmatmul.f32.gmra.mxu3 %v5916_v38  ;;  %v1479_v28 = vsub.f32 %v5964_v59, %v8435_v36  ;;  %v5983_v43 = vsub.f32 %v572_v27, %v5973_v54  ;;  %v5992_v36 = vand.u32 4294901760, %v575_v62 }
 0x13e   : > { %v668_v35 = vpop.f32.mrf.mxu0  ;;  %v877_v7 = vpop.f32.mrf.mxu1 }
 0x13f   : > { %v669_v34 = vadd.f32 %v668_v35, %v5884_v46  ;;  %v991_v20 = vpop.f32.mrf.mxu2 }
 0x140   : > { %v1109_v8 = vpop.f32.mrf.mxu3 }
 0x141   : > { %v874_v11 = vadd.f32 %v873_v41, %v669_v34  ;;  %1259 = vmatmul.f32.gmra.mxu0 %v5688_v25  ;;  %1360 = vmatmul.f32.gmra.mxu1 %v5704_v13  ;;  %v421_v41 = vrot.slane %v5287_v55, 2 }
 0x143   : > { %v992_v52 = vadd.f32 %v991_v20, %v874_v11  ;;  %1473 = vmatmul.f32.gmra.mxu2 %v1472_v5  ;;  %v1480_v5 = vand.u32 4294901760, %v1479_v28  ;;  %v8437_v11 = vand.u32 4294901760, %v5983_v43  ;;  %v433_v55 = vsel %vm427_vm2, %v420_v12, %v421_v41 }
 0x144   : > { %v578_v28 = vsel %vm508_vm1, %v433_v55, 0 }
 0x145   : > { %v5987_v35 = vadd.f32 %v1109_v8, %v992_v52  ;;  %1634 = vmatmul.f32.gmra.mxu3 %v5935_v4  ;;  %v1487_v53 = vsub.f32 %v5983_v43, %v8437_v11  ;;  %v6002_v52 = vsub.f32 %v575_v62, %v5992_v36  ;;  %v6011_v11 = vand.u32 4294901760, %v578_v28 }
 0x146   : > { %v676_v25 = vpop.f32.mrf.mxu0  ;;  %v881_v34 = vpop.f32.mrf.mxu1 }
 0x147   : > { %v677_v40 = vadd.f32 %v676_v25, %v5884_v46  ;;  %v996_v20 = vpop.f32.mrf.mxu2 }
 0x148   : > { %v1115_v27 = vpop.f32.mrf.mxu3 }
 0x149   : > { %v878_v19 = vadd.f32 %v877_v7, %v677_v40  ;;  %1263 = vmatmul.f32.gmra.mxu0 %v5704_v13  ;;  %1364 = vmatmul.f32.gmra.mxu1 %v5715_v18  ;;  %v422_v7 = vrot.slane %v5342_v24, 2 }
 0x14b   : > { %v997_v8 = vadd.f32 %v996_v20, %v878_v19  ;;  %1481 = vmatmul.f32.gmra.mxu2 %v1480_v5  ;;  %v1488_v20 = vand.u32 4294901760, %v1487_v53  ;;  %v8439_v5 = vand.u32 4294901760, %v6002_v52  ;;  %v432_v24 = vsel %vm427_vm2, %v421_v41, %v422_v7 }
 0x14c   : > { %v581_v53 = vsel %vm508_vm1, %v432_v24, 0 }
 0x14d   : > { %v6006_v25 = vadd.f32 %v1115_v27, %v997_v8  ;;  %1638 = vmatmul.f32.gmra.mxu3 %v5954_v2  ;;  %v1495_v55 = vsub.f32 %v6002_v52, %v8439_v5  ;;  %v6021_v8 = vsub.f32 %v578_v28, %v6011_v11  ;;  %v6030_v5 = vand.u32 4294901760, %v581_v53 }
 0x14e   : > { %v684_v13 = vpop.f32.mrf.mxu0  ;;  %v885_v40 = vpop.f32.mrf.mxu1 }
 0x14f   : > { %v685_v19 = vadd.f32 %v684_v13, %v5884_v46  ;;  %v1001_v12 = vpop.f32.mrf.mxu2 }
 0x150   : > { %v1121_v62 = vpop.f32.mrf.mxu3 }
 0x151   : > { %v882_v32 = vadd.f32 %v881_v34, %v685_v19  ;;  %1267 = vmatmul.f32.gmra.mxu0 %v5715_v18  ;;  %1368 = vmatmul.f32.gmra.mxu1 %v5731_v17  ;;  %v423_v34 = vrot.slane %v5431_v29, 2 }
 0x153   : > { %v1002_v27 = vadd.f32 %v1001_v12, %v882_v32  ;;  %1489 = vmatmul.f32.gmra.mxu2 %v1488_v20  ;;  %v1496_v12 = vand.u32 4294901760, %v1495_v55  ;;  %v8441_v20 = vand.u32 4294901760, %v6021_v8  ;;  %v431_v29 = vsel %vm427_vm2, %v422_v7, %v423_v34 }
 0x154   : > { %v584_v55 = vsel %vm508_vm1, %v431_v29, 0 }
 0x155   : > { %v6025_v13 = vadd.f32 %v1121_v62, %v1002_v27  ;;  %1642 = vmatmul.f32.gmra.mxu3 %v5973_v54  ;;  %v1503_v24 = vsub.f32 %v6021_v8, %v8441_v20  ;;  %v6040_v27 = vsub.f32 %v581_v53, %v6030_v5  ;;  %v6049_v20 = vand.u32 4294901760, %v584_v55 }
 0x156   : > { %v692_v18 = vpop.f32.mrf.mxu0  ;;  %v889_v19 = vpop.f32.mrf.mxu1 }
 0x157   : > { %v693_v32 = vadd.f32 %v692_v18, %v5884_v46  ;;  %v1006_v41 = vpop.f32.mrf.mxu2 }
 0x158   : > { %v1127_v28 = vpop.f32.mrf.mxu3 }
 0x159   : > { %v886_v42 = vadd.f32 %v885_v40, %v693_v32  ;;  %1271 = vmatmul.f32.gmra.mxu0 %v5731_v17  ;;  %1372 = vmatmul.f32.gmra.mxu1 %v5742_v44  ;;  %v424_v40 = vrot.slane %v5433_v45, 2 }
 0x15b   : > { %v1007_v62 = vadd.f32 %v1006_v41, %v886_v42  ;;  %1497 = vmatmul.f32.gmra.mxu2 %v1496_v12  ;;  %v1504_v41 = vand.u32 4294901760, %v1503_v24  ;;  %v8443_v12 = vand.u32 4294901760, %v6040_v27  ;;  %v430_v45 = vsel %vm427_vm2, %v423_v34, %v424_v40 }
 0x15c   : > { %v587_v24 = vsel %vm508_vm1, %v430_v45, 0 }
 0x15d   : > { %v6044_v18 = vadd.f32 %v1127_v28, %v1007_v62  ;;  %1646 = vmatmul.f32.gmra.mxu3 %v5992_v36  ;;  %v1511_v29 = vsub.f32 %v6040_v27, %v8443_v12  ;;  %v6059_v62 = vsub.f32 %v584_v55, %v6049_v20  ;;  %v6068_v12 = vand.u32 4294901760, %v587_v24 }
 0x15e   : > { %v700_v17 = vpop.f32.mrf.mxu0  ;;  %v893_v32 = vpop.f32.mrf.mxu1 }
 0x15f   : > { %v701_v42 = vadd.f32 %v700_v17, %v5884_v46  ;;  %v1011_v7 = vpop.f32.mrf.mxu2 }
 0x160   : > { %v1133_v53 = vpop.f32.mrf.mxu3 }
 0x161   : > { %v890_v3 = vadd.f32 %v889_v19, %v701_v42  ;;  %1275 = vmatmul.f32.gmra.mxu0 %v5742_v44  ;;  %1376 = vmatmul.f32.gmra.mxu1 %v5758_v14  ;;  %v425_v19 = vrot.slane %v5456_v58, 2 }
 0x163   : > { %v1012_v28 = vadd.f32 %v1011_v7, %v890_v3  ;;  %1505 = vmatmul.f32.gmra.mxu2 %v1504_v41  ;;  %v1512_v7 = vand.u32 4294901760, %v1511_v29  ;;  %v8445_v41 = vand.u32 4294901760, %v6059_v62  ;;  %v429_v58 = vsel %vm427_vm2, %v424_v40, %v425_v19 }
 0x164   : > { %v590_v29 = vsel %vm508_vm1, %v429_v58, 0 }
 0x165   : > { %v6063_v17 = vadd.f32 %v1133_v53, %v1012_v28  ;;  %1650 = vmatmul.f32.gmra.mxu3 %v6011_v11  ;;  %v1519_v45 = vsub.f32 %v6059_v62, %v8445_v41  ;;  %v6078_v28 = vsub.f32 %v587_v24, %v6068_v12  ;;  %v6087_v41 = vand.u32 4294901760, %v590_v29 }
 0x166   : > { %v708_v44 = vpop.f32.mrf.mxu0  ;;  %v897_v42 = vpop.f32.mrf.mxu1 }
 0x167   : > { %v709_v3 = vadd.f32 %v708_v44, %v5884_v46  ;;  %v1016_v34 = vpop.f32.mrf.mxu2 }
 0x168   : > { %v1139_v55 = vpop.f32.mrf.mxu3 }
 0x169   : > { %v894_v60 = vadd.f32 %v893_v32, %v709_v3  ;;  %1279 = vmatmul.f32.gmra.mxu0 %v5758_v14  ;;  %1380 = vmatmul.f32.gmra.mxu1 %v5769_v51  ;;  %v426_v32 = vrot.slane %v5556_v63, 2 }
 0x16b   : > { %v1017_v53 = vadd.f32 %v1016_v34, %v894_v60  ;;  %1513 = vmatmul.f32.gmra.mxu2 %v1512_v7  ;;  %v1520_v34 = vand.u32 4294901760, %v1519_v45  ;;  %v8447_v7 = vand.u32 4294901760, %v6078_v28  ;;  %v428_v63 = vsel %vm427_vm2, %v425_v19, %v426_v32 }
 0x16c   : > { %v593_v45 = vsel %vm508_vm1, %v428_v63, 0 }
 0x16d   : > { %v6082_v44 = vadd.f32 %v1139_v55, %v1017_v53  ;;  %1654 = vmatmul.f32.gmra.mxu3 %v6030_v5  ;;  %v1527_v58 = vsub.f32 %v6078_v28, %v8447_v7  ;;  %v6097_v53 = vsub.f32 %v590_v29, %v6087_v41  ;;  %v8533_v29 = vrot.slane %v5199_v6, 2 }
 0x16e   : > { %v716_v14 = vpop.f32.mrf.mxu0  ;;  %v901_v3 = vpop.f32.mrf.mxu1 }
 0x16f   : > { %v717_v60 = vadd.f32 %v716_v14, %v5884_v46  ;;  %v1021_v40 = vpop.f32.mrf.mxu2 }
 0x170   : > { %v1145_v24 = vpop.f32.mrf.mxu3 }
 0x171   : > { %v898_v57 = vadd.f32 %v897_v42, %v717_v60  ;;  %1283 = vmatmul.f32.gmra.mxu0 %v5769_v51  ;;  %1384 = vmatmul.f32.gmra.mxu1 %v5785_v47 }
 0x173   : > { %v1022_v55 = vadd.f32 %v1021_v40, %v898_v57  ;;  %1521 = vmatmul.f32.gmra.mxu2 %v1520_v34  ;;  %v1528_v57 = vand.u32 4294901760, %v1527_v58  ;;  %v8449_v40 = vand.u32 4294901760, %v6097_v53  ;;  %v6105_v34 = vand.u32 4294901760, %v593_v45 }
 0x175   : > { %v6100_v14 = vadd.f32 %v1145_v24, %v1022_v55  ;;  %1658 = vmatmul.f32.gmra.mxu3 %v6049_v20  ;;  %v443_v24 = vsel %vm427_vm2, %v426_v32, %v8533_v29  ;;  %v1535_v55 = vsub.f32 %v6097_v53, %v8449_v40  ;;  %v6117_v58 = vsub.f32 %v593_v45, %v6105_v34 }
 0x176   : > { %v724_v51 = vpop.f32.mrf.mxu0  ;;  %v905_v42 = vpop.f32.mrf.mxu1 }
 0x177   : > { %8532 = vst [vmem:[#allocation10_spill] sm:$0xff] %v6100_v14  ;;  %v725_v60 = vadd.f32 %v724_v51, %v5884_v46  ;;  %v1026_v19 = vpop.f32.mrf.mxu2 }
 0x178   : > { %v1151_v7 = vpop.f32.mrf.mxu3 }
 0x179   : > { %v902_v48 = vadd.f32 %v901_v3, %v725_v60  ;;  %1287 = vmatmul.f32.gmra.mxu0 %v5785_v47  ;;  %1388 = vmatmul.f32.gmra.mxu1 %v5796_v50  ;;  %v596_v3 = vsel %vm508_vm1, %v443_v24, 0 }
 0x17b   : > { %v1027_v63 = vadd.f32 %v1026_v19, %v902_v48  ;;  %1529 = vmatmul.f32.gmra.mxu2 %v1528_v57  ;;  %v1536_v48 = vand.u32 4294901760, %v1535_v55  ;;  %v8450_v19 = vand.u32 4294901760, %v6117_v58  ;;  %v6125_v57 = vand.u32 4294901760, %v596_v3 }
 0x17d   : > { %v6120_v51 = vadd.f32 %v1151_v7, %v1027_v63  ;;  %1662 = vmatmul.f32.gmra.mxu3 %v6068_v12  ;;  %v1543_v45 = vsub.f32 %v6117_v58, %v8450_v19  ;;  %v6133_v24 = vsub.f32 %v596_v3, %v6125_v57 }
 0x17e   : > { %v732_v47 = vpop.f32.mrf.mxu0  ;;  %v909_v6 = vpop.f32.mrf.mxu1 }
 0x17f   : > { %8534 = vst [vmem:[#allocation11_spill] sm:$0xff] %v6120_v51  ;;  %v733_v60 = vadd.f32 %v732_v47, %v5884_v46  ;;  %v1031_v32 = vpop.f32.mrf.mxu2 }
 0x180   : > { %v1157_v29 = vpop.f32.mrf.mxu3 }
 0x181   : > { %v906_v40 = vadd.f32 %v905_v42, %v733_v60  ;;  %1291 = vmatmul.f32.gmra.mxu0 %v5796_v50  ;;  %1392 = vmatmul.f32.gmra.mxu1 %v5811_v61  ;;  %v1544_v60 = vand.u32 4294901760, %v1543_v45 }
 0x183   : > { %v1032_v7 = vadd.f32 %v1031_v32, %v906_v40  ;;  %1537 = vmatmul.f32.gmra.mxu2 %v1536_v48  ;;  %v8451_v40 = vand.u32 4294901760, %v6133_v24 }
 0x185   : > { %v6135_v63 = vadd.f32 %v1157_v29, %v1032_v7  ;;  %1666 = vmatmul.f32.gmra.mxu3 %v6087_v41  ;;  %v1551_v29 = vsub.f32 %v6133_v24, %v8451_v40 }
 0x186   : > { %v740_v55 = vpop.f32.mrf.mxu0  ;;  %v913_v47 = vpop.f32.mrf.mxu1 }
 0x187   : > { %8535 = vst [vmem:[#allocation12_spill] sm:$0xff] %v6135_v63  ;;  %v741_v42 = vadd.f32 %v740_v55, %v5884_v46  ;;  %v1036_v50 = vpop.f32.mrf.mxu2 }
 0x188   : > { %v1163_v32 = vpop.f32.mrf.mxu3 }
 0x189   : > { %v910_v48 = vadd.f32 %v909_v6, %v741_v42  ;;  %1295 = vmatmul.f32.gmra.mxu0 %v5811_v61  ;;  %1396 = vmatmul.f32.gmra.mxu1 %v5830_v49  ;;  %v1552_v6 = vand.u32 4294901760, %v1551_v29 }
 0x18b   : > { %v1037_v3 = vadd.f32 %v1036_v50, %v910_v48  ;;  %1545 = vmatmul.f32.gmra.mxu2 %v1544_v60 }
 0x18d   : > { %v6145_v7 = vadd.f32 %v1163_v32, %v1037_v3  ;;  %1670 = vmatmul.f32.gmra.mxu3 %v6105_v34 }
 0x18e   : > { %v748_v55 = vpop.f32.mrf.mxu0  ;;  %v917_v45 = vpop.f32.mrf.mxu1 }
 0x18f   : > { %8536 = vst [vmem:[#allocation13_spill] sm:$0xff] %v6145_v7  ;;  %v749_v19 = vadd.f32 %v748_v55, %v5884_v46  ;;  %v1041_v63 = vpop.f32.mrf.mxu2 }
 0x190   : > { %v1169_v42 = vpop.f32.mrf.mxu3 }
 0x191   : > { %v914_v61 = vadd.f32 %v913_v47, %v749_v19  ;;  %1299 = vmatmul.f32.gmra.mxu0 %v5830_v49  ;;  %1400 = vmatmul.f32.gmra.mxu1 %v5846_v39  ;;  %v8538_v19 = vand.u32 4294901760, %v5857_v16 }
 0x193   : > { %v1042_v50 = vadd.f32 %v1041_v63, %v914_v61  ;;  %1553 = vmatmul.f32.gmra.mxu2 %v1552_v6 }
 0x195   : > { %v6151_v60 = vadd.f32 %v1169_v42, %v1042_v50  ;;  %1674 = vmatmul.f32.gmra.mxu3 %v6125_v57 }
 0x196   : > { %v756_v32 = vpop.f32.mrf.mxu0  ;;  %v1341_v48 = vpop.f32.mrf.mxu1 }
 0x197   : > { %8537 = vst [vmem:[#allocation14_spill] sm:$0xff] %v6151_v60  ;;  %v757_v3 = vadd.f32 %v756_v32, %v5884_v46  ;;  %v1046_v40 = vpop.f32.mrf.mxu2 }
 0x198   : > { %v1175_v55 = vpop.f32.mrf.mxu3 }
 0x199   : > { %v918_v7 = vadd.f32 %v917_v45, %v757_v3  ;;  %1303 = vmatmul.f32.gmra.mxu0 %v5846_v39  ;;  %1818 = vmatmul.f32.vlgmr.msra.gmra.mxu1 %v8538_v19  ;;  %v8540_v39 = vand.u32 4294901760, %v5871_v15 }
 0x19b   : > { %v1047_v49 = vadd.f32 %v1046_v40, %v918_v7  ;;  %1953 = vmatmul.f32.vlgmr.msra.gmra.mxu2 %v5848_v56 }
 0x19d   : > { %v6159_v63 = vadd.f32 %v1175_v55, %v1047_v49  ;;  %2042 = vmatmul.f32.vlgmr.msra.gmra.mxu3 %v5848_v56 }
 0x19e   : > { %v1244_v47 = vpop.f32.mrf.mxu0  ;;  %v1345_v29 = vpop.f32.mrf.mxu1 }
 0x19f   : > { %8539 = vst [vmem:[#allocation15_spill] sm:$0xff] %v6159_v63  ;;  %v1245_v6 = vadd.f32 %v1244_v47, %v5910_v30  ;;  %v1434_v46 = vpop.f32.mrf.mxu2 }
 0x1a0   : > { %v1615_v42 = vpop.f32.mrf.mxu3 }
 0x1a1   : > { %1712 = vmatmul.f32.vlgmr.msra.gmra.mxu0 %v5857_v16  ;;  %v1342_v45 = vadd.f32 %v1341_v48, %v1245_v6  ;;  %1824 = vmatmul.f32.gmra.mxu1 %v8540_v39  ;;  %v8541_v48 = vand.u32 4294901760, %v5890_v9 }
 0x1a3   : > { %v1435_v61 = vadd.f32 %v1434_v46, %v1342_v45  ;;  %1957 = vmatmul.f32.gmra.mxu2 %v5862_v21 }
 0x1a5   : > { %v6167_v40 = vadd.f32 %v1615_v42, %v1435_v61  ;;  %2046 = vmatmul.f32.gmra.mxu3 %v5862_v21  ;;  %v8543_v61 = vand.u32 4294901760, %v5926_v0 }
 0x1a6   : > { %v1248_v56 = vpop.f32.mrf.mxu0  ;;  %v1349_v7 = vpop.f32.mrf.mxu1 }
 0x1a7   : > { %v1249_v50 = vadd.f32 %v1248_v56, %v5929_v22  ;;  %v1442_v30 = vpop.f32.mrf.mxu2 }
 0x1a8   : > { %v1619_v32 = vpop.f32.mrf.mxu3 }
 0x1a9   : > { %1717 = vmatmul.f32.gmra.mxu0 %v5871_v15  ;;  %v1346_v16 = vadd.f32 %v1345_v29, %v1249_v50  ;;  %1830 = vmatmul.f32.gmra.mxu1 %v8541_v48  ;;  %v8542_v29 = vand.u32 4294901760, %v5907_v26 }
 0x1ab   : > { %v1443_v3 = vadd.f32 %v1442_v30, %v1346_v16  ;;  %1961 = vmatmul.f32.gmra.mxu2 %v5876_v31  ;;  %v8544_v16 = vand.u32 4294901760, %v5945_v33 }
 0x1ad   : > { %v6175_v55 = vadd.f32 %v1619_v32, %v1443_v3  ;;  %2050 = vmatmul.f32.gmra.mxu3 %v5876_v31 }
 0x1ae   : > { %v1252_v21 = vpop.f32.mrf.mxu0  ;;  %v1353_v19 = vpop.f32.mrf.mxu1 }
 0x1af   : > { %v1253_v49 = vadd.f32 %v1252_v21, %v5948_v23  ;;  %v1450_v22 = vpop.f32.mrf.mxu2 }
 0x1b0   : > { %v1623_v47 = vpop.f32.mrf.mxu3 }
 0x1b1   : > { %1722 = vmatmul.f32.gmra.mxu0 %v5890_v9  ;;  %v1350_v15 = vadd.f32 %v1349_v7, %v1253_v49  ;;  %1836 = vmatmul.f32.gmra.mxu1 %v8542_v29 }
 0x1b3   : > { %v1451_v6 = vadd.f32 %v1450_v22, %v1350_v15  ;;  %1965 = vmatmul.f32.gmra.mxu2 %v5897_v10  ;;  %v8545_v22 = vand.u32 4294901760, %v5964_v59 }
 0x1b5   : > { %v6183_v46 = vadd.f32 %v1623_v47, %v1451_v6  ;;  %2054 = vmatmul.f32.gmra.mxu3 %v5897_v10 }
 0x1b6   : > { %v1256_v31 = vpop.f32.mrf.mxu0  ;;  %v1357_v42 = vpop.f32.mrf.mxu1 }
 0x1b7   : > { %v1257_v45 = vadd.f32 %v1256_v31, %v5968_v37  ;;  %v1458_v23 = vpop.f32.mrf.mxu2 }
 0x1b8   : > { %v1627_v39 = vpop.f32.mrf.mxu3 }
 0x1b9   : > { %1727 = vmatmul.f32.gmra.mxu0 %v5907_v26  ;;  %v1354_v9 = vadd.f32 %v1353_v19, %v1257_v45  ;;  %1842 = vmatmul.f32.gmra.mxu1 %v8543_v61 }
 0x1bb   : > { %v1459_v56 = vadd.f32 %v1458_v23, %v1354_v9  ;;  %1969 = vmatmul.f32.gmra.mxu2 %v5916_v38 }
 0x1bd   : > { %v6191_v7 = vadd.f32 %v1627_v39, %v1459_v56  ;;  %2058 = vmatmul.f32.gmra.mxu3 %v5916_v38  ;;  %v8547_v56 = vand.u32 4294901760, %v6002_v52 }
 0x1be   : > { %v1260_v10 = vpop.f32.mrf.mxu0  ;;  %v1361_v50 = vpop.f32.mrf.mxu1 }
 0x1bf   : > { %v1261_v30 = vadd.f32 %v1260_v10, %v5987_v35  ;;  %v1466_v37 = vpop.f32.mrf.mxu2 }
 0x1c0   : > { %v1631_v32 = vpop.f32.mrf.mxu3 }
 0x1c1   : > { %1732 = vmatmul.f32.gmra.mxu0 %v5926_v0  ;;  %v1358_v26 = vadd.f32 %v1357_v42, %v1261_v30  ;;  %1848 = vmatmul.f32.gmra.mxu1 %v8544_v16  ;;  %v8546_v42 = vand.u32 4294901760, %v5983_v43 }
 0x1c3   : > { %v1467_v48 = vadd.f32 %v1466_v37, %v1358_v26  ;;  %1973 = vmatmul.f32.gmra.mxu2 %v5935_v4 }
 0x1c5   : > { %v6199_v3 = vadd.f32 %v1631_v32, %v1467_v48  ;;  %2062 = vmatmul.f32.gmra.mxu3 %v5935_v4 }
 0x1c6   : > { %v1264_v38 = vpop.f32.mrf.mxu0  ;;  %v1365_v21 = vpop.f32.mrf.mxu1 }
 0x1c7   : > { %v1265_v19 = vadd.f32 %v1264_v38, %v6006_v25  ;;  %v1474_v35 = vpop.f32.mrf.mxu2 }
 0x1c8   : > { %v1635_v49 = vpop.f32.mrf.mxu3 }
 0x1c9   : > { %1737 = vmatmul.f32.gmra.mxu0 %v5945_v33  ;;  %v1362_v0 = vadd.f32 %v1361_v50, %v1265_v19  ;;  %1854 = vmatmul.f32.gmra.mxu1 %v8545_v22 }
 0x1cb   : > { %v1475_v47 = vadd.f32 %v1474_v35, %v1362_v0  ;;  %1977 = vmatmul.f32.gmra.mxu2 %v5954_v2  ;;  %v2281_v35 = vld [vmem:[%s8419_s2 + $0x70] sm:$0xff] }
 0x1cc   : > { %v6276_v22 = vand.u32 4294901760, %v2281_v35 }
 0x1cd   : > { %v6207_v15 = vadd.f32 %v1635_v49, %v1475_v47  ;;  %2066 = vmatmul.f32.gmra.mxu3 %v5954_v2 }
 0x1ce   : > { %v1268_v4 = vpop.f32.mrf.mxu0  ;;  %v1369_v29 = vpop.f32.mrf.mxu1 }
 0x1cf   : > { %v1269_v6 = vadd.f32 %v1268_v4, %v6025_v13  ;;  %v1482_v25 = vpop.f32.mrf.mxu2 }
 0x1d0   : > { %v1639_v31 = vpop.f32.mrf.mxu3 }
 0x1d1   : > { %1742 = vmatmul.f32.gmra.mxu0 %v5964_v59  ;;  %v1366_v33 = vadd.f32 %v1365_v21, %v1269_v6  ;;  %1860 = vmatmul.f32.gmra.mxu1 %v8546_v42 }
 0x1d3   : > { %v1483_v45 = vadd.f32 %v1482_v25, %v1366_v33  ;;  %1981 = vmatmul.f32.gmra.mxu2 %v5973_v54 }
 0x1d5   : > { %v6215_v23 = vadd.f32 %v1639_v31, %v1483_v45  ;;  %2070 = vmatmul.f32.gmra.mxu3 %v5973_v54 }
 0x1d6   : > { %v1272_v2 = vpop.f32.mrf.mxu0  ;;  %v6218_v39 = vpop.f32.mrf.mxu1 }
 0x1d7   : > { %v1273_v13 = vadd.f32 %v1272_v2, %v6044_v18  ;;  %v1490_v9 = vpop.f32.mrf.mxu2 }
 0x1d8   : > { %v1643_v61 = vpop.f32.mrf.mxu3 }
 0x1d9   : > { %1747 = vmatmul.f32.gmra.mxu0 %v5983_v43  ;;  %v1370_v59 = vadd.f32 %v1369_v29, %v1273_v13  ;;  %1866 = vmatmul.f32.gmra.mxu1 %v8547_v56  ;;  %v8550_v43 = vand.u32 4294901760, %v6021_v8  ;;  %v8559_v29 = vand.u32 4294901760, %v6059_v62 }
 0x1db   : > { %v1491_v10 = vadd.f32 %v1490_v9, %v1370_v59  ;;  %1985 = vmatmul.f32.gmra.mxu2 %v5992_v36  ;;  %v8564_v9 = vand.u32 4294901760, %v6078_v28 }
 0x1dd   : > { %v6225_v50 = vadd.f32 %v1643_v61, %v1491_v10  ;;  %2074 = vmatmul.f32.gmra.mxu3 %v5992_v36  ;;  %v2282_v36 = vld [vmem:[%s8419_s2 + $0x78] sm:$0xff] }
 0x1de   : > { %v6228_v54 = vpop.f32.mrf.mxu0  ;;  %v6230_v30 = vpop.f32.mrf.mxu1  ;;  %v6248_v16 = vand.u32 4294901760, %v2282_v36 }
 0x1df   : > { %8548 = vst [vmem:[#allocation16_spill] sm:$0xff] %v6230_v30  ;;  %v6232_v18 = vpop.f32.mrf.mxu2 }
 0x1e0   : > { %v6234_v37 = vpop.f32.mrf.mxu3  ;;  %2317 = vmatpush.msrb.mxu0 %v6248_v16  ;;  %v6256_v38 = vsub.f32 %v2282_v36, %v6248_v16  ;;  %2632 = vmatpush.msrb.mxu3 %v6248_v16 }
 0x1e1   : > { %8549 = vst [vmem:[#allocation17_spill] sm:$0xff] %v6234_v37  ;;  %1752 = vmatmul.f32.gmra.mxu0 %v6002_v52  ;;  %1872 = vmatmul.f32.gmra.mxu1 %v8550_v43 }
 0x1e2   : > { %v8455_v21 = vand.u32 4294901760, %v6256_v38  ;;  %2544 = vmatpush.msrb.mxu2 %v6256_v38  ;;  %2319 = vmatpush.msrb.mxu0 %v6276_v22 }
 0x1e3   : > { %1989 = vmatmul.f32.gmra.mxu2 %v6011_v11  ;;  %2634 = vmatpush.msrb.mxu3 %v6276_v22 }
 0x1e4   : > { %v2416_v19 = vsub.f32 %v6256_v38, %v8455_v21  ;;  %v8579_v21 = vand.u32 4294901760, %v6133_v24 }
 0x1e5   : > { %2078 = vmatmul.f32.gmra.mxu3 %v6011_v11  ;;  %v8554_v11 = vand.u32 4294901760, %v6040_v27 }
 0x1e6   : > { %v6244_v32 = vpop.f32.mrf.mxu0  ;;  %v6246_v26 = vpop.f32.mrf.mxu1  ;;  %v2417_v0 = vand.u32 4294901760, %v2416_v19 }
 0x1e7   : > { %8551 = vst [vmem:[#allocation18_spill] sm:$0xff] %v6246_v26  ;;  %v6250_v48 = vpop.f32.mrf.mxu2 }
 0x1e8   : > { %8552 = vst [vmem:[#allocation19_spill] sm:$0xff] %v6250_v48  ;;  %v6252_v52 = vpop.f32.mrf.mxu3  ;;  %2418 = vmatpush.msrb.mxu1 %v2417_v0 }
 0x1e9   : > { %8553 = vst [vmem:[#allocation20_spill] sm:$0xff] %v6252_v52  ;;  %1757 = vmatmul.f32.gmra.mxu0 %v6021_v8  ;;  %1878 = vmatmul.f32.gmra.mxu1 %v8554_v11 }
 0x1eb   : > { %1993 = vmatmul.f32.gmra.mxu2 %v6030_v5 }
 0x1ed   : > { %2082 = vmatmul.f32.gmra.mxu3 %v6030_v5  ;;  %v6284_v5 = vsub.f32 %v2281_v35, %v6276_v22  ;;  %v8569_v35 = vand.u32 4294901760, %v6097_v53 }
 0x1ee   : > { %v6272_v8 = vpop.f32.mrf.mxu0  ;;  %v6274_v49 = vpop.f32.mrf.mxu1 }
 0x1ef   : > { %8555 = vst [vmem:[#allocation21_spill] sm:$0xff] %v6272_v8  ;;  %v6278_v47 = vpop.f32.mrf.mxu2  ;;  %v8454_v6 = vand.u32 4294901760, %v6284_v5  ;;  %2547 = vmatpush.msrb.mxu2 %v6284_v5  ;;  %v8585_v14 = vand.u32 4294901760, %v6284_v5 }
 0x1f0   : > { %8556 = vst [vmem:[#allocation22_spill] sm:$0xff] %v6274_v49  ;;  %v6280_v4 = vpop.f32.mrf.mxu3 }
 0x1f1   : > { %8557 = vst [vmem:[#allocation23_spill] sm:$0xff] %v6278_v47  ;;  %1762 = vmatmul.f32.gmra.mxu0 %v6040_v27  ;;  %1884 = vmatmul.f32.gmra.mxu1 %v8559_v29  ;;  %v2422_v25 = vsub.f32 %v6284_v5, %v8454_v6  ;;  %v2280_v27 = vld [vmem:[%s8419_s2 + $0x68] sm:$0xff] }
 0x1f2   : > { %8558 = vst [vmem:[#allocation24_spill] sm:$0xff] %v6280_v4  ;;  %v6304_v45 = vand.u32 4294901760, %v2280_v27 }
 0x1f3   : > { %1997 = vmatmul.f32.gmra.mxu2 %v6049_v20  ;;  %v2423_v42 = vand.u32 4294901760, %v2422_v25 }
 0x1f4   : > { %2321 = vmatpush.msrb.mxu0 %v6304_v45  ;;  %2636 = vmatpush.msrb.mxu3 %v6304_v45 }
 0x1f5   : > { %2086 = vmatmul.f32.gmra.mxu3 %v6049_v20  ;;  %2424 = vmatpush.msrb.mxu1 %v2423_v42  ;;  %v6312_v20 = vsub.f32 %v2280_v27, %v6304_v45 }
 0x1f6   : > { %v6300_v31 = vpop.f32.mrf.mxu0  ;;  %v6302_v33 = vpop.f32.mrf.mxu1 }
 0x1f7   : > { %8560 = vst [vmem:[#allocation25_spill] sm:$0xff] %v6300_v31  ;;  %v6306_v2 = vpop.f32.mrf.mxu2  ;;  %v8453_v61 = vand.u32 4294901760, %v6312_v20  ;;  %2550 = vmatpush.msrb.mxu2 %v6312_v20 }
 0x1f8   : > { %8561 = vst [vmem:[#allocation26_spill] sm:$0xff] %v6302_v33  ;;  %v6308_v13 = vpop.f32.mrf.mxu3 }
 0x1f9   : > { %8562 = vst [vmem:[#allocation27_spill] sm:$0xff] %v6306_v2  ;;  %1767 = vmatmul.f32.gmra.mxu0 %v6059_v62  ;;  %1890 = vmatmul.f32.gmra.mxu1 %v8564_v9  ;;  %v2428_v59 = vsub.f32 %v6312_v20, %v8453_v61  ;;  %v2279_v62 = vld [vmem:[%s8419_s2 + $0x60] sm:$0xff] }
 0x1fa   : > { %8563 = vst [vmem:[#allocation28_spill] sm:$0xff] %v6308_v13  ;;  %v6332_v36 = vand.u32 4294901760, %v2279_v62 }
 0x1fb   : > { %2001 = vmatmul.f32.gmra.mxu2 %v6068_v12  ;;  %v2429_v43 = vand.u32 4294901760, %v2428_v59  ;;  %v8574_v59 = vand.u32 4294901760, %v6117_v58 }
 0x1fc   : > { %2323 = vmatpush.msrb.mxu0 %v6332_v36  ;;  %2638 = vmatpush.msrb.mxu3 %v6332_v36 }
 0x1fd   : > { %2090 = vmatmul.f32.gmra.mxu3 %v6068_v12  ;;  %2430 = vmatpush.msrb.mxu1 %v2429_v43  ;;  %v6340_v12 = vsub.f32 %v2279_v62, %v6332_v36  ;;  %v2277_v43 = vld [vmem:[%s8419_s2 + $0x50] sm:$0xff] }
 0x1fe   : > { %v6328_v56 = vpop.f32.mrf.mxu0  ;;  %v6330_v10 = vpop.f32.mrf.mxu1 }
 0x1ff   : > { %8565 = vst [vmem:[#allocation29_spill] sm:$0xff] %v6328_v56  ;;  %v6334_v11 = vpop.f32.mrf.mxu2  ;;  %v8452_v0 = vand.u32 4294901760, %v6340_v12  ;;  %2553 = vmatpush.msrb.mxu2 %v6340_v12  ;;  %v8587_v5 = vand.u32 4294901760, %v6340_v12 }
 0x200   : > { %8566 = vst [vmem:[#allocation30_spill] sm:$0xff] %v6330_v10  ;;  %v6336_v19 = vpop.f32.mrf.mxu3 }
 0x201   : > { %8567 = vst [vmem:[#allocation31_spill] sm:$0xff] %v6334_v11  ;;  %1772 = vmatmul.f32.gmra.mxu0 %v6078_v28  ;;  %1896 = vmatmul.f32.gmra.mxu1 %v8569_v35  ;;  %v2434_v29 = vsub.f32 %v6340_v12, %v8452_v0 }
 0x202   : > { %8568 = vst [vmem:[#allocation32_spill] sm:$0xff] %v6336_v19 }
 0x203   : > { %2005 = vmatmul.f32.gmra.mxu2 %v6087_v41  ;;  %v2435_v27 = vand.u32 4294901760, %v2434_v29 }
 0x205   : > { %2094 = vmatmul.f32.gmra.mxu3 %v6087_v41  ;;  %2436 = vmatpush.msrb.mxu1 %v2435_v27  ;;  %v2278_v41 = vld [vmem:[%s8419_s2 + $0x58] sm:$0xff]  ;;  %v6382_v27 = vand.u32 4294901760, %v2277_v43 }
 0x206   : > { %v6353_v25 = vpop.f32.mrf.mxu0  ;;  %v6355_v28 = vpop.f32.mrf.mxu1  ;;  %v6368_v62 = vand.u32 4294901760, %v2278_v41 }
 0x207   : > { %8570 = vst [vmem:[#allocation33_spill] sm:$0xff] %v6353_v25  ;;  %v6357_v42 = vpop.f32.mrf.mxu2  ;;  %v6395_v6 = vsub.f32 %v2277_v43, %v6382_v27 }
 0x208   : > { %8571 = vst [vmem:[#allocation34_spill] sm:$0xff] %v6355_v28  ;;  %v6359_v9 = vpop.f32.mrf.mxu3  ;;  %2325 = vmatpush.msrb.mxu0 %v6368_v62  ;;  %v6380_v29 = vsub.f32 %v2278_v41, %v6368_v62  ;;  %2640 = vmatpush.msrb.mxu3 %v6368_v62 }
 0x209   : > { %8572 = vst [vmem:[#allocation35_spill] sm:$0xff] %v6357_v42  ;;  %1777 = vmatmul.f32.gmra.mxu0 %v6097_v53  ;;  %1902 = vmatmul.f32.gmra.mxu1 %v8574_v59  ;;  %v8457_v43 = vand.u32 4294901760, %v6395_v6 }
 0x20a   : > { %8573 = vst [vmem:[#allocation36_spill] sm:$0xff] %v6359_v9  ;;  %v8456_v61 = vand.u32 4294901760, %v6380_v29  ;;  %2327 = vmatpush.msrb.mxu0 %v6382_v27  ;;  %2556 = vmatpush.msrb.mxu2 %v6380_v29 }
 0x20b   : > { %2009 = vmatmul.f32.gmra.mxu2 %v6105_v34  ;;  %2642 = vmatpush.msrb.mxu3 %v6382_v27 }
 0x20c   : > { %v2440_v9 = vsub.f32 %v6380_v29, %v8456_v61  ;;  %2559 = vmatpush.msrb.mxu2 %v6395_v6 }
 0x20d   : > { %2098 = vmatmul.f32.gmra.mxu3 %v6105_v34  ;;  %v2276_v34 = vld [vmem:[%s8419_s2 + $0x48] sm:$0xff] }
 0x20e   : > { %v6374_v35 = vpop.f32.mrf.mxu0  ;;  %v6376_v53 = vpop.f32.mrf.mxu1  ;;  %v6397_v41 = vand.u32 4294901760, %v2276_v34  ;;  %v2441_v61 = vand.u32 4294901760, %v2440_v9  ;;  %v2273_v9 = vld [vmem:[%s8419_s2 + $0x30] sm:$0xff] }
 0x20f   : > { %8575 = vst [vmem:[#allocation37_spill] sm:$0xff] %v6374_v35  ;;  %v6385_v59 = vpop.f32.mrf.mxu2 }
 0x210   : > { %8576 = vst [vmem:[#allocation38_spill] sm:$0xff] %v6376_v53  ;;  %v6390_v0 = vpop.f32.mrf.mxu3  ;;  %2329 = vmatpush.msrb.mxu0 %v6397_v41  ;;  %v6412_v19 = vsub.f32 %v2276_v34, %v6397_v41  ;;  %v2446_v53 = vsub.f32 %v6395_v6, %v8457_v43  ;;  %2442 = vmatpush.msrb.mxu1 %v2441_v61  ;;  %v2272_v61 = vld [vmem:[%s8419_s2 + $0x28] sm:$0xff] }
 0x211   : > { %8577 = vst [vmem:[#allocation39_spill] sm:$0xff] %v6385_v59  ;;  %1782 = vmatmul.f32.gmra.mxu0 %v6117_v58  ;;  %1908 = vmatmul.f32.gmra.mxu1 %v8579_v21  ;;  %v2274_v21 = vld [vmem:[%s8419_s2 + $0x38] sm:$0xff] }
 0x212   : > { %8578 = vst [vmem:[#allocation40_spill] sm:$0xff] %v6390_v0  ;;  %v2275_v0 = vld [vmem:[%s8419_s2 + $0x40] sm:$0xff]  ;;  %2562 = vmatpush.msrb.mxu2 %v6412_v19  ;;  %v6432_v42 = vand.u32 4294901760, %v2274_v21  ;;  %v2447_v34 = vand.u32 4294901760, %v2446_v53  ;;  %2644 = vmatpush.msrb.mxu3 %v6397_v41 }
 0x213   : > { %v6415_v58 = vand.u32 4294901760, %v2275_v0  ;;  %2013 = vmatmul.f32.gmra.mxu2 %v6125_v57 }
 0x214   : > { %v6449_v10 = vsub.f32 %v2274_v21, %v6432_v42  ;;  %2448 = vmatpush.msrb.mxu1 %v2447_v34  ;;  %v6464_v21 = vand.u32 4294901760, %v2272_v61  ;;  %v2271_v34 = vld [vmem:[%s8419_s2 + $0x20] sm:$0xff] }
 0x215   : > { %v6427_v59 = vsub.f32 %v2275_v0, %v6415_v58  ;;  %2331 = vmatpush.msrb.mxu0 %v6415_v58  ;;  %2102 = vmatmul.f32.gmra.mxu3 %v6125_v57  ;;  %v8581_v0 = vand.u32 4294901760, %v6412_v19  ;;  %v6444_v57 = vand.u32 4294901760, %v2273_v9 }
 0x216   : > { %v6437_v11 = vpop.f32.mrf.mxu0  ;;  %v1819_v43 = vpop.f32.mrf.mxu1  ;;  %v8459_v33 = vand.u32 4294901760, %v6449_v10  ;;  %2646 = vmatpush.msrb.mxu3 %v6415_v58 }
 0x217   : > { %8580 = vst [vmem:[#allocation41_spill] sm:$0xff] %v6437_v11  ;;  %v2452_v13 = vsub.f32 %v6412_v19, %v8581_v0  ;;  %v8458_v63 = vand.u32 4294901760, %v6427_v59  ;;  %2565 = vmatpush.msrb.mxu2 %v6427_v59  ;;  %v6446_v28 = vpop.f32.mrf.mxu2  ;;  %2333 = vmatpush.msrb.mxu0 %v6432_v42 }
 0x218   : > { %8582 = vst [vmem:[#allocation42_spill] sm:$0xff] %v6446_v28  ;;  %v6456_v53 = vpop.f32.mrf.mxu3  ;;  %v6462_v28 = vsub.f32 %v2273_v9, %v6444_v57  ;;  %v6475_v9 = vsub.f32 %v2272_v61, %v6464_v21  ;;  %2648 = vmatpush.msrb.mxu3 %v6432_v42 }
 0x219   : > { %8583 = vst [vmem:[#allocation43_spill] sm:$0xff] %v6456_v53  ;;  %v2453_v0 = vand.u32 4294901760, %v2452_v13  ;;  %v2458_v11 = vsub.f32 %v6427_v59, %v8458_v63  ;;  %1787 = vmatmul.f32.gmra.mxu0 %v6133_v24  ;;  %2568 = vmatpush.msrb.mxu2 %v6449_v10  ;;  %v6477_v63 = vand.u32 4294901760, %v2271_v34  ;;  %v2464_v24 = vsub.f32 %v6449_v10, %v8459_v33 }
 0x21a   : > { %v8460_v53 = vand.u32 4294901760, %v6462_v28  ;;  %2335 = vmatpush.msrb.mxu0 %v6444_v57  ;;  %v8461_v61 = vand.u32 4294901760, %v6475_v9  ;;  %2650 = vmatpush.msrb.mxu3 %v6444_v57 }
 0x21b   : > { %2454 = vmatpush.msrb.mxu1 %v2453_v0  ;;  %v2459_v13 = vand.u32 4294901760, %v2458_v11  ;;  %2571 = vmatpush.msrb.mxu2 %v6462_v28  ;;  %v2270_v0 = vld [vmem:[%s8419_s2 + $0x18] sm:$0xff]  ;;  %v6493_v2 = vsub.f32 %v2271_v34, %v6477_v63  ;;  %v2465_v35 = vand.u32 4294901760, %v2464_v24 }
 0x21c   : > { %v2470_v11 = vsub.f32 %v6462_v28, %v8460_v53  ;;  %v6495_v33 = vand.u32 4294901760, %v2270_v0  ;;  %2337 = vmatpush.msrb.mxu0 %v6464_v21  ;;  %v2476_v56 = vsub.f32 %v6475_v9, %v8461_v61  ;;  %2652 = vmatpush.msrb.mxu3 %v6464_v21 }
 0x21d   : > { %2460 = vmatpush.msrb.mxu1 %v2459_v13  ;;  %2574 = vmatpush.msrb.mxu2 %v6475_v9  ;;  %v2269_v13 = vld [vmem:[%s8419_s2 + $0x10] sm:$0xff]  ;;  %v8462_v34 = vand.u32 4294901760, %v6493_v2 }
 0x21e   : > { %v1713_v60 = vpop.f32.mrf.mxu0  ;;  %v1825_v53 = vpop.f32.mrf.mxu1  ;;  %v2471_v25 = vand.u32 4294901760, %v2470_v11  ;;  %v6508_v24 = vsub.f32 %v2270_v0, %v6495_v33  ;;  %v6512_v31 = vand.u32 4294901760, %v2269_v13  ;;  %v2268_v11 = vld [vmem:[%s8419_s2 + $0x8] sm:$0xff]  ;;  %v2477_v51 = vand.u32 4294901760, %v2476_v56  ;;  %2339 = vmatpush.msrb.mxu0 %v6477_v63  ;;  %v2267_v56 = vld [vmem:[%s8419_s2] sm:$0xff]  ;;  %2654 = vmatpush.msrb.mxu3 %v6477_v63 }
 0x21f   : > { %v1714_v49 = vadd.f32 %v1713_v60, %v6167_v40  ;;  %v1954_v4 = vpop.f32.mrf.mxu2  ;;  %2466 = vmatpush.msrb.mxu1 %v2465_v35  ;;  %2577 = vmatpush.msrb.mxu2 %v6493_v2  ;;  %v2482_v47 = vsub.f32 %v6493_v2, %v8462_v34  ;;  %v6522_v60 = vand.u32 4294901760, %v2268_v11 }
 0x220   : > { %v2043_v61 = vpop.f32.mrf.mxu3  ;;  %v8463_v0 = vand.u32 4294901760, %v6508_v24  ;;  %v6526_v35 = vsub.f32 %v2269_v13, %v6512_v31  ;;  %2341 = vmatpush.msrb.mxu0 %v6495_v33  ;;  %2656 = vmatpush.msrb.mxu3 %v6495_v33 }
 0x221   : > { %v1820_v40 = vadd.f32 %v1819_v43, %v1714_v49  ;;  %2472 = vmatpush.msrb.mxu1 %v2471_v25  ;;  %2580 = vmatpush.msrb.mxu2 %v6508_v24  ;;  %v2483_v34 = vand.u32 4294901760, %v2482_v47  ;;  %v6537_v26 = vsub.f32 %v2268_v11, %v6522_v60  ;;  %v6539_v49 = vand.u32 4294901760, %v2267_v56 }
 0x222   : > { %v2488_v52 = vsub.f32 %v6508_v24, %v8463_v0  ;;  %v8464_v43 = vand.u32 4294901760, %v6526_v35  ;;  %2343 = vmatpush.msrb.mxu0 %v6512_v31  ;;  %2658 = vmatpush.msrb.mxu3 %v6512_v31 }
 0x223   : > { %v1955_v25 = vadd.f32 %v1954_v4, %v1820_v40  ;;  %2478 = vmatpush.msrb.mxu1 %v2477_v51  ;;  %2583 = vmatpush.msrb.mxu2 %v6526_v35  ;;  %v8465_v13 = vand.u32 4294901760, %v6537_v26  ;;  %v6547_v0 = vsub.f32 %v2267_v56, %v6539_v49 }
 0x224   : > { %v2489_v47 = vand.u32 4294901760, %v2488_v52  ;;  %v2494_v51 = vsub.f32 %v6526_v35, %v8464_v43  ;;  %2345 = vmatpush.msrb.mxu0 %v6522_v60  ;;  %2660 = vmatpush.msrb.mxu3 %v6522_v60 }
 0x225   : > { %v2044_v11 = vadd.f32 %v2043_v61, %v1955_v25  ;;  %2484 = vmatpush.msrb.mxu1 %v2483_v34  ;;  %2586 = vmatpush.msrb.mxu2 %v6537_v26  ;;  %v2500_v52 = vsub.f32 %v6537_v26, %v8465_v13  ;;  %v8466_v48 = vand.u32 4294901760, %v6547_v0 }
 0x226   : > { %v1718_v4 = vpop.f32.mrf.mxu0  ;;  %v1831_v40 = vpop.f32.mrf.mxu1  ;;  %v2495_v56 = vand.u32 4294901760, %v2494_v51  ;;  %2347 = vmatpush.msrb.mxu0 %v6539_v49  ;;  %v8584_v51 = vand.u32 4294901760, %v6256_v38  ;;  %2662 = vmatpush.msrb.mxu3 %v6539_v49 }
 0x227   : > { %v1719_v61 = vadd.f32 %v1718_v4, %v6175_v55  ;;  %v1958_v34 = vpop.f32.mrf.mxu2  ;;  %2490 = vmatpush.msrb.mxu1 %v2489_v47  ;;  %2589 = vmatpush.msrb.mxu2 %v6547_v0  ;;  %v2501_v43 = vand.u32 4294901760, %v2500_v52  ;;  %v2506_v8 = vsub.f32 %v6547_v0, %v8466_v48  ;;  %v2106_v13 = vmax.f32 %v2044_v11, 0.0  ;;  %v4984_v55 = vld [vmem:[%s8422_s5] sm:$0xff] }
 0x228   : > { %v2047_v25 = vpop.f32.mrf.mxu3  ;;  %v6570_v4 = vperm.slane %v4984_v55, 1  ;;  %2715 = vmatpush.msra.mxu0 %v8584_v51  ;;  %v6578_v30 = vperm.slane %v4984_v55, 2  ;;  %v8590_v55 = vand.u32 4294901760, %v6412_v19  ;;  %v8591_v51 = vand.u32 4294901760, %v6427_v59 }
 0x229   : > { %v1826_v47 = vadd.f32 %v1825_v53, %v1719_v61  ;;  %2496 = vmatpush.msrb.mxu1 %v2495_v56  ;;  %v2507_v52 = vand.u32 4294901760, %v2506_v8  ;;  %v8586_v53 = vand.u32 4294901760, %v6312_v20  ;;  %v8588_v56 = vand.u32 4294901760, %v6380_v29 }
 0x22a   : > { %2719 = vmatpush.msra.mxu0 %v8585_v14  ;;  %v2123_v11 = vmul.f32 %v6570_v4, %v2106_v13  ;;  %v8593_v59 = vand.u32 4294901760, %v6462_v28  ;;  %v8595_v28 = vand.u32 4294901760, %v6493_v2 }
 0x22b   : > { %v1959_v48 = vadd.f32 %v1958_v34, %v1826_v47  ;;  %2502 = vmatpush.msrb.mxu1 %v2501_v43 }
 0x22c   : > { %2723 = vmatpush.msra.mxu0 %v8586_v53  ;;  %v8592_v53 = vand.u32 4294901760, %v6449_v10 }
 0x22d   : > { %v2048_v37 = vadd.f32 %v2047_v25, %v1959_v48  ;;  %2508 = vmatpush.msrb.mxu1 %v2507_v52  ;;  %v6588_v48 = vadd.f32 %v6578_v30, %v2123_v11 }
 0x22e   : > { %v1723_v61 = vpop.f32.mrf.mxu0  ;;  %v1837_v38 = vpop.f32.mrf.mxu1  ;;  %2727 = vmatpush.msra.mxu0 %v8587_v5 }
 0x22f   : > { %2810 = vmatpush.msra.mxu1 %v6248_v16  ;;  %v2107_v8 = vmax.f32 %v2048_v37, 0.0  ;;  %v1724_v34 = vadd.f32 %v1723_v61, %v6183_v46  ;;  %v1962_v43 = vpop.f32.mrf.mxu2  ;;  %v8589_v16 = vand.u32 4294901760, %v6395_v6 }
 0x230   : > { %v2051_v14 = vpop.f32.mrf.mxu3  ;;  %2731 = vmatpush.msra.mxu0 %v8588_v56  ;;  %v8596_v56 = vand.u32 4294901760, %v6508_v24 }
 0x231   : > { %2812 = vmatpush.msra.mxu1 %v6276_v22  ;;  %v2124_v20 = vmul.f32 %v6570_v4, %v2107_v8  ;;  %v1832_v13 = vadd.f32 %v1831_v40, %v1724_v34  ;;  %v8470_v22 = vrot.slane %v6588_v48, 1 }
 0x232   : > { %2735 = vmatpush.msra.mxu0 %v8589_v16 }
 0x233   : > { %2814 = vmatpush.msra.mxu1 %v6304_v45  ;;  %v2141_v46 = vadd.f32 %v6578_v30, %v2124_v20  ;;  %v1963_v37 = vadd.f32 %v1962_v43, %v1832_v13 }
 0x234   : > { %2739 = vmatpush.msra.mxu0 %v8590_v55 }
 0x235   : > { %2816 = vmatpush.msra.mxu1 %v6332_v36  ;;  %v2157_v12 = vrot.slane %v2141_v46, 1  ;;  %v2052_v25 = vadd.f32 %v2051_v14, %v1963_v37  ;;  %v8597_v37 = vand.u32 4294901760, %v6526_v35  ;;  %v8599_v35 = vand.u32 4294901760, %v6547_v0 }
 0x236   : > { %v1728_v40 = vpop.f32.mrf.mxu0  ;;  %v1843_v29 = vpop.f32.mrf.mxu1  ;;  %2743 = vmatpush.msra.mxu0 %v8591_v51 }
 0x237   : > { %2818 = vmatpush.msra.mxu1 %v6368_v62  ;;  %v2186_v45 = vsel %vm394_vm0, %v8470_v22, %v2157_v12  ;;  %v2108_v6 = vmax.f32 %v2052_v25, 0.0  ;;  %v1729_v47 = vadd.f32 %v1728_v40, %v6191_v7  ;;  %v1966_v36 = vpop.f32.mrf.mxu2 }
 0x238   : > { %v2188_v52 = vmax.f32 %v6588_v48, %v2186_v45  ;;  %v2055_v19 = vpop.f32.mrf.mxu3  ;;  %2747 = vmatpush.msra.mxu0 %v8592_v53  ;;  %v1277_v53 = vadd.f32 %v6228_v54, %v6063_v17 }
 0x239   : > { %2820 = vmatpush.msra.mxu1 %v6382_v27  ;;  %v2125_v11 = vmul.f32 %v6570_v4, %v2108_v6  ;;  %v1838_v62 = vadd.f32 %v1837_v38, %v1729_v47  ;;  %v8594_v27 = vand.u32 4294901760, %v6475_v9 }
 0x23a   : > { %2204 = vst [vmem:[#allocation2] sm:$0xff] %v2188_v52  ;;  %2751 = vmatpush.msra.mxu0 %v8593_v59 }
 0x23b   : > { %2822 = vmatpush.msra.mxu1 %v6397_v41  ;;  %v2142_v7 = vadd.f32 %v6578_v30, %v2125_v11  ;;  %v1967_v61 = vadd.f32 %v1966_v36, %v1838_v62 }
 0x23c   : > { %2755 = vmatpush.msra.mxu0 %v8594_v27 }
 0x23d   : > { %2824 = vmatpush.msra.mxu1 %v6415_v58  ;;  %v2158_v8 = vrot.slane %v2142_v7, 1  ;;  %v2056_v34 = vadd.f32 %v2055_v19, %v1967_v61 }
 0x23e   : > { %v1733_v38 = vpop.f32.mrf.mxu0  ;;  %v1849_v43 = vpop.f32.mrf.mxu1  ;;  %2759 = vmatpush.msra.mxu0 %v8595_v28 }
 0x23f   : > { %2826 = vmatpush.msra.mxu1 %v6432_v42  ;;  %v2185_v10 = vsel %vm394_vm0, %v2157_v12, %v2158_v8  ;;  %v2109_v41 = vmax.f32 %v2056_v34, 0.0  ;;  %v1734_v5 = vadd.f32 %v1733_v38, %v6199_v3  ;;  %v1970_v14 = vpop.f32.mrf.mxu2 }
 0x240   : > { %v2189_v58 = vmax.f32 %v2141_v46, %v2185_v10  ;;  %v2059_v20 = vpop.f32.mrf.mxu3  ;;  %2763 = vmatpush.msra.mxu0 %v8596_v56 }
 0x241   : > { %2828 = vmatpush.msra.mxu1 %v6444_v57  ;;  %v2126_v9 = vmul.f32 %v6570_v4, %v2109_v41  ;;  %v1844_v13 = vadd.f32 %v1843_v29, %v1734_v5  ;;  %v8598_v57 = vand.u32 4294901760, %v6537_v26 }
 0x242   : > { %2205 = vst [vmem:[#allocation2 + $0x8] sm:$0xff] %v2189_v58  ;;  %2767 = vmatpush.msra.mxu0 %v8597_v37 }
 0x243   : > { %2830 = vmatpush.msra.mxu1 %v6464_v21  ;;  %v2143_v42 = vadd.f32 %v6578_v30, %v2126_v9  ;;  %v1971_v3 = vadd.f32 %v1970_v14, %v1844_v13  ;;  %v1281_v13 = vadd.f32 %v6244_v32, %v6082_v44 }
 0x244   : > { %2771 = vmatpush.msra.mxu0 %v8598_v57 }
 0x245   : > { %2832 = vmatpush.msra.mxu1 %v6477_v63  ;;  %v2159_v2 = vrot.slane %v2143_v42, 1  ;;  %v2060_v46 = vadd.f32 %v2059_v20, %v1971_v3 }
 0x246   : > { %v1738_v16 = vpop.f32.mrf.mxu0  ;;  %v1855_v12 = vpop.f32.mrf.mxu1  ;;  %2775 = vmatpush.msra.mxu0 %v8599_v35 }
 0x247   : > { %2834 = vmatpush.msra.mxu1 %v6495_v33  ;;  %v2184_v21 = vsel %vm394_vm0, %v2158_v8, %v2159_v2  ;;  %v2110_v24 = vmax.f32 %v2060_v46, 0.0  ;;  %v1739_v25 = vadd.f32 %v1738_v16, %v6207_v15  ;;  %v1974_v55 = vpop.f32.mrf.mxu2 }
 0x248   : > { %v2190_v63 = vmax.f32 %v2142_v7, %v2184_v21  ;;  %v2063_v40 = vpop.f32.mrf.mxu3 }
 0x249   : > { %2836 = vmatpush.msra.mxu1 %v6512_v31  ;;  %v2127_v26 = vmul.f32 %v6570_v4, %v2110_v24  ;;  %v1850_v29 = vadd.f32 %v1849_v43, %v1739_v25  ;;  %v6646_v45 = vld [vmem:[#allocation2] ss:$2 sm:$0xff]  ;;  %v1374_v43 = vadd.f32 %v6218_v39, %v1277_v53 }
 0x24a   : > { %2206 = vst [vmem:[#allocation2 + $0x10] sm:$0xff] %v2190_v63  ;;  %v6649_v33 = vand.u32 4294901760, %v6646_v45  ;;  %v8467_v39 = vrot.slane %v6646_v45, 1  ;;  %v8603_v24 = vld [vmem:[#allocation16_spill] sm:$0xff]  ;;  %v8604_v63 = vld [vmem:[#allocation10_spill] sm:$0xff] }
 0x24b   : > { %2838 = vmatpush.msra.mxu1 %v6522_v60  ;;  %v2144_v15 = vadd.f32 %v6578_v30, %v2127_v26  ;;  %v1975_v6 = vadd.f32 %v1974_v55, %v1850_v29  ;;  %v1499_v58 = vadd.f32 %v6232_v18, %v1374_v43  ;;  %v8468_v18 = vrot.slane %v6646_v45, 2 }
 0x24c   : > { %2510 = vmatmul.f32.vlgmr.msrb.gmra.mxu1 %v6649_v33  ;;  %v2349_v0 = vsub.f32 %v6646_v45, %v6649_v33  ;;  %v1378_v25 = vadd.f32 %v8603_v24, %v1281_v13 }
 0x24d   : > { %v2160_v31 = vrot.slane %v2144_v15, 1  ;;  %v2064_v47 = vadd.f32 %v2063_v40, %v1975_v6  ;;  %2840 = vmatpush.msra.mxu1 %v6539_v49  ;;  %v8605_v40 = vld [vmem:[#allocation21_spill] sm:$0xff] }
 0x24e   : > { %v1743_v36 = vpop.f32.mrf.mxu0  ;;  %2592 = vmatmul.f32.vlgmr.msrb.gmra.mxu2 %v2349_v0  ;;  %v2350_v51 = vand.u32 4294901760, %v2349_v0  ;;  %v1861_v52 = vpop.f32.mrf.mxu1  ;;  %v1285_v26 = vadd.f32 %v8605_v40, %v8604_v63 }
 0x24f   : > { %v2183_v19 = vsel %vm394_vm0, %v2159_v2, %v2160_v31  ;;  %v2111_v60 = vmax.f32 %v2064_v47, 0.0  ;;  %v1744_v11 = vadd.f32 %v1743_v36, %v6215_v23  ;;  %v1978_v62 = vpop.f32.mrf.mxu2 }
 0x250   : > { %v2191_v7 = vmax.f32 %v2143_v42, %v2183_v19  ;;  %2666 = vmatmul.f32.vlgmr.msrb.gmra.mxu3 %v2350_v51  ;;  %v2067_v61 = vpop.f32.mrf.mxu3  ;;  %v2351_v59 = vsub.f32 %v2349_v0, %v2350_v51 }
 0x251   : > { %v2128_v49 = vmul.f32 %v6570_v4, %v2111_v60  ;;  %v1856_v8 = vadd.f32 %v1855_v12, %v1744_v11  ;;  %v8602_v12 = vld [vmem:[#allocation17_spill] sm:$0xff]  ;;  %v8606_v60 = vld [vmem:[#allocation19_spill] sm:$0xff] }
 0x252   : > { %2207 = vst [vmem:[#allocation2 + $0x18] sm:$0xff] %v2191_v7  ;;  %v2352_v34 = vand.u32 4294901760, %v2351_v59  ;;  %v1648_v21 = vadd.f32 %v8602_v12, %v1499_v58  ;;  %v1507_v11 = vadd.f32 %v8606_v60, %v1378_v25  ;;  %v8607_v7 = vld [vmem:[#allocation18_spill] sm:$0xff]  ;;  %v8613_v25 = vld [vmem:[#allocation24_spill] sm:$0xff] }
 0x253   : > { %v2145_v27 = vadd.f32 %v6578_v30, %v2128_v49  ;;  %v1979_v38 = vadd.f32 %v1978_v62, %v1856_v8 }
 0x254   : > { %2353 = vmatmul.f32.vlgmr.msrb.gmra.mxu0 %v2352_v34  ;;  %v8608_v34 = vld [vmem:[#allocation20_spill] sm:$0xff] }
 0x255   : > { %v2161_v23 = vrot.slane %v2145_v27, 1  ;;  %v2068_v10 = vadd.f32 %v2067_v61, %v1979_v38  ;;  %v1382_v61 = vadd.f32 %v8607_v7, %v1285_v26  ;;  %v1652_v38 = vadd.f32 %v8608_v34, %v1507_v11  ;;  %v8615_v26 = vld [vmem:[#allocation12_spill] sm:$0xff] }
 0x256   : > { %v1748_v41 = vpop.f32.mrf.mxu0  ;;  %v1867_v5 = vpop.f32.mrf.mxu1 }
 0x257   : > { %v2182_v17 = vsel %vm394_vm0, %v2160_v31, %v2161_v23  ;;  %v2112_v54 = vmax.f32 %v2068_v10, 0.0  ;;  %v1749_v14 = vadd.f32 %v1748_v41, %v6225_v50  ;;  %v1982_v28 = vpop.f32.mrf.mxu2 }
 0x258   : > { %v2192_v20 = vmax.f32 %v2144_v15, %v2182_v17  ;;  %v2071_v9 = vpop.f32.mrf.mxu3 }
 0x259   : > { %v2129_v56 = vmul.f32 %v6570_v4, %v2112_v54  ;;  %v1862_v42 = vadd.f32 %v1861_v52, %v1749_v14  ;;  %v6673_v3 = vld [vmem:[#allocation2 + $0x10] ss:$2 sm:$0xff]  ;;  %v8610_v54 = vld [vmem:[#allocation11_spill] sm:$0xff] }
 0x25a   : > { %2208 = vst [vmem:[#allocation2 + $0x20] sm:$0xff] %v2192_v20  ;;  %v2236_v37 = vrot.slane %v6673_v3, 1  ;;  %v2252_v50 = vrot.slane %v6673_v3, 2  ;;  %v6678_v2 = vand.u32 4294901760, %v6673_v3  ;;  %v8611_v14 = vld [vmem:[#allocation25_spill] sm:$0xff] }
 0x25b   : > { %v2146_v46 = vadd.f32 %v6578_v30, %v2129_v56  ;;  %v1983_v44 = vadd.f32 %v1982_v28, %v1862_v42  ;;  %v1289_v28 = vadd.f32 %v8611_v14, %v8610_v54  ;;  %v8624_v54 = vld [vmem:[#allocation30_spill] sm:$0xff] }
 0x25c   : > { %8600 = vst [vmem:[#allocation44_spill] sm:$0xff] %v6678_v2  ;;  %2514 = vmatmul.f32.gmra.mxu1 %v6678_v2  ;;  %v2357_v32 = vsub.f32 %v6673_v3, %v6678_v2  ;;  %v6691_v57 = vsel %vm394_vm0, %v8467_v39, %v2236_v37  ;;  %v6699_v16 = vsel %vm427_vm2, %v8468_v18, %v2252_v50 }
 0x25d   : > { %8601 = vst [vmem:[#allocation45_spill] sm:$0xff] %v6699_v16  ;;  %v2162_v55 = vrot.slane %v2146_v46, 1  ;;  %v2072_v35 = vadd.f32 %v2071_v9, %v1983_v44 }
 0x25e   : > { %v1753_v29 = vpop.f32.mrf.mxu0  ;;  %2597 = vmatmul.f32.gmra.mxu2 %v2357_v32  ;;  %v2358_v15 = vand.u32 4294901760, %v2357_v32  ;;  %v1873_v6 = vpop.f32.mrf.mxu1 }
 0x25f   : > { %v2181_v0 = vsel %vm394_vm0, %v2161_v23, %v2162_v55  ;;  %v2113_v31 = vmax.f32 %v2072_v35, 0.0  ;;  %v1754_v47 = vadd.f32 %v1753_v29, %v1648_v21  ;;  %v1986_v36 = vpop.f32.mrf.mxu2  ;;  %v8609_v23 = vld [vmem:[#allocation23_spill] sm:$0xff]  ;;  %v8614_v35 = vld [vmem:[#allocation22_spill] sm:$0xff]  ;;  %v8616_v29 = vld [vmem:[#allocation29_spill] sm:$0xff] }
 0x260   : > { %v2193_v51 = vmax.f32 %v2145_v27, %v2181_v0  ;;  %2672 = vmatmul.f32.gmra.mxu3 %v2358_v15  ;;  %v2075_v52 = vpop.f32.mrf.mxu3  ;;  %v2359_v19 = vsub.f32 %v2357_v32, %v2358_v15  ;;  %v1515_v10 = vadd.f32 %v8609_v23, %v1382_v61  ;;  %v1386_v63 = vadd.f32 %v8614_v35, %v1289_v28  ;;  %v8625_v28 = vld [vmem:[#allocation34_spill] sm:$0xff] }
 0x261   : > { %v2130_v62 = vmul.f32 %v6570_v4, %v2113_v31  ;;  %v1868_v53 = vadd.f32 %v1867_v5, %v1754_v47  ;;  %v1293_v15 = vadd.f32 %v8616_v29, %v8615_v26  ;;  %v8618_v47 = vld [vmem:[#allocation13_spill] sm:$0xff]  ;;  %v8631_v26 = vld [vmem:[#allocation39_spill] sm:$0xff] }
 0x262   : > { %2209 = vst [vmem:[#allocation2 + $0x28] sm:$0xff] %v2193_v51  ;;  %v2360_v59 = vand.u32 4294901760, %v2359_v19  ;;  %v8621_v19 = vld [vmem:[#allocation37_spill] sm:$0xff] }
 0x263   : > { %v2147_v49 = vadd.f32 %v6578_v30, %v2130_v62  ;;  %v1987_v8 = vadd.f32 %v1986_v36, %v1868_v53  ;;  %v8619_v36 = vld [vmem:[#allocation33_spill] sm:$0xff] }
 0x264   : > { %2361 = vmatmul.f32.gmra.mxu0 %v2360_v59  ;;  %v1297_v51 = vadd.f32 %v8619_v36, %v8618_v47  ;;  %v8632_v47 = vld [vmem:[#allocation38_spill] sm:$0xff] }
 0x265   : > { %v2163_v43 = vrot.slane %v2147_v49, 1  ;;  %v2076_v27 = vadd.f32 %v2075_v52, %v1987_v8  ;;  %v8620_v52 = vld [vmem:[#allocation14_spill] sm:$0xff] }
 0x266   : > { %v1758_v41 = vpop.f32.mrf.mxu0  ;;  %v1879_v17 = vpop.f32.mrf.mxu1  ;;  %v1301_v60 = vadd.f32 %v8621_v19, %v8620_v52  ;;  %v1394_v14 = vadd.f32 %v8624_v54, %v1297_v51 }
 0x267   : > { %v2180_v5 = vsel %vm394_vm0, %v2162_v55, %v2163_v43  ;;  %v2114_v58 = vmax.f32 %v2076_v27, 0.0  ;;  %v1759_v20 = vadd.f32 %v1758_v41, %v1652_v38  ;;  %v1990_v9 = vpop.f32.mrf.mxu2  ;;  %v1656_v55 = vadd.f32 %v8613_v25, %v1515_v10  ;;  %v8623_v38 = vld [vmem:[#allocation26_spill] sm:$0xff] }
 0x268   : > { %v2194_v13 = vmax.f32 %v2146_v46, %v2180_v5  ;;  %v2079_v56 = vpop.f32.mrf.mxu3  ;;  %v1390_v27 = vadd.f32 %v8623_v38, %v1293_v15  ;;  %v1398_v5 = vadd.f32 %v8625_v28, %v1301_v60  ;;  %v8635_v38 = vld [vmem:[#allocation40_spill] sm:$0xff]  ;;  %v8637_v28 = vld [vmem:[#allocation42_spill] sm:$0xff] }
 0x269   : > { %v2131_v42 = vmul.f32 %v6570_v4, %v2114_v58  ;;  %v1874_v44 = vadd.f32 %v1873_v6, %v1759_v20  ;;  %v6718_v32 = vld [vmem:[#allocation2 + $0x20] ss:$2 sm:$0xff] }
 0x26a   : > { %2210 = vst [vmem:[#allocation2 + $0x30] sm:$0xff] %v2194_v13  ;;  %v6721_v12 = vand.u32 4294901760, %v6718_v32  ;;  %v2237_v21 = vrot.slane %v6718_v32, 1  ;;  %v2253_v24 = vrot.slane %v6718_v32, 2  ;;  %v8627_v13 = vld [vmem:[#allocation41_spill] sm:$0xff]  ;;  %v1547_v29 = vadd.f32 %v8631_v26, %v1398_v5 }
 0x26b   : > { %v2148_v46 = vadd.f32 %v6578_v30, %v2131_v42  ;;  %v1991_v40 = vadd.f32 %v1990_v9, %v1874_v44  ;;  %v8626_v9 = vld [vmem:[#allocation15_spill] sm:$0xff] }
 0x26c   : > { %8612 = vst [vmem:[#allocation17_spill] sm:$0xff] %v6721_v12  ;;  %2518 = vmatmul.f32.gmra.mxu1 %v6721_v12  ;;  %v2365_v6 = vsub.f32 %v6718_v32, %v6721_v12  ;;  %v6739_v0 = vsel %vm394_vm0, %v2236_v37, %v2237_v21  ;;  %v6747_v31 = vsel %vm427_vm2, %v2252_v50, %v2253_v24  ;;  %v8622_v50 = vld [vmem:[#allocation27_spill] sm:$0xff] }
 0x26d   : > { %8617 = vst [vmem:[#allocation16_spill] sm:$0xff] %v6747_v31  ;;  %v2164_v11 = vrot.slane %v2148_v46, 1  ;;  %v2080_v62 = vadd.f32 %v2079_v56, %v1991_v40  ;;  %v1523_v34 = vadd.f32 %v8622_v50, %v1386_v63  ;;  %v1305_v56 = vadd.f32 %v8627_v13, %v8626_v9  ;;  %v8630_v63 = vld [vmem:[#allocation35_spill] sm:$0xff]  ;;  %v8634_v50 = vld [vmem:[#allocation36_spill] sm:$0xff] }
 0x26e   : > { %v1763_v53 = vpop.f32.mrf.mxu0  ;;  %2602 = vmatmul.f32.gmra.mxu2 %v2365_v6  ;;  %v2366_v37 = vand.u32 4294901760, %v2365_v6  ;;  %v1885_v7 = vpop.f32.mrf.mxu1  ;;  %v1539_v40 = vadd.f32 %v8630_v63, %v1394_v14 }
 0x26f   : > { %v2179_v61 = vsel %vm394_vm0, %v2163_v43, %v2164_v11  ;;  %v2115_v3 = vmax.f32 %v2080_v62, 0.0  ;;  %v1764_v59 = vadd.f32 %v1763_v53, %v1656_v55  ;;  %v1994_v8 = vpop.f32.mrf.mxu2  ;;  %v8629_v55 = vld [vmem:[#allocation31_spill] sm:$0xff]  ;;  %v1402_v36 = vadd.f32 %v8632_v47, %v1305_v56  ;;  %v2298_v62 = vld [vmem:[%s8419_s2 + $0xf8] sm:$0xff]  ;;  %v8633_v53 = vld [vmem:[#allocation32_spill] sm:$0xff] }
 0x270   : > { %v2195_v23 = vmax.f32 %v2147_v49, %v2179_v61  ;;  %2678 = vmatmul.f32.gmra.mxu3 %v2366_v37  ;;  %v2083_v10 = vpop.f32.mrf.mxu3  ;;  %v2367_v41 = vsub.f32 %v2365_v6, %v2366_v37  ;;  %v8628_v49 = vld [vmem:[#allocation28_spill] sm:$0xff]  ;;  %v1531_v35 = vadd.f32 %v8629_v55, %v1390_v27  ;;  %v6783_v27 = vadd.f32 %v8635_v38, %v1547_v29 }
 0x271   : > { %v2132_v58 = vmul.f32 %v6570_v4, %v2115_v3  ;;  %v1880_v20 = vadd.f32 %v1879_v17, %v1764_v59  ;;  %v1660_v25 = vadd.f32 %v8628_v49, %v1523_v34  ;;  %v6780_v34 = vadd.f32 %v8634_v50, %v1539_v40 }
 0x272   : > { %2211 = vst [vmem:[#allocation2 + $0x38] sm:$0xff] %v2195_v23  ;;  %v2368_v43 = vand.u32 4294901760, %v2367_v41  ;;  %v1664_v37 = vadd.f32 %v8633_v53, %v1531_v35  ;;  %v2297_v41 = vld [vmem:[%s8419_s2 + $0xf0] sm:$0xff]  ;;  %v1555_v5 = vadd.f32 %v8637_v28, %v1402_v36  ;;  %v2295_v35 = vld [vmem:[%s8419_s2 + $0xe0] sm:$0xff] }
 0x273   : > { %v6763_v42 = vadd.f32 %v6578_v30, %v2132_v58  ;;  %v1995_v44 = vadd.f32 %v1994_v8, %v1880_v20  ;;  %v6777_v8 = vand.u32 4294901760, %v2298_v62  ;;  %v6798_v14 = vand.u32 4294901760, %v2297_v41 }
 0x274   : > { %2369 = vmatmul.f32.gmra.mxu0 %v2368_v43  ;;  %v2296_v43 = vld [vmem:[%s8419_s2 + $0xe8] sm:$0xff]  ;;  %v6846_v47 = vand.u32 4294901760, %v2295_v35 }
 0x275   : > { %v2165_v17 = vrot.slane %v6763_v42, 1  ;;  %v2084_v15 = vadd.f32 %v2083_v10, %v1995_v44  ;;  %2875 = vmatpush.msra.mxu2 %v6777_v8  ;;  %v6796_v54 = vsub.f32 %v2298_v62, %v6777_v8  ;;  %3190 = vmatpush.msrb.mxu1 %v6777_v8  ;;  %v6815_v44 = vand.u32 4294901760, %v2296_v43 }
 0x276   : > { %v1768_v6 = vpop.f32.mrf.mxu0  ;;  %v1891_v59 = vpop.f32.mrf.mxu1  ;;  %v6818_v49 = vsub.f32 %v2297_v41, %v6798_v14  ;;  %v6875_v41 = vsub.f32 %v2295_v35, %v6846_v47  ;;  %v8639_v35 = vld [vmem:[#allocation43_spill] sm:$0xff] }
 0x277   : > { %v2178_v51 = vsel %vm394_vm0, %v2164_v11, %v2165_v17  ;;  %v2116_v52 = vmax.f32 %v2084_v15, 0.0  ;;  %v1769_v19 = vadd.f32 %v1768_v6, %v1660_v25  ;;  %v1998_v60 = vpop.f32.mrf.mxu2  ;;  %2877 = vmatpush.msra.mxu2 %v6798_v14  ;;  %v8479_v56 = vand.u32 4294901760, %v6796_v54  ;;  %3102 = vmatpush.msrb.mxu0 %v6796_v54 }
 0x278   : > { %v2196_v61 = vmax.f32 %v2148_v46, %v2178_v51  ;;  %v2087_v3 = vpop.f32.mrf.mxu3  ;;  %3192 = vmatpush.msrb.mxu1 %v6798_v14  ;;  %v8478_v6 = vand.u32 4294901760, %v6818_v49  ;;  %v6854_v51 = vsub.f32 %v2296_v43, %v6815_v44 }
 0x279   : > { %v2133_v11 = vmul.f32 %v6570_v4, %v2116_v52  ;;  %v1886_v23 = vadd.f32 %v1885_v7, %v1769_v19  ;;  %v6786_v10 = vld [vmem:[#allocation2 + $0x30] ss:$2 sm:$0xff]  ;;  %v2974_v15 = vsub.f32 %v6796_v54, %v8479_v56  ;;  %2879 = vmatpush.msra.mxu2 %v6815_v44  ;;  %3105 = vmatpush.msrb.mxu0 %v6818_v49 }
 0x27a   : > { %2212 = vst [vmem:[#allocation2 + $0x40] sm:$0xff] %v2196_v61  ;;  %v6792_v46 = vand.u32 4294901760, %v6786_v10  ;;  %v8476_v7 = vrot.slane %v6786_v10, 1  ;;  %v8472_v9 = vrot.slane %v6786_v10, 2  ;;  %v2294_v52 = vld [vmem:[%s8419_s2 + $0xd8] sm:$0xff]  ;;  %v2980_v53 = vsub.f32 %v6818_v49, %v8478_v6  ;;  %3194 = vmatpush.msrb.mxu1 %v6815_v44 }
 0x27b   : > { %v6804_v58 = vadd.f32 %v6578_v30, %v2133_v11  ;;  %v1999_v20 = vadd.f32 %v1998_v60, %v1886_v23  ;;  %2881 = vmatpush.msra.mxu2 %v6846_v47  ;;  %v6868_v50 = vand.u32 4294901760, %v2294_v52  ;;  %3108 = vmatpush.msrb.mxu0 %v6854_v51 }
 0x27c   : > { %8636 = vst [vmem:[#allocation10_spill] sm:$0xff] %v6792_v46  ;;  %2522 = vmatmul.f32.gmra.mxu1 %v6792_v46  ;;  %v2373_v13 = vsub.f32 %v6786_v10, %v6792_v46  ;;  %v6832_v63 = vsel %vm394_vm0, %v2237_v21, %v8476_v7  ;;  %v6840_v40 = vsel %vm427_vm2, %v2253_v24, %v8472_v9  ;;  %v2981_v23 = vand.u32 4294901760, %v2980_v53 }
 0x27d   : > { %v2166_v25 = vrot.slane %v6804_v58, 1  ;;  %v2088_v55 = vadd.f32 %v2087_v3, %v1999_v20  ;;  %8638 = vst [vmem:[#allocation21_spill] sm:$0xff] %v6840_v40  ;;  %v8475_v3 = vand.u32 4294901760, %v6854_v51  ;;  %3196 = vmatpush.msrb.mxu1 %v6846_v47  ;;  %2883 = vmatpush.msra.mxu2 %v6868_v50 }
 0x27e   : > { %v1773_v26 = vpop.f32.mrf.mxu0  ;;  %2607 = vmatmul.f32.gmra.mxu2 %v2373_v13  ;;  %v2374_v29 = vand.u32 4294901760, %v2373_v13  ;;  %v1897_v11 = vpop.f32.mrf.mxu1  ;;  %3111 = vmatpush.msrb.mxu0 %v6875_v41 }
 0x27f   : > { %v2177_v32 = vsel %vm394_vm0, %v2165_v17, %v2166_v25  ;;  %v2117_v21 = vmax.f32 %v2088_v55, 0.0  ;;  %v1774_v36 = vadd.f32 %v1773_v26, %v1664_v37  ;;  %v2002_v24 = vpop.f32.mrf.mxu2  ;;  %v2975_v17 = vand.u32 4294901760, %v2974_v15  ;;  %v2292_v55 = vld [vmem:[%s8419_s2 + $0xc8] sm:$0xff]  ;;  %3198 = vmatpush.msrb.mxu1 %v6868_v50 }
 0x280   : > { %v2197_v19 = vmax.f32 %v6763_v42, %v2177_v32  ;;  %2684 = vmatmul.f32.gmra.mxu3 %v2374_v29  ;;  %v2091_v60 = vpop.f32.mrf.mxu3  ;;  %v2375_v62 = vsub.f32 %v2373_v13, %v2374_v29  ;;  %v2293_v42 = vld [vmem:[%s8419_s2 + $0xd0] sm:$0xff]  ;;  %v2986_v43 = vsub.f32 %v6854_v51, %v8475_v3  ;;  %v6888_v13 = vsub.f32 %v2294_v52, %v6868_v50 }
 0x281   : > { %v2134_v37 = vmul.f32 %v6570_v4, %v2117_v21  ;;  %v1892_v61 = vadd.f32 %v1891_v59, %v1774_v36  ;;  %2976 = vmatpush.msra.mxu3 %v2975_v17  ;;  %v6877_v59 = vand.u32 4294901760, %v2293_v42  ;;  %v6894_v26 = vadd.f32 %v8639_v35, %v1555_v5  ;;  %v2291_v5 = vld [vmem:[%s8419_s2 + $0xc0] sm:$0xff] }
 0x282   : > { %2213 = vst [vmem:[#allocation2 + $0x48] sm:$0xff] %v2197_v19  ;;  %v2376_v38 = vand.u32 4294901760, %v2375_v62  ;;  %v8474_v29 = vand.u32 4294901760, %v6875_v41  ;;  %v6897_v15 = vand.u32 4294901760, %v2292_v55  ;;  %v8473_v52 = vand.u32 4294901760, %v6888_v13  ;;  %3114 = vmatpush.msrb.mxu0 %v6888_v13 }
 0x283   : > { %v6881_v28 = vadd.f32 %v6578_v30, %v2134_v37  ;;  %v2003_v20 = vadd.f32 %v2002_v24, %v1892_v61  ;;  %2982 = vmatpush.msra.mxu3 %v2981_v23  ;;  %v6900_v32 = vsub.f32 %v2293_v42, %v6877_v59  ;;  %v2987_v24 = vand.u32 4294901760, %v2986_v43  ;;  %2885 = vmatpush.msra.mxu2 %v6877_v59 }
 0x284   : > { %2377 = vmatmul.f32.gmra.mxu0 %v2376_v38  ;;  %v2992_v62 = vsub.f32 %v6875_v41, %v8474_v29  ;;  %v6913_v53 = vand.u32 4294901760, %v2291_v5  ;;  %v2998_v23 = vsub.f32 %v6888_v13, %v8473_v52  ;;  %3200 = vmatpush.msrb.mxu1 %v6877_v59  ;;  %v2287_v52 = vld [vmem:[%s8419_s2 + $0xa0] sm:$0xff] }
 0x285   : > { %v2167_v21 = vrot.slane %v6881_v28, 1  ;;  %v2092_v36 = vadd.f32 %v2091_v60, %v2003_v20  ;;  %v8471_v17 = vand.u32 4294901760, %v6900_v32  ;;  %v6916_v60 = vsub.f32 %v2292_v55, %v6897_v15  ;;  %2988 = vmatpush.msra.mxu3 %v2987_v24  ;;  %2887 = vmatpush.msra.mxu2 %v6897_v15  ;;  %v2290_v20 = vld [vmem:[%s8419_s2 + $0xb8] sm:$0xff] }
 0x286   : > { %v1778_v19 = vpop.f32.mrf.mxu0  ;;  %v2993_v35 = vand.u32 4294901760, %v2992_v62  ;;  %v2999_v39 = vand.u32 4294901760, %v2998_v23  ;;  %v2289_v62 = vld [vmem:[%s8419_s2 + $0xb0] sm:$0xff]  ;;  %3117 = vmatpush.msrb.mxu0 %v6900_v32  ;;  %3202 = vmatpush.msrb.mxu1 %v6897_v15 }
 0x287   : > { %v2176_v37 = vsel %vm394_vm0, %v2166_v25, %v2167_v21  ;;  %v2118_v61 = vmax.f32 %v2092_v36, 0.0  ;;  %v1779_v42 = vadd.f32 %v1778_v19, %v6780_v34  ;;  %v2006_v38 = vpop.f32.mrf.mxu2  ;;  %v3004_v34 = vsub.f32 %v6900_v32, %v8471_v17  ;;  %2889 = vmatpush.msra.mxu2 %v6913_v53 }
 0x288   : > { %v2198_v43 = vmax.f32 %v6804_v58, %v2176_v37  ;;  %v2095_v55 = vpop.f32.mrf.mxu3  ;;  %v8469_v25 = vand.u32 4294901760, %v6916_v60  ;;  %v6944_v58 = vand.u32 4294901760, %v2290_v20  ;;  %2994 = vmatpush.msra.mxu3 %v2993_v35  ;;  %3120 = vmatpush.msrb.mxu0 %v6916_v60 }
 0x289   : > { %v2135_v36 = vmul.f32 %v6570_v4, %v2118_v61  ;;  %v1898_v24 = vadd.f32 %v1897_v11, %v1779_v42  ;;  %v6941_v19 = vld [vmem:[#allocation2 + $0x40] ss:$2 sm:$0xff]  ;;  %v3005_v18 = vand.u32 4294901760, %v3004_v34  ;;  %v6956_v61 = vsub.f32 %v2291_v5, %v6913_v53  ;;  %3204 = vmatpush.msrb.mxu1 %v6913_v53 }
 0x28a   : > { %2214 = vst [vmem:[#allocation2 + $0x50] sm:$0xff] %v2198_v43  ;;  %v6950_v37 = vand.u32 4294901760, %v6941_v19  ;;  %v3010_v11 = vsub.f32 %v6916_v60, %v8469_v25  ;;  %2891 = vmatpush.msra.mxu2 %v6944_v58  ;;  %v6963_v43 = vand.u32 4294901760, %v2289_v62  ;;  %v6966_v35 = vsub.f32 %v2290_v20, %v6944_v58  ;;  %v2288_v34 = vld [vmem:[%s8419_s2 + $0xa8] sm:$0xff]  ;;  %3000 = vmatpush.msra.mxu3 %v2999_v39 }
 0x28b   : > { %v6960_v42 = vadd.f32 %v6578_v30, %v2135_v36  ;;  %v2007_v23 = vadd.f32 %v2006_v38, %v1898_v24  ;;  %v1903_v36 = vpop.f32.mrf.mxu1  ;;  %v8477_v24 = vand.u32 4294901760, %v6956_v61  ;;  %v6976_v25 = vand.u32 4294901760, %v2288_v34  ;;  %3123 = vmatpush.msrb.mxu0 %v6956_v61  ;;  %3206 = vmatpush.msrb.mxu1 %v6944_v58 }
 0x28c   : > { %8640 = vst [vmem:[#allocation19_spill] sm:$0xff] %v6950_v37  ;;  %2526 = vmatmul.f32.gmra.mxu1 %v6950_v37  ;;  %v2381_v5 = vsub.f32 %v6941_v19, %v6950_v37  ;;  %v3011_v38 = vand.u32 4294901760, %v3010_v11  ;;  %2893 = vmatpush.msra.mxu2 %v6963_v43  ;;  %v8480_v17 = vand.u32 4294901760, %v6966_v35  ;;  %v6982_v9 = vsub.f32 %v2289_v62, %v6963_v43 }
 0x28d   : > { %v8481_v20 = vrot.slane %v6960_v42, 1  ;;  %v2096_v22 = vadd.f32 %v2095_v55, %v2007_v23  ;;  %3006 = vmatpush.msra.mxu3 %v3005_v18  ;;  %v3016_v55 = vsub.f32 %v6956_v61, %v8477_v24  ;;  %v6991_v23 = vand.u32 4294901760, %v2287_v52  ;;  %3126 = vmatpush.msrb.mxu0 %v6966_v35 }
 0x28e   : > { %v1783_v39 = vpop.f32.mrf.mxu0  ;;  %2612 = vmatmul.f32.gmra.mxu2 %v2381_v5  ;;  %v2382_v11 = vand.u32 4294901760, %v2381_v5  ;;  %v6994_v29 = vsub.f32 %v2288_v34, %v6976_v25  ;;  %v3022_v24 = vsub.f32 %v6966_v35, %v8480_v17  ;;  %v2286_v34 = vld [vmem:[%s8419_s2 + $0x98] sm:$0xff]  ;;  %3208 = vmatpush.msrb.mxu1 %v6963_v43 }
 0x28f   : > { %v2175_v62 = vsel %vm394_vm0, %v2167_v21, %v8481_v20  ;;  %v2119_v3 = vmax.f32 %v2096_v22, 0.0  ;;  %v1784_v7 = vadd.f32 %v1783_v39, %v6783_v27  ;;  %v2010_v18 = vpop.f32.mrf.mxu2  ;;  %2895 = vmatpush.msra.mxu2 %v6976_v25  ;;  %v3017_v56 = vand.u32 4294901760, %v3016_v55  ;;  %3012 = vmatpush.msra.mxu3 %v3011_v38 }
 0x290   : > { %v2199_v6 = vmax.f32 %v6881_v28, %v2175_v62  ;;  %2690 = vmatmul.f32.gmra.mxu3 %v2382_v11  ;;  %v2099_v21 = vpop.f32.mrf.mxu3  ;;  %v2383_v22 = vsub.f32 %v2381_v5, %v2382_v11  ;;  %v8484_v27 = vand.u32 4294901760, %v6982_v9  ;;  %v3023_v20 = vand.u32 4294901760, %v3022_v24  ;;  %v2285_v28 = vld [vmem:[%s8419_s2 + $0x90] sm:$0xff]  ;;  %3129 = vmatpush.msrb.mxu0 %v6982_v9 }
 0x291   : > { %v2136_v39 = vmul.f32 %v6570_v4, %v2119_v3  ;;  %v1904_v17 = vadd.f32 %v1903_v36, %v1784_v7  ;;  %2897 = vmatpush.msra.mxu2 %v6991_v23  ;;  %v8483_v40 = vand.u32 4294901760, %v6994_v29  ;;  %v7023_v55 = vand.u32 4294901760, %v2286_v34  ;;  %3018 = vmatpush.msra.mxu3 %v3017_v56 }
 0x292   : > { %2215 = vst [vmem:[#allocation2 + $0x58] sm:$0xff] %v2199_v6  ;;  %v2384_v5 = vand.u32 4294901760, %v2383_v22  ;;  %v3028_v11 = vsub.f32 %v6982_v9, %v8484_v27  ;;  %v7026_v7 = vsub.f32 %v2287_v52, %v6991_v23  ;;  %v7036_v38 = vand.u32 4294901760, %v2285_v28  ;;  %v2284_v52 = vld [vmem:[%s8419_s2 + $0x88] sm:$0xff]  ;;  %3132 = vmatpush.msrb.mxu0 %v6994_v29  ;;  %3210 = vmatpush.msrb.mxu1 %v6976_v25 }
 0x293   : > { %v7031_v3 = vadd.f32 %v6578_v30, %v2136_v39  ;;  %v2011_v36 = vadd.f32 %v2010_v18, %v1904_v17  ;;  %v3034_v6 = vsub.f32 %v6994_v29, %v8483_v40  ;;  %2899 = vmatpush.msra.mxu2 %v7023_v55  ;;  %v7044_v22 = vsub.f32 %v2286_v34, %v7023_v55  ;;  %v1909_v27 = vpop.f32.mrf.mxu1 }
 0x294   : > { %2385 = vmatmul.f32.gmra.mxu0 %v2384_v5  ;;  %v3029_v24 = vand.u32 4294901760, %v3028_v11  ;;  %v8487_v62 = vand.u32 4294901760, %v7026_v7  ;;  %v7046_v56 = vand.u32 4294901760, %v2284_v52  ;;  %3024 = vmatpush.msra.mxu3 %v3023_v20  ;;  %v7050_v40 = vsub.f32 %v2285_v28, %v7036_v38  ;;  %v2283_v5 = vld [vmem:[%s8419_s2 + $0x80] sm:$0xff] }
 0x295   : > { %v2169_v17 = vrot.slane %v7031_v3, 1  ;;  %v2100_v18 = vadd.f32 %v2099_v21, %v2011_v36  ;;  %v3035_v39 = vand.u32 4294901760, %v3034_v6  ;;  %2901 = vmatpush.msra.mxu2 %v7036_v38  ;;  %v7061_v21 = vand.u32 4294901760, %v2283_v5  ;;  %3135 = vmatpush.msrb.mxu0 %v7026_v7 }
 0x296   : > { %v1788_v11 = vpop.f32.mrf.mxu0  ;;  %v3040_v34 = vsub.f32 %v7026_v7, %v8487_v62  ;;  %v7064_v28 = vsub.f32 %v2284_v52, %v7046_v56  ;;  %v8641_v36 = vrot.slane %v6960_v42, 1  ;;  %3030 = vmatpush.msra.mxu3 %v3029_v24  ;;  %v8494_v62 = vand.u32 4294901760, %v7050_v40  ;;  %3212 = vmatpush.msrb.mxu1 %v6991_v23 }
 0x297   : > { %v2120_v31 = vmax.f32 %v2100_v18, 0.0  ;;  %v1789_v16 = vadd.f32 %v1788_v11, %v6894_v26  ;;  %v2014_v37 = vpop.f32.mrf.mxu2  ;;  %v8642_v46 = vand.u32 4294901760, %v7044_v22  ;;  %2903 = vmatpush.msra.mxu2 %v7046_v56  ;;  %v7088_v11 = vsub.f32 %v2283_v5, %v7061_v21  ;;  %3138 = vmatpush.msrb.mxu0 %v7044_v22 }
 0x298   : > { %v2174_v6 = vsel %vm394_vm0, %v8641_v36, %v2169_v17  ;;  %v3041_v52 = vand.u32 4294901760, %v3040_v34  ;;  %v8495_v36 = vand.u32 4294901760, %v7064_v28  ;;  %3036 = vmatpush.msra.mxu3 %v3035_v39  ;;  %3214 = vmatpush.msrb.mxu1 %v7023_v55 }
 0x299   : > { %v2200_v20 = vmax.f32 %v6960_v42, %v2174_v6  ;;  %v3046_v12 = vsub.f32 %v7044_v22, %v8642_v46  ;;  %v2137_v26 = vmul.f32 %v6570_v4, %v2120_v31  ;;  %v1910_v24 = vadd.f32 %v1909_v27, %v1789_v16  ;;  %v7082_v18 = vld [vmem:[#allocation2 + $0x50] ss:$2 sm:$0xff]  ;;  %v2103_v46 = vpop.f32.mrf.mxu3  ;;  %2905 = vmatpush.msra.mxu2 %v7061_v21 }
 0x29a   : > { %v3052_v42 = vsub.f32 %v7050_v40, %v8494_v62  ;;  %v7091_v34 = vand.u32 4294901760, %v7082_v18  ;;  %v3058_v16 = vsub.f32 %v7064_v28, %v8495_v36  ;;  %3042 = vmatpush.msra.mxu3 %v3041_v52  ;;  %v3063_v5 = vand.u32 4294901760, %v7088_v11  ;;  %3216 = vmatpush.msrb.mxu1 %v7036_v38 }
 0x29b   : > { %2216 = vst [vmem:[#allocation2 + $0x60] sm:$0xff] %v2200_v20  ;;  %v3047_v6 = vand.u32 4294901760, %v3046_v12  ;;  %v2154_v31 = vadd.f32 %v6578_v30, %v2137_v26  ;;  %v2015_v27 = vadd.f32 %v2014_v37, %v1910_v24  ;;  %v8643_v20 = vand.u32 4294901760, %v6796_v54  ;;  %3141 = vmatpush.msrb.mxu0 %v7050_v40 }
 0x29c   : > { %v3053_v39 = vand.u32 4294901760, %v3052_v42  ;;  %2530 = vmatmul.f32.gmra.mxu1 %v7091_v34  ;;  %v2389_v12 = vsub.f32 %v7082_v18, %v7091_v34  ;;  %v2239_v62 = vrot.slane %v6941_v19, 1  ;;  %v3059_v37 = vand.u32 4294901760, %v3058_v16 }
 0x29d   : > { %3273 = vmatpush.msrb.mxu2 %v8643_v20  ;;  %v2170_v36 = vrot.slane %v2154_v31, 1  ;;  %v2104_v2 = vadd.f32 %v2103_v46, %v2015_v27  ;;  %3048 = vmatpush.msra.mxu3 %v3047_v6  ;;  %v3064_v52 = vsub.f32 %v7088_v11, %v3063_v5  ;;  %v8644_v54 = vand.u32 4294901760, %v6818_v49 }
 0x29e   : > { %2617 = vmatmul.f32.gmra.mxu2 %v2389_v12  ;;  %v2390_v26 = vand.u32 4294901760, %v2389_v12  ;;  %v8645_v24 = vrot.slane %v6786_v10, 1  ;;  %v8646_v49 = vand.u32 4294901760, %v6854_v51  ;;  %v2256_v51 = vrot.slane %v7082_v18, 2  ;;  %3218 = vmatpush.msrb.mxu1 %v7046_v56 }
 0x29f   : > { %3277 = vmatpush.msrb.mxu2 %v8644_v54  ;;  %v2173_v46 = vsel %vm394_vm0, %v2169_v17, %v2170_v36  ;;  %v2121_v6 = vmax.f32 %v2104_v2, 0.0  ;;  %3054 = vmatpush.msra.mxu3 %v3053_v39  ;;  %v3065_v16 = vand.u32 4294901760, %v3064_v52  ;;  %v2255_v2 = vrot.slane %v6941_v19, 2 }
 0x2a0   : > { %v7118_v42 = vsel %vm394_vm0, %v8645_v24, %v2239_v62  ;;  %v2201_v27 = vmax.f32 %v7031_v3, %v2173_v46  ;;  %2696 = vmatmul.f32.gmra.mxu3 %v2390_v26  ;;  %v2391_v20 = vsub.f32 %v2389_v12, %v2390_v26  ;;  %v8647_v24 = vand.u32 4294901760, %v6875_v41  ;;  %3144 = vmatpush.msrb.mxu0 %v7064_v28 }
 0x2a1   : > { %3281 = vmatpush.msrb.mxu2 %v8646_v49  ;;  %v2138_v54 = vmul.f32 %v6570_v4, %v2121_v6  ;;  %3060 = vmatpush.msra.mxu3 %v3059_v37  ;;  %v8648_v39 = vand.u32 4294901760, %v6888_v13  ;;  %v8649_v4 = vrot.slane %v6786_v10, 2  ;;  %v7146_v12 = vsel %vm427_vm2, %v2255_v2, %v2256_v51 }
 0x2a2   : > { %2217 = vst [vmem:[#allocation2 + $0x68] sm:$0xff] %v2201_v27  ;;  %v2392_v17 = vand.u32 4294901760, %v2391_v20  ;;  %v8651_v10 = vrot.slane %v6588_v48, 1  ;;  %v8652_v52 = vand.u32 4294901760, %v6916_v60  ;;  %3220 = vmatpush.msrb.mxu1 %v7061_v21  ;;  %3147 = vmatpush.msrb.mxu0 %v7088_v11  ;;  %v8654_v60 = vand.u32 4294901760, %v6966_v35 }
 0x2a3   : > { %3285 = vmatpush.msrb.mxu2 %v8647_v24  ;;  %v2155_v3 = vadd.f32 %v6578_v30, %v2138_v54  ;;  %3066 = vmatpush.msra.mxu3 %v3065_v16  ;;  %v7142_v41 = vsel %vm427_vm2, %v8649_v4, %v2255_v2  ;;  %v8650_v30 = vand.u32 4294901760, %v6900_v32  ;;  %v8656_v35 = vand.u32 4294901760, %v6994_v29 }
 0x2a4   : > { %2393 = vmatmul.f32.gmra.mxu0 %v2392_v17  ;;  %v8658_v27 = vand.u32 4294901760, %v7044_v22  ;;  %v8659_v20 = vand.u32 4294901760, %v7050_v40  ;;  %v8660_v54 = vand.u32 4294901760, %v7064_v28  ;;  %v8661_v2 = vrot.slane %v6646_v45, 2 }
 0x2a5   : > { %3289 = vmatpush.msrb.mxu2 %v8648_v39  ;;  %3368 = vmatpush.msrb.mxu3 %v6777_v8  ;;  %v2171_v37 = vrot.slane %v2155_v3, 1  ;;  %v2240_v39 = vrot.slane %v7082_v18, 1 }
 0x2a7   : > { %3293 = vmatpush.msrb.mxu2 %v8650_v30  ;;  %3370 = vmatpush.msrb.mxu3 %v6798_v14  ;;  %v2172_v8 = vsel %vm394_vm0, %v2170_v36, %v2171_v37  ;;  %v2187_v13 = vsel %vm394_vm0, %v2171_v37, %v8651_v10  ;;  %v8653_v36 = vand.u32 4294901760, %v6956_v61  ;;  %v7179_v61 = vand.u32 4294901760, %v6691_v57 }
 0x2a8   : > { %v2202_v32 = vmax.f32 %v2154_v31, %v2172_v8  ;;  %v2203_v26 = vmax.f32 %v2155_v3, %v2187_v13  ;;  %v8655_v31 = vand.u32 4294901760, %v6982_v9  ;;  %v8657_v9 = vand.u32 4294901760, %v7026_v7  ;;  %v8664_v8 = vld [vmem:[#allocation10_spill] sm:$0xff] }
 0x2a9   : > { %3297 = vmatpush.msrb.mxu2 %v8652_v52  ;;  %3372 = vmatpush.msrb.mxu3 %v6815_v44  ;;  %v7164_v14 = vld [vmem:[#allocation2 + $0x60] ss:$2 sm:$0xff]  ;;  %v7193_v16 = vsub.f32 %v6691_v57, %v7179_v61  ;;  %v7211_v7 = vand.u32 4294901760, %v6739_v0  ;;  %v7244_v3 = vand.u32 4294901760, %v6832_v63 }
 0x2aa   : > { %2218 = vst [vmem:[#allocation2 + $0x70] sm:$0xff] %v2202_v32  ;;  %v7169_v48 = vand.u32 4294901760, %v7164_v14  ;;  %v2257_v46 = vrot.slane %v7164_v14, 2  ;;  %v2241_v30 = vrot.slane %v7164_v14, 1 }
 0x2ab   : > { %3301 = vmatpush.msrb.mxu2 %v8653_v36  ;;  %3374 = vmatpush.msrb.mxu3 %v6846_v47  ;;  %2219 = vst [vmem:[#allocation2 + $0x78] sm:$0xff] %v2203_v26 }
 0x2ac   : > { %2534 = vmatmul.f32.gmra.mxu1 %v7169_v48  ;;  %v2397_v44 = vsub.f32 %v7164_v14, %v7169_v48  ;;  %v7189_v6 = vsel %vm427_vm2, %v2256_v51, %v2257_v46 }
 0x2ad   : > { %3305 = vmatpush.msrb.mxu2 %v8654_v60  ;;  %3376 = vmatpush.msrb.mxu3 %v6868_v50  ;;  %v8665_v60 = vld [vmem:[#allocation19_spill] sm:$0xff] }
 0x2ae   : > { %2622 = vmatmul.f32.gmra.mxu2 %v2397_v44  ;;  %v2398_v47 = vand.u32 4294901760, %v2397_v44 }
 0x2af   : > { %3309 = vmatpush.msrb.mxu2 %v8655_v31  ;;  %3378 = vmatpush.msrb.mxu3 %v6877_v59 }
 0x2b0   : > { %2702 = vmatmul.f32.gmra.mxu3 %v2398_v47  ;;  %v2399_v50 = vsub.f32 %v2397_v44, %v2398_v47 }
 0x2b1   : > { %3313 = vmatpush.msrb.mxu2 %v8656_v35  ;;  %3380 = vmatpush.msrb.mxu3 %v6897_v15  ;;  %v2908_v15 = vand.u32 4294901760, %v7193_v16 }
 0x2b2   : > { %v2400_v49 = vand.u32 4294901760, %v2399_v50  ;;  %v7198_v59 = vld [vmem:[#allocation2 + $0x70] ss:$2 sm:$0xff]  ;;  %v8666_v50 = vrot.slane %v6646_v45, 1 }
 0x2b3   : > { %3317 = vmatpush.msrb.mxu2 %v8657_v9  ;;  %v7201_v29 = vand.u32 4294901760, %v7198_v59  ;;  %3382 = vmatpush.msrb.mxu3 %v6913_v53  ;;  %v2258_v53 = vrot.slane %v7198_v59, 2  ;;  %v2909_v40 = vsub.f32 %v7193_v16, %v2908_v15  ;;  %v2242_v32 = vrot.slane %v7198_v59, 1 }
 0x2b4   : > { %2401 = vmatmul.f32.gmra.mxu0 %v2400_v49 }
 0x2b5   : > { %3321 = vmatpush.msrb.mxu2 %v8658_v27  ;;  %2538 = vmatmul.f32.gmra.mxu1 %v7201_v29  ;;  %v2405_v57 = vsub.f32 %v7198_v59, %v7201_v29  ;;  %v7222_v24 = vsel %vm427_vm2, %v2257_v46, %v2258_v53  ;;  %v2910_v51 = vand.u32 4294901760, %v2909_v40  ;;  %v2243_v36 = vsel %vm394_vm0, %v2241_v30, %v2242_v32 }
 0x2b6   : > { %3384 = vmatpush.msrb.mxu3 %v6944_v58  ;;  %v7229_v58 = vsub.f32 %v6739_v0, %v7211_v7  ;;  %v7310_v46 = vand.u32 4294901760, %v2243_v36  ;;  %v2250_v9 = vsel %vm394_vm0, %v2242_v32, %v8666_v50 }
 0x2b7   : > { %3325 = vmatpush.msrb.mxu2 %v8659_v20  ;;  %v2406_v22 = vand.u32 4294901760, %v2405_v57  ;;  %v7326_v27 = vand.u32 4294901760, %v2250_v9 }
 0x2b8   : > { %2627 = vmatmul.f32.gmra.mxu2 %v2405_v57  ;;  %3386 = vmatpush.msrb.mxu3 %v6963_v43  ;;  %v7235_v43 = vsel %vm427_vm2, %v2258_v53, %v8661_v2  ;;  %v2916_v0 = vand.u32 4294901760, %v7229_v58  ;;  %v7317_v35 = vsub.f32 %v2243_v36, %v7310_v46 }
 0x2b9   : > { %3329 = vmatpush.msrb.mxu2 %v8660_v54  ;;  %2708 = vmatmul.f32.gmra.mxu3 %v2406_v22  ;;  %v2407_v17 = vsub.f32 %v2405_v57, %v2406_v22  ;;  %v2314_v57 = vld [vmem:[%s8419_s2 + $0x178] sm:$0xff]  ;;  %v7336_v20 = vsub.f32 %v2250_v9, %v7326_v27  ;;  %v2313_v22 = vld [vmem:[%s8419_s2 + $0x170] sm:$0xff] }
 0x2ba   : > { %3388 = vmatpush.msrb.mxu3 %v6976_v25  ;;  %v2917_v25 = vsub.f32 %v7229_v58, %v2916_v0  ;;  %v8505_v59 = vand.u32 4294901760, %v7317_v35  ;;  %v7338_v53 = vand.u32 4294901760, %v2314_v57  ;;  %v7343_v54 = vand.u32 4294901760, %v2313_v22 }
 0x2bb   : > { %3333 = vmatpush.msrb.mxu2 %v3063_v5  ;;  %v2408_v28 = vand.u32 4294901760, %v2407_v17  ;;  %v7262_v5 = vand.u32 4294901760, %v7118_v42 }
 0x2bc   : > { %3390 = vmatpush.msrb.mxu3 %v6991_v23  ;;  %v7254_v23 = vsub.f32 %v6832_v63, %v7244_v3  ;;  %v2918_v11 = vand.u32 4294901760, %v2917_v25  ;;  %v2957_v45 = vsub.f32 %v7317_v35, %v8505_v59  ;;  %v7347_v17 = vsub.f32 %v2314_v57, %v7338_v53  ;;  %v2312_v25 = vld [vmem:[%s8419_s2 + $0x168] sm:$0xff]  ;;  %v2303_v59 = vld [vmem:[%s8419_s2 + $0x120] sm:$0xff] }
 0x2bd   : > { %2409 = vmatmul.f32.gmra.mxu0 %v2408_v28  ;;  %2842 = vmatmul.f32.vlgmr.msra.gmra.mxu1 %v6649_v33  ;;  %v7351_v40 = vsub.f32 %v2313_v22, %v7343_v54  ;;  %v8498_v28 = vand.u32 4294901760, %v7336_v20 }
 0x2be   : > { %3392 = vmatpush.msrb.mxu3 %v7023_v55  ;;  %v8662_v55 = vld [vmem:[#allocation44_spill] sm:$0xff]  ;;  %v2958_v2 = vand.u32 4294901760, %v2957_v45 }
 0x2c0   : > { %2911 = vmatmul.f32.vlgmr.msra.gmra.mxu2 %v2910_v51  ;;  %3394 = vmatpush.msrb.mxu3 %v7036_v38  ;;  %v2924_v38 = vand.u32 4294901760, %v7254_v23  ;;  %v8510_v51 = vand.u32 4294901760, %v7347_v17 }
 0x2c1   : > { %3068 = vmatmul.f32.vlgmr.msra.gmra.mxu3 %v7179_v61  ;;  %3660 = vmatpush.msra.mxu2 %v7347_v17 }
 0x2c2   : > { %3396 = vmatpush.msrb.mxu3 %v7046_v56  ;;  %v2925_v63 = vsub.f32 %v7254_v23, %v2924_v38  ;;  %v2245_v56 = vsel %vm394_vm0, %v2239_v62, %v2240_v39 }
 0x2c3   : > { %v7280_v37 = vand.u32 4294901760, %v2245_v56  ;;  %3663 = vmatpush.msra.mxu2 %v7351_v40 }
 0x2c4   : > { %3398 = vmatpush.msrb.mxu3 %v7061_v21  ;;  %v8663_v21 = vld [vmem:[#allocation17_spill] sm:$0xff]  ;;  %v2926_v18 = vand.u32 4294901760, %v2925_v63 }
 0x2c5   : > { %2777 = vmatmul.f32.vlgmr.msra.gmra.mxu0 %v6649_v33  ;;  %2846 = vmatmul.f32.gmra.mxu1 %v8662_v55  ;;  %v7271_v33 = vsub.f32 %v7118_v42, %v7262_v5  ;;  %v7288_v62 = vsub.f32 %v2245_v56, %v7280_v37  ;;  %v2244_v42 = vsel %vm394_vm0, %v2240_v39, %v2241_v30 }
 0x2c6   : > { %v7295_v52 = vand.u32 4294901760, %v2244_v42  ;;  %3433 = vmatpush.msra.mxu0 %v7338_v53  ;;  %3748 = vmatpush.msra.mxu3 %v7338_v53  ;;  %v2965_v56 = vsub.f32 %v7336_v20, %v8498_v28 }
 0x2c7   : > { %v2932_v4 = vand.u32 4294901760, %v7271_v33  ;;  %v8512_v13 = vand.u32 4294901760, %v7288_v62 }
 0x2c8   : > { %2919 = vmatmul.f32.gmra.mxu2 %v2918_v11  ;;  %v7303_v14 = vsub.f32 %v2244_v42, %v7295_v52  ;;  %3435 = vmatpush.msra.mxu0 %v7343_v54  ;;  %v7362_v11 = vand.u32 4294901760, %v2312_v25 }
 0x2c9   : > { %3072 = vmatmul.f32.gmra.mxu3 %v7211_v7  ;;  %v2933_v19 = vsub.f32 %v7271_v33, %v2932_v4  ;;  %v2941_v26 = vsub.f32 %v7288_v62, %v8512_v13 }
 0x2ca   : > { %v8511_v31 = vand.u32 4294901760, %v7303_v14  ;;  %3750 = vmatpush.msra.mxu3 %v7343_v54  ;;  %3437 = vmatpush.msra.mxu0 %v7362_v11  ;;  %v7374_v63 = vsub.f32 %v2312_v25, %v7362_v11 }
 0x2cb   : > { %v2934_v10 = vand.u32 4294901760, %v2933_v19  ;;  %v2942_v44 = vand.u32 4294901760, %v2941_v26 }
 0x2cc   : > { %v2949_v47 = vsub.f32 %v7303_v14, %v8511_v31  ;;  %v8506_v19 = vand.u32 4294901760, %v7374_v63  ;;  %3666 = vmatpush.msra.mxu2 %v7374_v63  ;;  %3752 = vmatpush.msra.mxu3 %v7362_v11 }
 0x2cd   : > { %2781 = vmatmul.f32.gmra.mxu0 %v8662_v55  ;;  %2850 = vmatmul.f32.gmra.mxu1 %v8663_v21  ;;  %v8508_v55 = vand.u32 4294901760, %v7351_v40 }
 0x2ce   : > { %v2950_v49 = vand.u32 4294901760, %v2949_v47  ;;  %v2309_v47 = vld [vmem:[%s8419_s2 + $0x150] sm:$0xff] }
 0x2cf   : > { %v3538_v39 = vsub.f32 %v7351_v40, %v8508_v55  ;;  %v7415_v9 = vand.u32 4294901760, %v2309_v47  ;;  %v7546_v55 = vand.u32 4294901760, %v2303_v59 }
 0x2d0   : > { %2927 = vmatmul.f32.gmra.mxu2 %v2926_v18  ;;  %v2311_v18 = vld [vmem:[%s8419_s2 + $0x160] sm:$0xff] }
 0x2d1   : > { %3076 = vmatmul.f32.gmra.mxu3 %v7244_v3  ;;  %v3539_v30 = vand.u32 4294901760, %v3538_v39  ;;  %v7385_v42 = vand.u32 4294901760, %v2311_v18  ;;  %v7423_v45 = vsub.f32 %v2309_v47, %v7415_v9 }
 0x2d3   : > { %3439 = vmatpush.msra.mxu0 %v7385_v42  ;;  %3754 = vmatpush.msra.mxu3 %v7385_v42  ;;  %v7397_v26 = vsub.f32 %v2311_v18, %v7385_v42  ;;  %v8501_v25 = vand.u32 4294901760, %v7423_v45  ;;  %v7464_v47 = vpop.f32.mrf.mxu3 }
 0x2d5   : > { %2785 = vmatmul.f32.gmra.mxu0 %v8663_v21  ;;  %2854 = vmatmul.f32.gmra.mxu1 %v8664_v8  ;;  %v8503_v36 = vand.u32 4294901760, %v7397_v26  ;;  %v3562_v39 = vsub.f32 %v7423_v45, %v8501_v25  ;;  %v2304_v25 = vld [vmem:[%s8419_s2 + $0x128] sm:$0xff] }
 0x2d6   : > { %3669 = vmatpush.msra.mxu2 %v7397_v26 }
 0x2d7   : > { %v3550_v50 = vsub.f32 %v7397_v26, %v8503_v36 }
 0x2d8   : > { %2935 = vmatmul.f32.gmra.mxu2 %v2934_v10  ;;  %v2966_v10 = vand.u32 4294901760, %v2965_v56 }
 0x2d9   : > { %3080 = vmatmul.f32.gmra.mxu3 %v7262_v5  ;;  %v3551_v57 = vand.u32 4294901760, %v3550_v50 }
 0x2dd   : > { %2789 = vmatmul.f32.gmra.mxu0 %v8664_v8  ;;  %2858 = vmatmul.f32.gmra.mxu1 %v8665_v60  ;;  %v3544_v8 = vsub.f32 %v7374_v63, %v8506_v19 }
 0x2df   : > { %v3545_v32 = vand.u32 4294901760, %v3544_v8  ;;  %v2307_v8 = vld [vmem:[%s8419_s2 + $0x140] sm:$0xff] }
 0x2e0   : > { %2943 = vmatmul.f32.gmra.mxu2 %v2942_v44  ;;  %v7404_v44 = vpop.f32.mrf.mxu1 }
 0x2e1   : > { %3084 = vmatmul.f32.gmra.mxu3 %v7280_v37 }
 0x2e5   : > { %2793 = vmatmul.f32.gmra.mxu0 %v8665_v60  ;;  %2862 = vmatmul.f32.gmra.mxu1 %v7091_v34  ;;  %v2310_v60 = vld [vmem:[%s8419_s2 + $0x158] sm:$0xff] }
 0x2e8   : > { %2951 = vmatmul.f32.gmra.mxu2 %v2950_v49  ;;  %v7453_v18 = vpop.f32.mrf.mxu1 }
 0x2e9   : > { %3088 = vmatmul.f32.gmra.mxu3 %v7295_v52  ;;  %8667 = vst [vmem:[#allocation18_spill] sm:$0xff] %v7453_v18 }
 0x2ed   : > { %2797 = vmatmul.f32.gmra.mxu0 %v7091_v34  ;;  %2866 = vmatmul.f32.gmra.mxu1 %v7169_v48  ;;  %v3532_v34 = vsub.f32 %v7347_v17, %v8510_v51 }
 0x2ef   : > { %v3533_v21 = vand.u32 4294901760, %v3532_v34 }
 0x2f0   : > { %2959 = vmatmul.f32.gmra.mxu2 %v2958_v2  ;;  %v2308_v2 = vld [vmem:[%s8419_s2 + $0x148] sm:$0xff] }
 0x2f1   : > { %3092 = vmatmul.f32.gmra.mxu3 %v7310_v46  ;;  %3534 = vmatpush.msra.mxu1 %v3533_v21  ;;  %v7434_v34 = vand.u32 4294901760, %v2308_v2  ;;  %v7451_v21 = vpop.f32.mrf.mxu2 }
 0x2f3   : > { %3540 = vmatpush.msra.mxu1 %v3539_v30  ;;  %v7448_v56 = vsub.f32 %v2308_v2, %v7434_v34 }
 0x2f5   : > { %2801 = vmatmul.f32.gmra.mxu0 %v7169_v48  ;;  %2870 = vmatmul.f32.gmra.mxu1 %v7201_v29  ;;  %v7407_v48 = vand.u32 4294901760, %v2310_v60 }
 0x2f6   : > { %3546 = vmatpush.msra.mxu1 %v3545_v32  ;;  %v8499_v32 = vand.u32 4294901760, %v7448_v56 }
 0x2f7   : > { %3441 = vmatpush.msra.mxu0 %v7407_v48  ;;  %v7419_v49 = vsub.f32 %v2310_v60, %v7407_v48  ;;  %3756 = vmatpush.msra.mxu3 %v7407_v48  ;;  %v7460_v60 = vand.u32 4294901760, %v2307_v8 }
 0x2f8   : > { %2967 = vmatmul.f32.gmra.mxu2 %v2966_v10  ;;  %3552 = vmatpush.msra.mxu1 %v3551_v57  ;;  %v3563_v10 = vand.u32 4294901760, %v3562_v39  ;;  %v7488_v39 = vpop.f32.mrf.mxu1 }
 0x2f9   : > { %3096 = vmatmul.f32.gmra.mxu3 %v7326_v27  ;;  %v8502_v22 = vand.u32 4294901760, %v7419_v49  ;;  %3443 = vmatpush.msra.mxu0 %v7415_v9  ;;  %v7475_v57 = vsub.f32 %v2307_v8, %v7460_v60  ;;  %8669 = vst [vmem:[#allocation23_spill] sm:$0xff] %v7488_v39  ;;  %v2305_v8 = vld [vmem:[%s8419_s2 + $0x130] sm:$0xff] }
 0x2fa   : > { %3758 = vmatpush.msra.mxu3 %v7415_v9  ;;  %3672 = vmatpush.msra.mxu2 %v7419_v49 }
 0x2fb   : > { %3445 = vmatpush.msra.mxu0 %v7434_v34 }
 0x2fc   : > { %3675 = vmatpush.msra.mxu2 %v7423_v45  ;;  %3760 = vmatpush.msra.mxu3 %v7434_v34 }
 0x2fd   : > { %2805 = vmatmul.f32.gmra.mxu0 %v7201_v29  ;;  %3224 = vmatmul.f32.vlgmr.msrb.gmra.mxu1 %v2908_v15  ;;  %v3556_v29 = vsub.f32 %v7419_v49, %v8502_v22  ;;  %v7441_v15 = vpop.f32.mrf.mxu0 }
 0x2fe   : > { %3447 = vmatpush.msra.mxu0 %v7460_v60  ;;  %3678 = vmatpush.msra.mxu2 %v7448_v56 }
 0x2ff   : > { %v3557_v30 = vand.u32 4294901760, %v3556_v29  ;;  %3762 = vmatpush.msra.mxu3 %v7460_v60  ;;  %v8500_v29 = vand.u32 4294901760, %v7475_v57 }
 0x300   : > { %3335 = vmatmul.f32.vlgmr.msrb.gmra.mxu2 %v7179_v61  ;;  %v7539_v36 = vpop.f32.mrf.mxu1 }
 0x301   : > { %3400 = vmatmul.f32.vlgmr.msrb.gmra.mxu3 %v7179_v61  ;;  %3558 = vmatpush.msra.mxu1 %v3557_v30  ;;  %v3568_v61 = vsub.f32 %v7448_v56, %v8499_v32  ;;  %8673 = vst [vmem:[#allocation22_spill] sm:$0xff] %v7539_v36  ;;  %v2299_v36 = vld [vmem:[%s8419_s2 + $0x100] sm:$0xff] }
 0x302   : > { %3681 = vmatpush.msra.mxu2 %v7475_v57 }
 0x303   : > { %3564 = vmatpush.msra.mxu1 %v3563_v10  ;;  %v3569_v50 = vand.u32 4294901760, %v3568_v61  ;;  %v3574_v10 = vsub.f32 %v7475_v57, %v8500_v29  ;;  %v7499_v61 = vand.u32 4294901760, %v2305_v8 }
 0x305   : > { %3150 = vmatmul.f32.vlgmr.msrb.gmra.mxu0 %v7193_v16  ;;  %3230 = vmatmul.f32.gmra.mxu1 %v2916_v0  ;;  %v7479_v2 = vpop.f32.mrf.mxu0  ;;  %v2306_v16 = vld [vmem:[%s8419_s2 + $0x138] sm:$0xff]  ;;  %v7486_v0 = vpop.f32.mrf.mxu2  ;;  %v7509_v32 = vsub.f32 %v2305_v8, %v7499_v61 }
 0x306   : > { %3570 = vmatpush.msra.mxu1 %v3569_v50  ;;  %8668 = vst [vmem:[#allocation20_spill] sm:$0xff] %v7486_v0  ;;  %v7491_v30 = vand.u32 4294901760, %v2306_v16  ;;  %v7501_v50 = vpop.f32.mrf.mxu3  ;;  %v8681_v0 = vand.u32 4294901760, %v7351_v40  ;;  %v4985_v40 = vld [vmem:[%s8422_s5] sm:$0xff] }
 0x307   : > { %8670 = vst [vmem:[#allocation11_spill] sm:$0xff] %v7501_v50 }
 0x308   : > { %3339 = vmatmul.f32.gmra.mxu2 %v7211_v7  ;;  %3449 = vmatpush.msra.mxu0 %v7491_v30  ;;  %v7505_v28 = vsub.f32 %v2306_v16, %v7491_v30  ;;  %v8507_v16 = vand.u32 4294901760, %v7509_v32 }
 0x309   : > { %3404 = vmatmul.f32.gmra.mxu3 %v7211_v7  ;;  %v3575_v7 = vand.u32 4294901760, %v3574_v10  ;;  %v7520_v10 = vand.u32 4294901760, %v2304_v25 }
 0x30a   : > { %3764 = vmatpush.msra.mxu3 %v7491_v30  ;;  %v8504_v29 = vand.u32 4294901760, %v7505_v28  ;;  %3451 = vmatpush.msra.mxu0 %v7499_v61  ;;  %v3586_v8 = vsub.f32 %v7509_v32, %v8507_v16 }
 0x30b   : > { %3576 = vmatpush.msra.mxu1 %v3575_v7  ;;  %v7534_v7 = vsub.f32 %v2304_v25, %v7520_v10  ;;  %3684 = vmatpush.msra.mxu2 %v7505_v28 }
 0x30c   : > { %3766 = vmatpush.msra.mxu3 %v7499_v61  ;;  %3453 = vmatpush.msra.mxu0 %v7520_v10  ;;  %v3587_v19 = vand.u32 4294901760, %v3586_v8  ;;  %v7561_v8 = vsub.f32 %v2303_v59, %v7546_v55 }
 0x30d   : > { %3155 = vmatmul.f32.gmra.mxu0 %v7229_v58  ;;  %3236 = vmatmul.f32.gmra.mxu1 %v2924_v38  ;;  %v3580_v58 = vsub.f32 %v7505_v28, %v8504_v29  ;;  %v7527_v38 = vpop.f32.mrf.mxu0  ;;  %v7537_v22 = vpop.f32.mrf.mxu2  ;;  %v8509_v16 = vand.u32 4294901760, %v7534_v7 }
 0x30e   : > { %8671 = vst [vmem:[#allocation25_spill] sm:$0xff] %v7527_v38  ;;  %3687 = vmatpush.msra.mxu2 %v7509_v32  ;;  %3768 = vmatpush.msra.mxu3 %v7520_v10  ;;  %v7550_v25 = vpop.f32.mrf.mxu3 }
 0x30f   : > { %8672 = vst [vmem:[#allocation24_spill] sm:$0xff] %v7537_v22  ;;  %v3581_v29 = vand.u32 4294901760, %v3580_v58  ;;  %3455 = vmatpush.msra.mxu0 %v7546_v55  ;;  %v7631_v22 = vand.u32 4294901760, %v2299_v36 }
 0x310   : > { %3343 = vmatmul.f32.gmra.mxu2 %v7244_v3  ;;  %8674 = vst [vmem:[#allocation12_spill] sm:$0xff] %v7550_v25  ;;  %3770 = vmatpush.msra.mxu3 %v7546_v55 }
 0x311   : > { %3408 = vmatmul.f32.gmra.mxu3 %v7244_v3  ;;  %3582 = vmatpush.msra.mxu1 %v3581_v29  ;;  %v3592_v3 = vsub.f32 %v7534_v7, %v8509_v16  ;;  %v8515_v16 = vand.u32 4294901760, %v7561_v8 }
 0x312   : > { %3690 = vmatpush.msra.mxu2 %v7534_v7 }
 0x313   : > { %3588 = vmatpush.msra.mxu1 %v3587_v19  ;;  %v3593_v58 = vand.u32 4294901760, %v3592_v3  ;;  %v7577_v19 = vpop.f32.mrf.mxu1  ;;  %v3598_v51 = vsub.f32 %v7561_v8, %v8515_v16 }
 0x314   : > { %3693 = vmatpush.msra.mxu2 %v7561_v8 }
 0x315   : > { %3160 = vmatmul.f32.gmra.mxu0 %v7254_v23  ;;  %3242 = vmatmul.f32.gmra.mxu1 %v2932_v4  ;;  %v7565_v29 = vpop.f32.mrf.mxu0  ;;  %v2302_v23 = vld [vmem:[%s8419_s2 + $0x118] sm:$0xff]  ;;  %v2301_v4 = vld [vmem:[%s8419_s2 + $0x110] sm:$0xff]  ;;  %v7575_v59 = vpop.f32.mrf.mxu2 }
 0x316   : > { %8675 = vst [vmem:[#allocation29_spill] sm:$0xff] %v7565_v29  ;;  %3594 = vmatpush.msra.mxu1 %v3593_v58  ;;  %v7580_v3 = vand.u32 4294901760, %v2302_v23  ;;  %v7582_v58 = vand.u32 4294901760, %v2301_v4  ;;  %v7587_v31 = vpop.f32.mrf.mxu3 }
 0x317   : > { %8676 = vst [vmem:[#allocation13_spill] sm:$0xff] %v7575_v59  ;;  %v8678_v59 = vand.u32 4294901760, %v7288_v62 }
 0x318   : > { %3347 = vmatmul.f32.gmra.mxu2 %v7262_v5  ;;  %8677 = vst [vmem:[#allocation33_spill] sm:$0xff] %v7587_v31  ;;  %3457 = vmatpush.msra.mxu0 %v7580_v3  ;;  %v7591_v13 = vsub.f32 %v2302_v23, %v7580_v3  ;;  %v7594_v1 = vsub.f32 %v2301_v4, %v7582_v58 }
 0x319   : > { %3412 = vmatmul.f32.gmra.mxu3 %v7262_v5  ;;  %v3599_v5 = vand.u32 4294901760, %v3598_v51  ;;  %v2300_v51 = vld [vmem:[%s8419_s2 + $0x108] sm:$0xff] }
 0x31a   : > { %3772 = vmatpush.msra.mxu3 %v7580_v3  ;;  %v8516_v16 = vand.u32 4294901760, %v7591_v13  ;;  %v8517_v31 = vand.u32 4294901760, %v7594_v1  ;;  %3696 = vmatpush.msra.mxu2 %v7591_v13 }
 0x31b   : > { %3600 = vmatpush.msra.mxu1 %v3599_v5  ;;  %3459 = vmatpush.msra.mxu0 %v7582_v58 }
 0x31c   : > { %v3604_v23 = vsub.f32 %v7591_v13, %v8516_v16  ;;  %3699 = vmatpush.msra.mxu2 %v7594_v1  ;;  %3774 = vmatpush.msra.mxu3 %v7582_v58  ;;  %v7622_v16 = vpop.f32.mrf.mxu1 }
 0x31d   : > { %3165 = vmatmul.f32.gmra.mxu0 %v7271_v33  ;;  %3248 = vmatmul.f32.gmra.mxu1 %v8678_v59  ;;  %v3610_v33 = vsub.f32 %v7594_v1, %v8517_v31  ;;  %v7614_v4 = vpop.f32.mrf.mxu0  ;;  %v7616_v59 = vand.u32 4294901760, %v2300_v51  ;;  %v7620_v5 = vpop.f32.mrf.mxu2 }
 0x31e   : > { %v3605_v31 = vand.u32 4294901760, %v3604_v23  ;;  %v7635_v39 = vpop.f32.mrf.mxu3  ;;  %v7639_v23 = vsub.f32 %v2299_v36, %v7631_v22 }
 0x31f   : > { %v3611_v25 = vand.u32 4294901760, %v3610_v33  ;;  %v7629_v29 = vsub.f32 %v2300_v51, %v7616_v59  ;;  %3461 = vmatpush.msra.mxu0 %v7616_v59  ;;  %3776 = vmatpush.msra.mxu3 %v7616_v59  ;;  %v8679_v33 = vand.u32 4294901760, %v7303_v14 }
 0x320   : > { %3351 = vmatmul.f32.gmra.mxu2 %v7280_v37  ;;  %3606 = vmatpush.msra.mxu1 %v3605_v31  ;;  %v3621_v31 = vand.u32 4294901760, %v7639_v23 }
 0x321   : > { %3416 = vmatmul.f32.gmra.mxu3 %v7280_v37  ;;  %v8518_v37 = vand.u32 4294901760, %v7629_v29  ;;  %3702 = vmatpush.msra.mxu2 %v7629_v29 }
 0x322   : > { %3778 = vmatpush.msra.mxu3 %v7631_v22  ;;  %3612 = vmatpush.msra.mxu1 %v3611_v25  ;;  %v8680_v25 = vand.u32 4294901760, %v7347_v17  ;;  %v8683_v17 = vand.u32 4294901760, %v7317_v35 }
 0x323   : > { %v3616_v51 = vsub.f32 %v7629_v29, %v8518_v37  ;;  %3705 = vmatpush.msra.mxu2 %v7639_v23  ;;  %3463 = vmatpush.msra.mxu0 %v7631_v22 }
 0x325   : > { %3170 = vmatmul.f32.gmra.mxu0 %v7288_v62  ;;  %3254 = vmatmul.f32.gmra.mxu1 %v8679_v33  ;;  %v7653_v36 = vpop.f32.mrf.mxu0  ;;  %v3617_v50 = vand.u32 4294901760, %v3616_v51  ;;  %v3622_v62 = vsub.f32 %v7639_v23, %v3621_v31  ;;  %v7660_v33 = vpop.f32.mrf.mxu2  ;;  %v8682_v51 = vand.u32 4294901760, %v7374_v63  ;;  %v7766_v23 = vand.u32 4294901760, %v7142_v41 }
 0x326   : > { %3831 = vmatpush.msrb.mxu0 %v8680_v25  ;;  %v7665_v18 = vpop.f32.mrf.mxu3  ;;  %v8687_v25 = vld [vmem:[#allocation45_spill] sm:$0xff] }
 0x327   : > { %3618 = vmatpush.msra.mxu1 %v3617_v50  ;;  %v3623_v38 = vand.u32 4294901760, %v3622_v62 }
 0x328   : > { %3355 = vmatmul.f32.gmra.mxu2 %v7295_v52  ;;  %3835 = vmatpush.msrb.mxu0 %v8681_v0  ;;  %v7679_v0 = vperm.slane %v4985_v40, 3 }
 0x329   : > { %3420 = vmatmul.f32.gmra.mxu3 %v7295_v52  ;;  %v2535_v37 = vpop.f32.mrf.mxu1  ;;  %3624 = vmatpush.msra.mxu1 %v3623_v38  ;;  %v8684_v52 = vand.u32 4294901760, %v7397_v26  ;;  %v8686_v38 = vand.u32 4294901760, %v7423_v45 }
 0x32a   : > { %3839 = vmatpush.msrb.mxu0 %v8682_v51  ;;  %v7690_v51 = vand.u32 4294901760, %v8687_v25 }
 0x32b   : > { %3926 = vmatpush.msrb.mxu1 %v7338_v53 }
 0x32c   : > { %3843 = vmatpush.msrb.mxu0 %v8684_v52  ;;  %v3465_v45 = vsub.f32 %v8687_v25, %v7690_v51 }
 0x32d   : > { %3175 = vmatmul.f32.gmra.mxu0 %v7303_v14  ;;  %3260 = vmatmul.f32.gmra.mxu1 %v8683_v17  ;;  %v8685_v14 = vand.u32 4294901760, %v7419_v49  ;;  %v8688_v49 = vand.u32 4294901760, %v7448_v56 }
 0x32e   : > { %3928 = vmatpush.msrb.mxu1 %v7343_v54  ;;  %v3466_v40 = vand.u32 4294901760, %v3465_v45 }
 0x32f   : > { %3847 = vmatpush.msrb.mxu0 %v8685_v14  ;;  %v8693_v14 = vld [vmem:[#allocation16_spill] sm:$0xff] }
 0x330   : > { %3359 = vmatmul.f32.gmra.mxu2 %v7310_v46  ;;  %3930 = vmatpush.msrb.mxu1 %v7362_v11  ;;  %v8690_v11 = vand.u32 4294901760, %v7475_v57 }
 0x331   : > { %3424 = vmatmul.f32.gmra.mxu3 %v7310_v46  ;;  %v2402_v63 = vpop.f32.mrf.mxu0  ;;  %v2623_v53 = vpop.f32.mrf.mxu2  ;;  %3851 = vmatpush.msrb.mxu0 %v8686_v38  ;;  %v8689_v46 = vand.u32 4294901760, %v7336_v20 }
 0x332   : > { %v2403_v26 = vadd.f32 %v2402_v63, %v7679_v0  ;;  %v2539_v50 = vpop.f32.mrf.mxu1  ;;  %3932 = vmatpush.msrb.mxu1 %v7385_v42  ;;  %v7717_v63 = vand.u32 4294901760, %v8693_v14 }
 0x333   : > { %v2703_v62 = vpop.f32.mrf.mxu3  ;;  %3855 = vmatpush.msrb.mxu0 %v8688_v49 }
 0x334   : > { %v2536_v54 = vadd.f32 %v2535_v37, %v2403_v26  ;;  %3934 = vmatpush.msrb.mxu1 %v7407_v48  ;;  %v8692_v48 = vand.u32 4294901760, %v7509_v32  ;;  %v3473_v26 = vsub.f32 %v8693_v14, %v7717_v63 }
 0x335   : > { %3180 = vmatmul.f32.gmra.mxu0 %v7317_v35  ;;  %3266 = vmatmul.f32.gmra.mxu1 %v8689_v46  ;;  %v8691_v35 = vand.u32 4294901760, %v7505_v28 }
 0x336   : > { %v2624_v17 = vadd.f32 %v2623_v53, %v2536_v54  ;;  %3859 = vmatpush.msrb.mxu0 %v8690_v11  ;;  %3936 = vmatpush.msrb.mxu1 %v7415_v9  ;;  %v3467_v53 = vsub.f32 %v3465_v45, %v3466_v40  ;;  %v8699_v54 = vand.u32 4294901760, %v7629_v29 }
 0x338   : > { %3363 = vmatmul.f32.gmra.mxu2 %v7326_v27  ;;  %v7704_v42 = vadd.f32 %v2703_v62, %v2624_v17  ;;  %3863 = vmatpush.msrb.mxu0 %v8691_v35  ;;  %v3468_v38 = vand.u32 4294901760, %v3467_v53  ;;  %v3474_v62 = vand.u32 4294901760, %v3473_v26  ;;  %v3489_v17 = vsub.f32 %v7142_v41, %v7766_v23 }
 0x339   : > { %3428 = vmatmul.f32.gmra.mxu3 %v7326_v27  ;;  %3938 = vmatpush.msrb.mxu1 %v7434_v34  ;;  %v8694_v27 = vand.u32 4294901760, %v7534_v7  ;;  %v8695_v34 = vand.u32 4294901760, %v7561_v8  ;;  %v8697_v8 = vand.u32 4294901760, %v7594_v1 }
 0x33a   : > { %v2410_v56 = vpop.f32.mrf.mxu0  ;;  %3867 = vmatpush.msrb.mxu0 %v8692_v48  ;;  %v7714_v52 = vpop.f32.mrf.mxu1  ;;  %v3475_v1 = vsub.f32 %v3473_v26, %v3474_v62  ;;  %v2387_v48 = vadd.f32 %v7614_v4, %v7679_v0  ;;  %v7796_v4 = vand.u32 4294901760, %v7189_v6 }
 0x33b   : > { %v2628_v37 = vpop.f32.mrf.mxu2  ;;  %v2411_v57 = vadd.f32 %v2410_v56, %v7679_v0  ;;  %3940 = vmatpush.msrb.mxu1 %v7460_v60  ;;  %v8696_v60 = vand.u32 4294901760, %v7591_v13  ;;  %v3490_v56 = vand.u32 4294901760, %v3489_v17 }
 0x33c   : > { %v2709_v9 = vpop.f32.mrf.mxu3  ;;  %3871 = vmatpush.msrb.mxu0 %v8694_v27 }
 0x33d   : > { %v2540_v28 = vadd.f32 %v2539_v50, %v2411_v57  ;;  %3185 = vmatmul.f32.gmra.mxu0 %v7336_v20  ;;  %3626 = vmatmul.f32.vlgmr.msra.gmra.mxu1 %v7690_v51  ;;  %v3491_v41 = vsub.f32 %v3489_v17, %v3490_v56 }
 0x33e   : > { %3942 = vmatpush.msrb.mxu1 %v7491_v30  ;;  %3875 = vmatpush.msrb.mxu0 %v8695_v34 }
 0x33f   : > { %v2629_v32 = vadd.f32 %v2628_v37, %v2540_v28  ;;  %v7781_v37 = vand.u32 4294901760, %v7146_v12  ;;  %v3492_v28 = vand.u32 4294901760, %v3491_v41 }
 0x340   : > { %3708 = vmatmul.f32.vlgmr.msra.gmra.mxu2 %v3465_v45  ;;  %3944 = vmatpush.msrb.mxu1 %v7499_v61  ;;  %v8698_v61 = vld [vmem:[#allocation21_spill] sm:$0xff] }
 0x341   : > { %3879 = vmatpush.msrb.mxu0 %v8696_v60  ;;  %v7732_v7 = vadd.f32 %v2709_v9, %v2629_v32  ;;  %3782 = vmatmul.f32.vlgmr.msra.gmra.mxu3 %v3466_v40  ;;  %v7744_v25 = vand.u32 4294901760, %v8698_v61  ;;  %v3497_v57 = vsub.f32 %v7146_v12, %v7781_v37  ;;  %v2528_v40 = vadd.f32 %v7577_v19, %v2387_v48 }
 0x342   : > { %v7734_v20 = vpop.f32.mrf.mxu0  ;;  %3946 = vmatpush.msrb.mxu1 %v7520_v10  ;;  %v7741_v50 = vpop.f32.mrf.mxu1  ;;  %v2395_v12 = vadd.f32 %v7653_v36, %v7679_v0  ;;  %v7809_v36 = vand.u32 4294901760, %v7222_v24  ;;  %v7821_v48 = vand.u32 4294901760, %v7235_v43 }
 0x343   : > { %v7736_v30 = vpop.f32.mrf.mxu2  ;;  %3883 = vmatpush.msrb.mxu0 %v8697_v8  ;;  %v3481_v10 = vsub.f32 %v8698_v61, %v7744_v25  ;;  %v3498_v34 = vand.u32 4294901760, %v3497_v57  ;;  %v2614_v53 = vadd.f32 %v7620_v5, %v2528_v40 }
 0x344   : > { %v7746_v13 = vpop.f32.mrf.mxu3  ;;  %3948 = vmatpush.msrb.mxu1 %v7546_v55  ;;  %v2532_v8 = vadd.f32 %v7622_v16, %v2395_v12 }
 0x345   : > { %3887 = vmatpush.msrb.mxu0 %v8699_v54  ;;  %3630 = vmatmul.f32.gmra.mxu1 %v7717_v63  ;;  %v3482_v46 = vand.u32 4294901760, %v3481_v10  ;;  %v3499_v19 = vsub.f32 %v3497_v57, %v3498_v34  ;;  %v2692_v60 = vadd.f32 %v7635_v39, %v2614_v53  ;;  %v2363_v53 = vadd.f32 %v7479_v2, %v7679_v0 }
 0x346   : > { %3469 = vmatmul.f32.vlgmr.msra.gmra.mxu0 %v3468_v38  ;;  %3950 = vmatpush.msrb.mxu1 %v7580_v3  ;;  %v3476_v3 = vand.u32 4294901760, %v3475_v1 }
 0x347   : > { %3891 = vmatpush.msrb.mxu0 %v3621_v31  ;;  %v3500_v54 = vand.u32 4294901760, %v3499_v19 }
 0x348   : > { %3713 = vmatmul.f32.gmra.mxu2 %v3473_v26  ;;  %3952 = vmatpush.msrb.mxu1 %v7582_v58  ;;  %v3483_v58 = vsub.f32 %v3481_v10, %v3482_v46  ;;  %v3505_v26 = vsub.f32 %v7189_v6, %v7796_v4  ;;  %v2355_v6 = vadd.f32 %v7441_v15, %v7679_v0 }
 0x349   : > { %3788 = vmatmul.f32.gmra.mxu3 %v3474_v62 }
 0x34a   : > { %v7758_v55 = vpop.f32.mrf.mxu0  ;;  %3954 = vmatpush.msrb.mxu1 %v7616_v59  ;;  %v7763_v49 = vpop.f32.mrf.mxu1  ;;  %v3484_v35 = vand.u32 4294901760, %v3483_v58  ;;  %v3506_v1 = vand.u32 4294901760, %v3505_v26  ;;  %v3513_v58 = vsub.f32 %v7222_v24, %v7809_v36  ;;  %v2512_v41 = vadd.f32 %v7404_v44, %v2355_v6 }
 0x34b   : > { %v7760_v29 = vpop.f32.mrf.mxu2  ;;  %v3521_v24 = vsub.f32 %v7235_v43, %v7821_v48 }
 0x34c   : > { %v7768_v31 = vpop.f32.mrf.mxu3  ;;  %3956 = vmatpush.msrb.mxu1 %v7631_v22  ;;  %v3507_v16 = vsub.f32 %v3505_v26, %v3506_v1 }
 0x34d   : > { %3634 = vmatmul.f32.gmra.mxu1 %v7744_v25 }
 0x34e   : > { %3477 = vmatmul.f32.gmra.mxu0 %v3476_v3  ;;  %v2619_v3 = vadd.f32 %v7660_v33, %v2532_v8  ;;  %v3508_v40 = vand.u32 4294901760, %v3507_v16  ;;  %v3522_v8 = vand.u32 4294901760, %v3521_v24 }
 0x350   : > { %3718 = vmatmul.f32.gmra.mxu2 %v3481_v10 }
 0x351   : > { %3794 = vmatmul.f32.gmra.mxu3 %v3482_v46 }
 0x352   : > { %v7774_v59 = vpop.f32.mrf.mxu0  ;;  %v7778_v45 = vpop.f32.mrf.mxu1 }
 0x353   : > { %v7776_v11 = vpop.f32.mrf.mxu2 }
 0x354   : > { %v7783_v22 = vpop.f32.mrf.mxu3 }
 0x355   : > { %3638 = vmatmul.f32.gmra.mxu1 %v7766_v23 }
 0x356   : > { %3485 = vmatmul.f32.gmra.mxu0 %v3484_v35 }
 0x358   : > { %3723 = vmatmul.f32.gmra.mxu2 %v3489_v17  ;;  %v2698_v17 = vadd.f32 %v7665_v18, %v2619_v3  ;;  %v2594_v18 = vadd.f32 %v7451_v21, %v2512_v41 }
 0x359   : > { %3800 = vmatmul.f32.gmra.mxu3 %v3490_v56 }
 0x35a   : > { %v7791_v14 = vpop.f32.mrf.mxu0  ;;  %v2859_v27 = vpop.f32.mrf.mxu1 }
 0x35b   : > { %v7793_v9 = vpop.f32.mrf.mxu2 }
 0x35c   : > { %v7798_v32 = vpop.f32.mrf.mxu3 }
 0x35d   : > { %3642 = vmatmul.f32.gmra.mxu1 %v7781_v37 }
 0x35e   : > { %3493 = vmatmul.f32.gmra.mxu0 %v3492_v28 }
 0x360   : > { %3728 = vmatmul.f32.gmra.mxu2 %v3497_v57 }
 0x361   : > { %3806 = vmatmul.f32.gmra.mxu3 %v3498_v34 }
 0x362   : > { %v2794_v38 = vpop.f32.mrf.mxu0  ;;  %v2863_v5 = vpop.f32.mrf.mxu1 }
 0x363   : > { %v2944_v62 = vpop.f32.mrf.mxu2  ;;  %v2795_v61 = vadd.f32 %v2794_v38, %v2692_v60  ;;  %v2668_v38 = vadd.f32 %v7464_v47, %v2594_v18  ;;  %v3523_v47 = vsub.f32 %v3521_v24, %v3522_v8 }
 0x364   : > { %v3085_v10 = vpop.f32.mrf.mxu3 }
 0x365   : > { %v2860_v46 = vadd.f32 %v2859_v27, %v2795_v61  ;;  %3646 = vmatmul.f32.gmra.mxu1 %v7796_v4  ;;  %v3514_v27 = vand.u32 4294901760, %v3513_v58  ;;  %v2779_v2 = vadd.f32 %v7734_v20, %v2668_v38  ;;  %v8703_v20 = vld [vmem:[#allocation11_spill] sm:$0xff]  ;;  %v8707_v38 = vld [vmem:[#allocation12_spill] sm:$0xff] }
 0x366   : > { %3501 = vmatmul.f32.gmra.mxu0 %v3500_v54 }
 0x367   : > { %v2945_v39 = vadd.f32 %v2944_v62, %v2860_v46  ;;  %v3515_v44 = vsub.f32 %v3513_v58, %v3514_v27  ;;  %v8700_v62 = vld [vmem:[#allocation18_spill] sm:$0xff]  ;;  %v8702_v46 = vld [vmem:[#allocation25_spill] sm:$0xff]  ;;  %v2844_v16 = vadd.f32 %v7714_v52, %v2779_v2  ;;  %v8705_v52 = vld [vmem:[#allocation24_spill] sm:$0xff] }
 0x368   : > { %3733 = vmatmul.f32.gmra.mxu2 %v3505_v26  ;;  %v2516_v61 = vadd.f32 %v8700_v62, %v2363_v53  ;;  %v2371_v6 = vadd.f32 %v8702_v46, %v7679_v0  ;;  %v8706_v53 = vld [vmem:[#allocation29_spill] sm:$0xff]  ;;  %v8708_v62 = vld [vmem:[#allocation22_spill] sm:$0xff] }
 0x369   : > { %v7818_v35 = vadd.f32 %v3085_v10, %v2945_v39  ;;  %3812 = vmatmul.f32.gmra.mxu3 %v3506_v1  ;;  %v3516_v21 = vand.u32 4294901760, %v3515_v44  ;;  %v8701_v10 = vld [vmem:[#allocation20_spill] sm:$0xff] }
 0x36a   : > { %v2798_v56 = vpop.f32.mrf.mxu0  ;;  %v2867_v15 = vpop.f32.mrf.mxu1  ;;  %v2599_v3 = vadd.f32 %v8701_v10, %v2516_v61 }
 0x36b   : > { %v2952_v33 = vpop.f32.mrf.mxu2  ;;  %v2799_v57 = vadd.f32 %v2798_v56, %v2698_v17 }
 0x36c   : > { %v3089_v28 = vpop.f32.mrf.mxu3  ;;  %v2674_v56 = vadd.f32 %v8703_v20, %v2599_v3 }
 0x36d   : > { %v2864_v34 = vadd.f32 %v2863_v5, %v2799_v57  ;;  %3650 = vmatmul.f32.gmra.mxu1 %v7809_v36 }
 0x36e   : > { %3509 = vmatmul.f32.gmra.mxu0 %v3508_v40  ;;  %v3524_v40 = vand.u32 4294901760, %v3523_v47  ;;  %v8710_v47 = vld [vmem:[#allocation33_spill] sm:$0xff] }
 0x36f   : > { %v2953_v12 = vadd.f32 %v2952_v33, %v2864_v34  ;;  %v8704_v33 = vld [vmem:[#allocation23_spill] sm:$0xff]  ;;  %v2783_v34 = vadd.f32 %v7758_v55, %v2674_v56 }
 0x370   : > { %3738 = vmatmul.f32.gmra.mxu2 %v3513_v58  ;;  %v2520_v41 = vadd.f32 %v8704_v33, %v2371_v6 }
 0x371   : > { %v7830_v19 = vadd.f32 %v3089_v28, %v2953_v12  ;;  %3818 = vmatmul.f32.gmra.mxu3 %v3514_v27  ;;  %v2913_v28 = vadd.f32 %v7736_v30, %v2844_v16  ;;  %v2379_v12 = vadd.f32 %v8706_v53, %v7679_v0 }
 0x372   : > { %v2802_v26 = vpop.f32.mrf.mxu0  ;;  %v2871_v5 = vpop.f32.mrf.mxu1  ;;  %v2604_v18 = vadd.f32 %v8705_v52, %v2520_v41 }
 0x373   : > { %v2960_v60 = vpop.f32.mrf.mxu2  ;;  %v2803_v43 = vadd.f32 %v2802_v26, %v7704_v42  ;;  %v3070_v26 = vadd.f32 %v7746_v13, %v2913_v28  ;;  %v2524_v61 = vadd.f32 %v8708_v62, %v2379_v12 }
 0x374   : > { %v3093_v54 = vpop.f32.mrf.mxu3  ;;  %v2680_v55 = vadd.f32 %v8707_v38, %v2604_v18 }
 0x375   : > { %v2868_v1 = vadd.f32 %v2867_v15, %v2803_v43  ;;  %3654 = vmatmul.f32.gmra.mxu1 %v7821_v48 }
 0x376   : > { %3517 = vmatmul.f32.gmra.mxu0 %v3516_v21  ;;  %v2787_v0 = vadd.f32 %v7774_v59, %v2680_v55 }
 0x377   : > { %v2961_v39 = vadd.f32 %v2960_v60, %v2868_v1 }
 0x378   : > { %3743 = vmatmul.f32.gmra.mxu2 %v3521_v24  ;;  %v2852_v3 = vadd.f32 %v7763_v49, %v2787_v0 }
 0x379   : > { %v7841_v42 = vadd.f32 %v3093_v54, %v2961_v39  ;;  %3824 = vmatmul.f32.gmra.mxu3 %v3522_v8 }
 0x37a   : > { %v2806_v58 = vpop.f32.mrf.mxu0  ;;  %v3225_v15 = vpop.f32.mrf.mxu1 }
 0x37b   : > { %v2968_v17 = vpop.f32.mrf.mxu2  ;;  %v2807_v57 = vadd.f32 %v2806_v58, %v7732_v7  ;;  %v2848_v7 = vadd.f32 %v7741_v50, %v2783_v34  ;;  %v8709_v50 = vld [vmem:[#allocation13_spill] sm:$0xff] }
 0x37c   : > { %v3097_v27 = vpop.f32.mrf.mxu3  ;;  %v2609_v13 = vadd.f32 %v8709_v50, %v2524_v61 }
 0x37d   : > { %v2872_v24 = vadd.f32 %v2871_v5, %v2807_v57  ;;  %3958 = vmatmul.f32.vlgmr.msrb.gmra.mxu1 %v7690_v51  ;;  %v2921_v54 = vadd.f32 %v7760_v29, %v2848_v7 }
 0x37e   : > { %3525 = vmatmul.f32.gmra.mxu0 %v3524_v40  ;;  %v2686_v29 = vadd.f32 %v8710_v47, %v2609_v13 }
 0x37f   : > { %v2969_v44 = vadd.f32 %v2968_v17, %v2872_v24  ;;  %v3074_v10 = vadd.f32 %v7768_v31, %v2921_v54 }
 0x380   : > { %v2791_v17 = vadd.f32 %v7791_v14, %v2686_v29 }
 0x381   : > { %v7854_v60 = vadd.f32 %v3097_v27, %v2969_v44 }
 0x382   : > { %v3151_v8 = vpop.f32.mrf.mxu0  ;;  %v3231_v5 = vpop.f32.mrf.mxu1  ;;  %v2856_v56 = vadd.f32 %v7778_v45, %v2791_v17 }
 0x383   : > { %v3336_v30 = vpop.f32.mrf.mxu2  ;;  %v3152_v43 = vadd.f32 %v3151_v8, %v3070_v26 }
 0x384   : > { %v3401_v21 = vpop.f32.mrf.mxu3 }
 0x385   : > { %v3226_v2 = vadd.f32 %v3225_v15, %v3152_v43  ;;  %3962 = vmatmul.f32.gmra.mxu1 %v7717_v63 }
 0x386   : > { %3893 = vmatmul.f32.vlgmr.msrb.gmra.mxu0 %v7690_v51  ;;  %v2929_v51 = vadd.f32 %v7776_v11, %v2852_v3  ;;  %v2937_v11 = vadd.f32 %v7793_v9, %v2856_v56 }
 0x387   : > { %v3337_v1 = vadd.f32 %v3336_v30, %v3226_v2 }
 0x388   : > { %v3078_v49 = vadd.f32 %v7783_v22, %v2929_v51  ;;  %v3082_v14 = vadd.f32 %v7798_v32, %v2937_v11 }
 0x389   : > { %v7865_v46 = vadd.f32 %v3401_v21, %v3337_v1 }
 0x38a   : > { %v3156_v6 = vpop.f32.mrf.mxu0  ;;  %v3237_v59 = vpop.f32.mrf.mxu1 }
 0x38b   : > { %v3340_v39 = vpop.f32.mrf.mxu2  ;;  %v3157_v16 = vadd.f32 %v3156_v6, %v3074_v10 }
 0x38c   : > { %v3405_v58 = vpop.f32.mrf.mxu3 }
 0x38d   : > { %v3232_v20 = vadd.f32 %v3231_v5, %v3157_v16  ;;  %3966 = vmatmul.f32.gmra.mxu1 %v7744_v25 }
 0x38e   : > { %3897 = vmatmul.f32.gmra.mxu0 %v7717_v63 }
 0x38f   : > { %v3341_v31 = vadd.f32 %v3340_v39, %v3232_v20 }
 0x391   : > { %v3406_v33 = vadd.f32 %v3405_v58, %v3341_v31 }
 0x392   : > { %v3161_v41 = vpop.f32.mrf.mxu0  ;;  %v3243_v40 = vpop.f32.mrf.mxu1 }
 0x393   : > { %v3344_v57 = vpop.f32.mrf.mxu2  ;;  %v3162_v15 = vadd.f32 %v3161_v41, %v3078_v49 }
 0x394   : > { %v3409_v27 = vpop.f32.mrf.mxu3 }
 0x395   : > { %v3238_v28 = vadd.f32 %v3237_v59, %v3162_v15  ;;  %3970 = vmatmul.f32.gmra.mxu1 %v7766_v23 }
 0x396   : > { %3901 = vmatmul.f32.gmra.mxu0 %v7744_v25 }
 0x397   : > { %v3345_v63 = vadd.f32 %v3344_v57, %v3238_v28 }
 0x399   : > { %v3410_v34 = vadd.f32 %v3409_v27, %v3345_v63 }
 0x39a   : > { %v3166_v22 = vpop.f32.mrf.mxu0  ;;  %v3249_v52 = vpop.f32.mrf.mxu1 }
 0x39b   : > { %v3348_v24 = vpop.f32.mrf.mxu2  ;;  %v3167_v45 = vadd.f32 %v3166_v22, %v3082_v14 }
 0x39c   : > { %v3413_v18 = vpop.f32.mrf.mxu3 }
 0x39d   : > { %v3244_v53 = vadd.f32 %v3243_v40, %v3167_v45  ;;  %3974 = vmatmul.f32.gmra.mxu1 %v7781_v37 }
 0x39e   : > { %3905 = vmatmul.f32.gmra.mxu0 %v7766_v23 }
 0x39f   : > { %v3349_v9 = vadd.f32 %v3348_v24, %v3244_v53 }
 0x3a1   : > { %v3414_v12 = vadd.f32 %v3413_v18, %v3349_v9 }
 0x3a2   : > { %v3171_v44 = vpop.f32.mrf.mxu0  ;;  %v3255_v26 = vpop.f32.mrf.mxu1 }
 0x3a3   : > { %v3172_v25 = vadd.f32 %v3171_v44, %v7818_v35  ;;  %v3352_v7 = vpop.f32.mrf.mxu2 }
 0x3a4   : > { %v3417_v32 = vpop.f32.mrf.mxu3 }
 0x3a5   : > { %v3250_v8 = vadd.f32 %v3249_v52, %v3172_v25  ;;  %3978 = vmatmul.f32.gmra.mxu1 %v7796_v4 }
 0x3a6   : > { %3909 = vmatmul.f32.gmra.mxu0 %v7781_v37 }
 0x3a7   : > { %v3353_v30 = vadd.f32 %v3352_v7, %v3250_v8 }
 0x3a9   : > { %v3418_v38 = vadd.f32 %v3417_v32, %v3353_v30 }
 0x3aa   : > { %v3176_v55 = vpop.f32.mrf.mxu0  ;;  %v3261_v62 = vpop.f32.mrf.mxu1 }
 0x3ab   : > { %v3177_v23 = vadd.f32 %v3176_v55, %v7830_v19  ;;  %v3356_v35 = vpop.f32.mrf.mxu2  ;;  %v4070_v55 = vld [vmem:[%s8420_s3 + $0x78] sm:$0xff] }
 0x3ac   : > { %v3421_v5 = vpop.f32.mrf.mxu3 }
 0x3ad   : > { %v3256_v61 = vadd.f32 %v3255_v26, %v3177_v23  ;;  %3982 = vmatmul.f32.gmra.mxu1 %v7809_v36 }
 0x3ae   : > { %3913 = vmatmul.f32.gmra.mxu0 %v7796_v4 }
 0x3af   : > { %v3357_v43 = vadd.f32 %v3356_v35, %v3256_v61  ;;  %v7908_v61 = vand.u32 4294901760, %v4070_v55 }
 0x3b1   : > { %v3422_v21 = vadd.f32 %v3421_v5, %v3357_v43  ;;  %4096 = vmatpush.msrb.mxu2 %v7908_v61  ;;  %4400 = vmatpush.msra.mxu1 %v7908_v61 }
 0x3b2   : > { %v3181_v54 = vpop.f32.mrf.mxu0  ;;  %v3267_v0 = vpop.f32.mrf.mxu1 }
 0x3b3   : > { %v3182_v37 = vadd.f32 %v3181_v54, %v7841_v42  ;;  %v3360_v39 = vpop.f32.mrf.mxu2 }
 0x3b4   : > { %v3425_v16 = vpop.f32.mrf.mxu3 }
 0x3b5   : > { %v3262_v2 = vadd.f32 %v3261_v62, %v3182_v37  ;;  %3986 = vmatmul.f32.gmra.mxu1 %v7821_v48 }
 0x3b6   : > { %3917 = vmatmul.f32.gmra.mxu0 %v7809_v36 }
 0x3b7   : > { %v3361_v35 = vadd.f32 %v3360_v39, %v3262_v2 }
 0x3ba   : > { %v3186_v19 = vpop.f32.mrf.mxu0  ;;  %v3627_v13 = vpop.f32.mrf.mxu1 }
 0x3bb   : > { %v3187_v50 = vadd.f32 %v3186_v19, %v7854_v60  ;;  %v3364_v60 = vpop.f32.mrf.mxu2 }
 0x3bc   : > { %v7894_v20 = vpop.f32.mrf.mxu3 }
 0x3bd   : > { %v7890_v4 = vadd.f32 %v3267_v0, %v3187_v50  ;;  %v7915_v0 = vsub.f32 %v4070_v55, %v7908_v61  ;;  %v4066_v55 = vld [vmem:[%s8420_s3 + $0x58] sm:$0xff] }
 0x3be   : > { %3921 = vmatmul.f32.gmra.mxu0 %v7821_v48 }
 0x3bf   : > { %v4138_v39 = vand.u32 4294901760, %v7915_v0 }
 0x3c1   : > { %4333 = vmatpush.msra.mxu0 %v4138_v39 }
 0x3c2   : > { %v3631_v3 = vpop.f32.mrf.mxu1 }
 0x3c3   : > { %v3470_v1 = vpop.f32.mrf.mxu0 }
 0x3c4   : > { %v3471_v10 = vadd.f32 %v3470_v1, %v7865_v46  ;;  %v3709_v46 = vpop.f32.mrf.mxu2  ;;  %v3783_v57 = vpop.f32.mrf.mxu3 }
 0x3c6   : > { %v3628_v6 = vadd.f32 %v3627_v13, %v3471_v10  ;;  %v3426_v10 = vadd.f32 %v3425_v16, %v3361_v35 }
 0x3c8   : > { %v3710_v9 = vadd.f32 %v3709_v46, %v3628_v6 }
 0x3ca   : > { %v3635_v29 = vpop.f32.mrf.mxu1  ;;  %v3784_v44 = vadd.f32 %v3783_v57, %v3710_v9 }
 0x3cb   : > { %v3478_v42 = vpop.f32.mrf.mxu0 }
 0x3cc   : > { %v3479_v47 = vadd.f32 %v3478_v42, %v3406_v33  ;;  %v3714_v27 = vpop.f32.mrf.mxu2  ;;  %v3789_v14 = vpop.f32.mrf.mxu3 }
 0x3ce   : > { %v3632_v36 = vadd.f32 %v3631_v3, %v3479_v47  ;;  %v3365_v3 = vadd.f32 %v3364_v60, %v7890_v4  ;;  %v4069_v47 = vld [vmem:[%s8420_s3 + $0x70] sm:$0xff] }
 0x3d0   : > { %v3715_v32 = vadd.f32 %v3714_v27, %v3632_v36  ;;  %v4067_v36 = vld [vmem:[%s8420_s3 + $0x60] sm:$0xff] }
 0x3d2   : > { %v3639_v51 = vpop.f32.mrf.mxu1  ;;  %v3790_v43 = vadd.f32 %v3789_v14, %v3715_v32 }
 0x3d3   : > { %v3486_v59 = vpop.f32.mrf.mxu0 }
 0x3d4   : > { %v3487_v58 = vadd.f32 %v3486_v59, %v3410_v34  ;;  %v3719_v24 = vpop.f32.mrf.mxu2  ;;  %v3795_v52 = vpop.f32.mrf.mxu3  ;;  %v7928_v59 = vand.u32 4294901760, %v4069_v47 }
 0x3d6   : > { %v3636_v17 = vadd.f32 %v3635_v29, %v3487_v58  ;;  %v4068_v29 = vld [vmem:[%s8420_s3 + $0x68] sm:$0xff]  ;;  %v7932_v58 = vand.u32 4294901760, %v4067_v36  ;;  %4098 = vmatpush.msrb.mxu2 %v7928_v59  ;;  %v7939_v46 = vsub.f32 %v4069_v47, %v7928_v59  ;;  %4402 = vmatpush.msra.mxu1 %v7928_v59 }
 0x3d7   : > { %v7930_v4 = vand.u32 4294901760, %v4068_v29 }
 0x3d8   : > { %v7945_v57 = vsub.f32 %v4067_v36, %v7932_v58 }
 0x3d9   : > { %4100 = vmatpush.msrb.mxu2 %v7930_v4  ;;  %4404 = vmatpush.msra.mxu1 %v7930_v4 }
 0x3da   : > { %v3643_v49 = vpop.f32.mrf.mxu1 }
 0x3db   : > { %v3494_v31 = vpop.f32.mrf.mxu0  ;;  %4102 = vmatpush.msrb.mxu2 %v7932_v58  ;;  %4406 = vmatpush.msra.mxu1 %v7932_v58 }
 0x3dc   : > { %v3495_v48 = vadd.f32 %v3494_v31, %v3414_v12  ;;  %v3724_v12 = vpop.f32.mrf.mxu2  ;;  %v7902_v25 = vpop.f32.mrf.mxu3  ;;  %v4139_v31 = vsub.f32 %v7915_v0, %v4138_v39 }
 0x3de   : > { %v3640_v56 = vadd.f32 %v3639_v51, %v3495_v48  ;;  %v4140_v27 = vand.u32 4294901760, %v4139_v31 }
 0x3e0   : > { %v3725_v51 = vadd.f32 %v3724_v12, %v3640_v56  ;;  %4141 = vmatpush.msrb.mxu3 %v4140_v27 }
 0x3e2   : > { %v3647_v40 = vpop.f32.mrf.mxu1 }
 0x3e3   : > { %v3502_v41 = vpop.f32.mrf.mxu0 }
 0x3e4   : > { %v3503_v15 = vadd.f32 %v3502_v41, %v3418_v38  ;;  %v8711_v38 = vld [vmem:[#allocation9_spill] sm:$0xff]  ;;  %v3729_v23 = vpop.f32.mrf.mxu2  ;;  %v3807_v19 = vpop.f32.mrf.mxu3  ;;  %v7942_v41 = vsub.f32 %v4068_v29, %v7930_v4 }
 0x3e5   : > { %vm3998_vm3 = vcmp.lt.s32.totalorder %v8711_v38, 4  ;;  %v4449_v38 = vld [vmem:[#allocation3 + $0x60] sm:$0xff] }
 0x3e6   : > { %v3644_v33 = vadd.f32 %v3643_v49, %v3503_v15  ;;  %v4150_v14 = vand.u32 4294901760, %v7942_v41 }
 0x3e8   : > { %v3730_v60 = vadd.f32 %v3729_v23, %v3644_v33  ;;  %v4065_v23 = vld [vmem:[%s8420_s3 + $0x50] sm:$0xff] }
 0x3ea   : > { %v7896_v63 = vpop.f32.mrf.mxu1  ;;  %v7961_v32 = vadd.f32 %v3807_v19, %v3730_v60  ;;  %v7981_v19 = vand.u32 4294901760, %v4065_v23 }
 0x3eb   : > { %v3510_v11 = vpop.f32.mrf.mxu0 }
 0x3ec   : > { %v3511_v28 = vadd.f32 %v3510_v11, %v3422_v21  ;;  %v3720_v21 = vadd.f32 %v3719_v24, %v3636_v17  ;;  %v3734_v48 = vpop.f32.mrf.mxu2  ;;  %v4156_v24 = vand.u32 4294901760, %v7945_v57  ;;  %v3813_v9 = vpop.f32.mrf.mxu3  ;;  %v7993_v39 = vsub.f32 %v4065_v23, %v7981_v19 }
 0x3ee   : > { %v3648_v34 = vadd.f32 %v3647_v40, %v3511_v28  ;;  %v3796_v6 = vadd.f32 %v3795_v52, %v3720_v21  ;;  %v4144_v28 = vand.u32 4294901760, %v7939_v46  ;;  %v7954_v52 = vadd.f32 %v7894_v20, %v3365_v3  ;;  %v4063_v21 = vld [vmem:[%s8420_s3 + $0x40] sm:$0xff] }
 0x3ef   : > { %v4168_v31 = vand.u32 4294901760, %v7993_v39 }
 0x3f0   : > { %v3735_v56 = vadd.f32 %v3734_v48, %v3648_v34  ;;  %4337 = vmatpush.msra.mxu0 %v4144_v28 }
 0x3f2   : > { %v7898_v45 = vpop.f32.mrf.mxu1  ;;  %v7963_v20 = vadd.f32 %v3813_v9, %v3735_v56  ;;  %4341 = vmatpush.msra.mxu0 %v4150_v14 }
 0x3f3   : > { %v3518_v22 = vpop.f32.mrf.mxu0 }
 0x3f4   : > { %v3519_v15 = vadd.f32 %v3518_v22, %v3426_v10  ;;  %v7987_v10 = vand.u32 4294901760, %v4063_v21  ;;  %4345 = vmatpush.msra.mxu0 %v4156_v24 }
 0x3f6   : > { %v8000_v36 = vsub.f32 %v4063_v21, %v7987_v10 }
 0x3fa   : > { %v3959_v53 = vpop.f32.mrf.mxu1 }
 0x3fb   : > { %v7900_v18 = vpop.f32.mrf.mxu0 }
 0x402   : > { %v3963_v8 = vpop.f32.mrf.mxu1 }
 0x403   : > { %v3894_v26 = vpop.f32.mrf.mxu0 }
 0x404   : > { %v3895_v7 = vadd.f32 %v3894_v26, %v3784_v44  ;;  %v4145_v44 = vsub.f32 %v7939_v46, %v4144_v28  ;;  %v4151_v26 = vsub.f32 %v7942_v41, %v4150_v14  ;;  %v4169_v28 = vsub.f32 %v7993_v39, %v4168_v31  ;;  %v4062_v14 = vld [vmem:[%s8420_s3 + $0x38] sm:$0xff] }
 0x405   : > { %v8023_v9 = vand.u32 4294901760, %v4062_v14 }
 0x406   : > { %v3960_v30 = vadd.f32 %v3959_v53, %v3895_v7  ;;  %v4157_v7 = vsub.f32 %v7945_v57, %v4156_v24  ;;  %v4061_v24 = vld [vmem:[%s8420_s3 + $0x30] sm:$0xff] }
 0x408   : > { %v3990_v62 = vmax.f32 %v3960_v30, 0.0 }
 0x40a   : > { %v3999_v5 = vsel %vm3998_vm3, %v3990_v62, 0.0  ;;  %v3967_v13 = vpop.f32.mrf.mxu1  ;;  %v4064_v62 = vld [vmem:[%s8420_s3 + $0x48] sm:$0xff] }
 0x40b   : > { %v4007_v54 = vrot.slane %v3999_v5, 4  ;;  %v3898_v37 = vpop.f32.mrf.mxu0 }
 0x40c   : > { %v3899_v50 = vadd.f32 %v3898_v37, %v3790_v43  ;;  %v4146_v43 = vand.u32 4294901760, %v4145_v44  ;;  %v7979_v37 = vand.u32 4294901760, %v4066_v55 }
 0x40d   : > { %v4008_v1 = vadd.f32 %v4007_v54, %v3999_v5  ;;  %v4152_v5 = vand.u32 4294901760, %v4151_v26 }
 0x40e   : > { %v3964_v2 = vadd.f32 %v3963_v8, %v3899_v50  ;;  %v3802_v8 = vadd.f32 %v7902_v25, %v3725_v51  ;;  %v3652_v25 = vadd.f32 %v7896_v63, %v3519_v15  ;;  %v7983_v50 = vand.u32 4294901760, %v4064_v62  ;;  %4147 = vmatpush.msrb.mxu3 %v4146_v43  ;;  %4104 = vmatpush.msrb.mxu2 %v7979_v37 }
 0x40f   : > { %v4009_v42 = vrot.slane %v4008_v1, 2  ;;  %v4158_v63 = vand.u32 4294901760, %v4157_v7  ;;  %4408 = vmatpush.msra.mxu1 %v7979_v37  ;;  %v4180_v15 = vand.u32 4294901760, %v8000_v36  ;;  %v4170_v7 = vand.u32 4294901760, %v4169_v28 }
 0x410   : > { %v3991_v16 = vmax.f32 %v3964_v2, 0.0  ;;  %4153 = vmatpush.msrb.mxu3 %v4152_v5  ;;  %v7997_v29 = vsub.f32 %v4064_v62, %v7983_v50  ;;  %4106 = vmatpush.msrb.mxu2 %v7981_v19  ;;  %v8038_v62 = vsub.f32 %v4062_v14, %v8023_v9 }
 0x411   : > { %v4010_v17 = vadd.f32 %v4009_v42, %v4008_v1  ;;  %v7990_v42 = vsub.f32 %v4066_v55, %v7979_v37  ;;  %4410 = vmatpush.msra.mxu1 %v7981_v19 }
 0x412   : > { %v4000_v49 = vsel %vm3998_vm3, %v3991_v16, 0.0  ;;  %v3971_v22 = vpop.f32.mrf.mxu1  ;;  %v3739_v16 = vpop.f32.mrf.mxu2  ;;  %4159 = vmatpush.msrb.mxu3 %v4158_v63  ;;  %v4174_v56 = vand.u32 4294901760, %v7997_v29  ;;  %4108 = vmatpush.msrb.mxu2 %v7983_v50 }
 0x413   : > { %v4013_v40 = vrot.slane %v4000_v49, 4  ;;  %v3902_v33 = vpop.f32.mrf.mxu0  ;;  %v4011_v53 = vrot.slane %v4010_v17, 1  ;;  %v8006_v48 = vadd.f32 %v3739_v16, %v3652_v25  ;;  %4412 = vmatpush.msra.mxu1 %v7983_v50 }
 0x414   : > { %v3903_v11 = vadd.f32 %v3902_v33, %v3796_v6  ;;  %4110 = vmatpush.msrb.mxu2 %v7987_v10 }
 0x415   : > { %v4014_v34 = vadd.f32 %v4013_v40, %v4000_v49  ;;  %4414 = vmatpush.msra.mxu1 %v7987_v10 }
 0x416   : > { %v3968_v12 = vadd.f32 %v3967_v13, %v3903_v11  ;;  %v4012_v13 = vadd.f32 %v4011_v53, %v4010_v17  ;;  %v4162_v17 = vand.u32 4294901760, %v7990_v42  ;;  %4112 = vmatpush.msrb.mxu2 %v8023_v9 }
 0x417   : > { %v4015_v30 = vrot.slane %v4014_v34, 2  ;;  %4416 = vmatpush.msra.mxu1 %v8023_v9 }
 0x418   : > { %v3992_v35 = vmax.f32 %v3968_v12, 0.0  ;;  %v4163_v11 = vsub.f32 %v7990_v42, %v4162_v17  ;;  %4349 = vmatpush.msra.mxu0 %v4162_v17  ;;  %v4060_v12 = vld [vmem:[%s8420_s3 + $0x28] sm:$0xff] }
 0x419   : > { %v4016_v54 = vadd.f32 %v4015_v30, %v4014_v34  ;;  %v4175_v34 = vsub.f32 %v7997_v29, %v4174_v56  ;;  %v4059_v30 = vld [vmem:[%s8420_s3 + $0x20] sm:$0xff]  ;;  %v8044_v21 = vand.u32 4294901760, %v4060_v12 }
 0x41a   : > { %v4001_v1 = vsel %vm3998_vm3, %v3992_v35, 0.0  ;;  %v3975_v27 = vpop.f32.mrf.mxu1  ;;  %v4164_v26 = vand.u32 4294901760, %v4163_v11  ;;  %4353 = vmatpush.msra.mxu0 %v4168_v31  ;;  %v8049_v63 = vand.u32 4294901760, %v4059_v30 }
 0x41b   : > { %v4017_v2 = vrot.slane %v4016_v54, 1  ;;  %v4019_v3 = vrot.slane %v4001_v1, 4  ;;  %v3906_v6 = vpop.f32.mrf.mxu0  ;;  %v4176_v23 = vand.u32 4294901760, %v4175_v34 }
 0x41c   : > { %v3907_v47 = vadd.f32 %v3906_v6, %v3802_v8  ;;  %v8029_v8 = vand.u32 4294901760, %v4061_v24  ;;  %4165 = vmatpush.msrb.mxu3 %v4164_v26  ;;  %4357 = vmatpush.msra.mxu0 %v4174_v56  ;;  %v4058_v56 = vld [vmem:[%s8420_s3 + $0x18] sm:$0xff] }
 0x41d   : > { %v4018_v51 = vadd.f32 %v4017_v2, %v4016_v54  ;;  %v4020_v60 = vadd.f32 %v4019_v3, %v4001_v1  ;;  %v4186_v1 = vand.u32 4294901760, %v8038_v62  ;;  %v8076_v28 = vand.u32 4294901760, %v4058_v56 }
 0x41e   : > { %v3972_v49 = vadd.f32 %v3971_v22, %v3907_v47  ;;  %v4181_v22 = vsub.f32 %v8000_v36, %v4180_v15  ;;  %v8042_v5 = vsub.f32 %v4061_v24, %v8029_v8  ;;  %4171 = vmatpush.msrb.mxu3 %v4170_v7  ;;  %v8054_v47 = vsub.f32 %v4060_v12, %v8044_v21 }
 0x41f   : > { %v4081_v40 = vsel %vm4080_vm4, %v4018_v51, %v4012_v13  ;;  %v4021_v33 = vrot.slane %v4020_v60, 2  ;;  %4114 = vmatpush.msrb.mxu2 %v8029_v8  ;;  %v4187_v16 = vsub.f32 %v8038_v62, %v4186_v1  ;;  %v8059_v51 = vsub.f32 %v4059_v30, %v8049_v63  ;;  %4361 = vmatpush.msra.mxu0 %v4180_v15  ;;  %v4056_v15 = vld [vmem:[%s8420_s3 + $0x8] sm:$0xff]  ;;  %v4055_v30 = vld [vmem:[%s8420_s3] sm:$0xff] }
 0x420   : > { %v3993_v53 = vmax.f32 %v3972_v49, 0.0  ;;  %v4182_v13 = vand.u32 4294901760, %v4181_v22  ;;  %v4192_v6 = vand.u32 4294901760, %v8042_v5  ;;  %4418 = vmatpush.msra.mxu1 %v8029_v8  ;;  %4177 = vmatpush.msrb.mxu3 %v4176_v23  ;;  %v4198_v49 = vand.u32 4294901760, %v8054_v47 }
 0x421   : > { %v4022_v44 = vadd.f32 %v4021_v33, %v4020_v60  ;;  %v4057_v33 = vld [vmem:[%s8420_s3 + $0x10] sm:$0xff]  ;;  %4116 = vmatpush.msrb.mxu2 %v8044_v21  ;;  %v4204_v11 = vand.u32 4294901760, %v8059_v51  ;;  %4365 = vmatpush.msra.mxu0 %v4186_v1  ;;  %v8087_v26 = vsub.f32 %v4058_v56, %v8076_v28  ;;  %v8089_v7 = vand.u32 4294901760, %v4056_v15 }
 0x422   : > { %v4002_v55 = vsel %vm3998_vm3, %v3993_v53, 0.0  ;;  %v4193_v31 = vsub.f32 %v8042_v5, %v4192_v6  ;;  %4420 = vmatpush.msra.mxu1 %v8044_v21  ;;  %v3979_v24 = vpop.f32.mrf.mxu1  ;;  %4183 = vmatpush.msrb.mxu3 %v4182_v13  ;;  %v4199_v34 = vsub.f32 %v8054_v47, %v4198_v49  ;;  %v8080_v22 = vand.u32 4294901760, %v4057_v33 }
 0x423   : > { %v4023_v25 = vrot.slane %v4022_v44, 1  ;;  %v4025_v35 = vrot.slane %v4002_v55, 4  ;;  %v3910_v43 = vpop.f32.mrf.mxu0  ;;  %4118 = vmatpush.msrb.mxu2 %v8049_v63  ;;  %4369 = vmatpush.msra.mxu0 %v4192_v6  ;;  %v4210_v1 = vand.u32 4294901760, %v8087_v26 }
 0x424   : > { %v3911_v54 = vadd.f32 %v3910_v43, %v7961_v32  ;;  %v4194_v53 = vand.u32 4294901760, %v4193_v31  ;;  %4422 = vmatpush.msra.mxu1 %v8049_v63  ;;  %v8096_v43 = vsub.f32 %v4057_v33, %v8080_v22 }
 0x425   : > { %v4024_v2 = vadd.f32 %v4023_v25, %v4022_v44  ;;  %v4026_v3 = vadd.f32 %v4025_v35, %v4002_v55  ;;  %v4205_v44 = vsub.f32 %v8059_v51, %v4204_v11  ;;  %v4200_v35 = vand.u32 4294901760, %v4199_v34  ;;  %4120 = vmatpush.msrb.mxu2 %v8076_v28  ;;  %4373 = vmatpush.msra.mxu0 %v4198_v49  ;;  %v3819_v49 = vpop.f32.mrf.mxu3 }
 0x426   : > { %v3976_v32 = vadd.f32 %v3975_v27, %v3911_v54  ;;  %v4188_v27 = vand.u32 4294901760, %v4187_v16  ;;  %4424 = vmatpush.msra.mxu1 %v8076_v28  ;;  %v8106_v16 = vand.u32 4294901760, %v4055_v30  ;;  %v4211_v31 = vsub.f32 %v8087_v26, %v4210_v1 }
 0x427   : > { %v4083_v60 = vsel %vm4082_vm5, %v4024_v2, %v4081_v40  ;;  %v4027_v17 = vrot.slane %v4026_v3, 2  ;;  %v4206_v13 = vand.u32 4294901760, %v4205_v44  ;;  %v8102_v2 = vsub.f32 %v4056_v15, %v8089_v7  ;;  %4122 = vmatpush.msrb.mxu2 %v8080_v22  ;;  %4377 = vmatpush.msra.mxu0 %v4204_v11 }
 0x428   : > { %v3994_v40 = vmax.f32 %v3976_v32, 0.0  ;;  %4189 = vmatpush.msrb.mxu3 %v4188_v27  ;;  %v4216_v32 = vand.u32 4294901760, %v8096_v43  ;;  %4426 = vmatpush.msra.mxu1 %v8080_v22  ;;  %v8117_v27 = vsub.f32 %v4055_v30, %v8106_v16 }
 0x429   : > { %v4028_v14 = vadd.f32 %v4027_v17, %v4026_v3  ;;  %v4222_v56 = vand.u32 4294901760, %v8102_v2  ;;  %4124 = vmatpush.msrb.mxu2 %v8089_v7  ;;  %4381 = vmatpush.msra.mxu0 %v4210_v1 }
 0x42a   : > { %v4003_v12 = vsel %vm3998_vm3, %v3994_v40, 0.0  ;;  %4195 = vmatpush.msrb.mxu3 %v4194_v53  ;;  %v4217_v40 = vsub.f32 %v8096_v43, %v4216_v32  ;;  %4428 = vmatpush.msra.mxu1 %v8089_v7  ;;  %v3820_v53 = vadd.f32 %v3819_v49, %v8006_v48 }
 0x42b   : > { %v4029_v55 = vrot.slane %v4028_v14, 1  ;;  %v4031_v23 = vrot.slane %v4003_v12, 4  ;;  %v3914_v25 = vpop.f32.mrf.mxu0  ;;  %4126 = vmatpush.msrb.mxu2 %v8106_v16  ;;  %4385 = vmatpush.msra.mxu0 %v4216_v32 }
 0x42c   : > { %v3915_v54 = vadd.f32 %v3914_v25, %v7963_v20  ;;  %v3527_v20 = vadd.f32 %v7900_v18, %v7954_v52  ;;  %4201 = vmatpush.msrb.mxu3 %v4200_v35  ;;  %v4212_v52 = vand.u32 4294901760, %v4211_v31  ;;  %4430 = vmatpush.msra.mxu1 %v8106_v16 }
 0x42d   : > { %v4030_v3 = vadd.f32 %v4029_v55, %v4028_v14  ;;  %v4032_v6 = vadd.f32 %v4031_v23, %v4003_v12  ;;  %v4223_v14 = vsub.f32 %v8102_v2, %v4222_v56  ;;  %4239 = vmatpush.msra.mxu2 %v7915_v0  ;;  %v3983_v55 = vpop.f32.mrf.mxu1  ;;  %4389 = vmatpush.msra.mxu0 %v4222_v56 }
 0x42e   : > { %v3980_v17 = vadd.f32 %v3979_v24, %v3915_v54  ;;  %4207 = vmatpush.msrb.mxu3 %v4206_v13  ;;  %v4218_v24 = vand.u32 4294901760, %v4217_v40  ;;  %v3656_v34 = vadd.f32 %v7898_v45, %v3527_v20  ;;  %v3744_v45 = vpop.f32.mrf.mxu2 }
 0x42f   : > { %v4085_v33 = vsel %vm4084_vm6, %v4030_v3, %v4083_v60  ;;  %v4033_v15 = vrot.slane %v4032_v6, 2  ;;  %v4228_v60 = vand.u32 4294901760, %v8117_v27  ;;  %v4224_v25 = vand.u32 4294901760, %v4223_v14  ;;  %4242 = vmatpush.msra.mxu2 %v7939_v46 }
 0x430   : > { %v3995_v18 = vmax.f32 %v3980_v17, 0.0  ;;  %4213 = vmatpush.msrb.mxu3 %v4212_v52  ;;  %v3745_v1 = vadd.f32 %v3744_v45, %v3656_v34  ;;  %v3825_v17 = vpop.f32.mrf.mxu3 }
 0x431   : > { %v4034_v11 = vadd.f32 %v4033_v15, %v4032_v6  ;;  %v4229_v35 = vsub.f32 %v8117_v27, %v4228_v60  ;;  %4245 = vmatpush.msra.mxu2 %v7942_v41  ;;  %4393 = vmatpush.msra.mxu0 %v4228_v60 }
 0x432   : > { %v4004_v12 = vsel %vm3998_vm3, %v3995_v18, 0.0  ;;  %4219 = vmatpush.msrb.mxu3 %v4218_v24  ;;  %v3826_v46 = vadd.f32 %v3825_v17, %v3745_v1  ;;  %v4451_v24 = vld [vmem:[#allocation3 + $0x70] sm:$0xff] }
 0x433   : > { %v4035_v44 = vrot.slane %v4034_v11, 1  ;;  %v4037_v30 = vrot.slane %v4004_v12, 4  ;;  %v3918_v23 = vpop.f32.mrf.mxu0  ;;  %v4230_v0 = vand.u32 4294901760, %v4229_v35  ;;  %4248 = vmatpush.msra.mxu2 %v7945_v57  ;;  %v8150_v34 = vand.u32 4294901760, %v4451_v24  ;;  %v4446_v35 = vld [vmem:[#allocation3 + $0x48] sm:$0xff] }
 0x434   : > { %v3919_v48 = vadd.f32 %v3918_v23, %v3820_v53  ;;  %4225 = vmatpush.msrb.mxu3 %v4224_v25  ;;  %v8196_v45 = vand.u32 4294901760, %v4446_v35 }
 0x435   : > { %v4036_v54 = vadd.f32 %v4035_v44, %v4034_v11  ;;  %v4038_v13 = vadd.f32 %v4037_v30, %v4004_v12  ;;  %4251 = vmatpush.msra.mxu2 %v7990_v42  ;;  %v3987_v18 = vpop.f32.mrf.mxu1  ;;  %v4448_v12 = vld [vmem:[#allocation3 + $0x58] sm:$0xff] }
 0x436   : > { %v3984_v3 = vadd.f32 %v3983_v55, %v3919_v48  ;;  %4231 = vmatpush.msrb.mxu3 %v4230_v0  ;;  %v4447_v55 = vld [vmem:[#allocation3 + $0x50] sm:$0xff]  ;;  %v8174_v23 = vand.u32 4294901760, %v4448_v12 }
 0x437   : > { %v4087_v6 = vsel %vm4086_vm7, %v4036_v54, %v4085_v33  ;;  %v4039_v32 = vrot.slane %v4038_v13, 2  ;;  %4254 = vmatpush.msra.mxu2 %v7993_v39  ;;  %v4452_v39 = vld [vmem:[#allocation3 + $0x78] sm:$0xff] }
 0x438   : > { %v3996_v20 = vmax.f32 %v3984_v3, 0.0  ;;  %4292 = vmatpush.msra.mxu3 %v7908_v61  ;;  %v8148_v53 = vand.u32 4294901760, %v4452_v39  ;;  %v8211_v3 = vsub.f32 %v4446_v35, %v8196_v45 }
 0x439   : > { %v4040_v31 = vadd.f32 %v4039_v32, %v4038_v13  ;;  %4257 = vmatpush.msra.mxu2 %v7997_v29  ;;  %v4444_v13 = vld [vmem:[#allocation3 + $0x38] sm:$0xff]  ;;  %v4443_v32 = vld [vmem:[#allocation3 + $0x30] sm:$0xff] }
 0x43a   : > { %v4005_v56 = vsel %vm3998_vm3, %v3996_v20, 0.0  ;;  %4294 = vmatpush.msra.mxu3 %v7928_v59  ;;  %4654 = vmatpush.msrb.mxu1 %v8148_v53 }
 0x43b   : > { %v4041_v49 = vrot.slane %v4040_v31, 1  ;;  %v4043_v41 = vrot.slane %v4005_v56, 4  ;;  %v3922_v15 = vpop.f32.mrf.mxu0  ;;  %4260 = vmatpush.msra.mxu2 %v8000_v36 }
 0x43c   : > { %v3923_v33 = vadd.f32 %v3922_v15, %v3826_v46  ;;  %4296 = vmatpush.msra.mxu3 %v7930_v4  ;;  %v4450_v4 = vld [vmem:[#allocation3 + $0x68] sm:$0xff]  ;;  %4656 = vmatpush.msrb.mxu1 %v8150_v34 }
 0x43d   : > { %v4042_v57 = vadd.f32 %v4041_v49, %v4040_v31  ;;  %v4044_v40 = vadd.f32 %v4043_v41, %v4005_v56  ;;  %4263 = vmatpush.msra.mxu2 %v8038_v62  ;;  %v8157_v62 = vand.u32 4294901760, %v4450_v4  ;;  %v8233_v49 = vand.u32 4294901760, %v4443_v32 }
 0x43e   : > { %v3988_v52 = vadd.f32 %v3987_v18, %v3923_v33  ;;  %4298 = vmatpush.msra.mxu3 %v7932_v58 }
 0x43f   : > { %v4089_v61 = vsel %vm4088_vm8, %v4042_v57, %v4087_v6  ;;  %v4045_v14 = vrot.slane %v4044_v40, 2  ;;  %4266 = vmatpush.msra.mxu2 %v8042_v5  ;;  %v8165_v5 = vand.u32 4294901760, %v4449_v38  ;;  %4658 = vmatpush.msrb.mxu1 %v8157_v62  ;;  %v8213_v6 = vand.u32 4294901760, %v4444_v13 }
 0x440   : > { %v3997_v42 = vmax.f32 %v3988_v52, 0.0  ;;  %4300 = vmatpush.msra.mxu3 %v7979_v37  ;;  %v8155_v37 = vsub.f32 %v4452_v39, %v8148_v53  ;;  %v8250_v18 = vsub.f32 %v4443_v32, %v8233_v49 }
 0x441   : > { %v4046_v11 = vadd.f32 %v4045_v14, %v4044_v40  ;;  %4269 = vmatpush.msra.mxu2 %v8054_v47  ;;  %v8172_v47 = vsub.f32 %v4450_v4, %v8157_v62  ;;  %4660 = vmatpush.msrb.mxu1 %v8165_v5  ;;  %v8231_v56 = vsub.f32 %v4444_v13, %v8213_v6 }
 0x442   : > { %v4006_v59 = vsel %vm3998_vm3, %v3997_v42, 0.0  ;;  %4302 = vmatpush.msra.mxu3 %v7981_v19  ;;  %v8163_v19 = vsub.f32 %v4451_v24, %v8150_v34  ;;  %4601 = vmatpush.msrb.mxu0 %v8155_v37 }
 0x443   : > { %v4047_v60 = vrot.slane %v4046_v11, 1  ;;  %v4049_v29 = vrot.slane %v4006_v59, 4  ;;  %4272 = vmatpush.msra.mxu2 %v8059_v51  ;;  %v8183_v51 = vand.u32 4294901760, %v4447_v55  ;;  %4662 = vmatpush.msrb.mxu1 %v8174_v23  ;;  %v4548_v24 = vand.u32 4294901760, %v8231_v56 }
 0x444   : > { %4304 = vmatpush.msra.mxu3 %v7983_v50  ;;  %4604 = vmatpush.msrb.mxu0 %v8163_v19 }
 0x445   : > { %v4048_v58 = vadd.f32 %v4047_v60, %v4046_v11  ;;  %v4050_v36 = vadd.f32 %v4049_v29, %v4006_v59  ;;  %4275 = vmatpush.msra.mxu2 %v8087_v26  ;;  %v4445_v26 = vld [vmem:[#allocation3 + $0x40] sm:$0xff]  ;;  %4664 = vmatpush.msrb.mxu1 %v8183_v51  ;;  %v4554_v29 = vand.u32 4294901760, %v8250_v18 }
 0x446   : > { %4306 = vmatpush.msra.mxu3 %v7987_v10  ;;  %v8181_v10 = vsub.f32 %v4449_v38, %v8165_v5  ;;  %4607 = vmatpush.msrb.mxu0 %v8172_v47  ;;  %v8205_v1 = vand.u32 4294901760, %v4445_v26 }
 0x447   : > { %v4091_v44 = vsel %vm4090_vm9, %v4048_v58, %v4089_v61  ;;  %v4051_v30 = vrot.slane %v4050_v36, 2  ;;  %4278 = vmatpush.msra.mxu2 %v8096_v43  ;;  %v8200_v43 = vsub.f32 %v4447_v55, %v8183_v51  ;;  %4666 = vmatpush.msrb.mxu1 %v8196_v45  ;;  %v4536_v61 = vand.u32 4294901760, %v8211_v3  ;;  %v4442_v55 = vld [vmem:[#allocation3 + $0x28] sm:$0xff] }
 0x448   : > { %4308 = vmatpush.msra.mxu3 %v8023_v9  ;;  %v8190_v9 = vsub.f32 %v4448_v12, %v8174_v23  ;;  %4610 = vmatpush.msrb.mxu0 %v8181_v10  ;;  %v8221_v17 = vsub.f32 %v4445_v26, %v8205_v1  ;;  %v4518_v31 = vand.u32 4294901760, %v8181_v10  ;;  %v4549_v58 = vsub.f32 %v8231_v56, %v4548_v24 }
 0x449   : > { %v4052_v50 = vadd.f32 %v4051_v30, %v4050_v36  ;;  %4281 = vmatpush.msra.mxu2 %v8102_v2  ;;  %4668 = vmatpush.msrb.mxu1 %v8205_v1  ;;  %v4537_v39 = vsub.f32 %v8211_v3, %v4536_v61  ;;  %v4555_v12 = vsub.f32 %v8250_v18, %v4554_v29  ;;  %v8286_v35 = vand.u32 4294901760, %v4442_v55 }
 0x44a   : > { %4310 = vmatpush.msra.mxu3 %v8029_v8  ;;  %v4500_v8 = vand.u32 4294901760, %v8155_v37  ;;  %4613 = vmatpush.msrb.mxu0 %v8190_v9  ;;  %v4524_v15 = vand.u32 4294901760, %v8190_v9  ;;  %v4519_v40 = vsub.f32 %v8181_v10, %v4518_v31  ;;  %v4542_v11 = vand.u32 4294901760, %v8221_v17 }
 0x44b   : > { %v4053_v25 = vrot.slane %v4052_v50, 1  ;;  %4284 = vmatpush.msra.mxu2 %v8117_v27  ;;  %v4512_v27 = vand.u32 4294901760, %v8172_v47  ;;  %4670 = vmatpush.msrb.mxu1 %v8213_v6  ;;  %v4538_v38 = vand.u32 4294901760, %v4537_v39  ;;  %v4556_v30 = vand.u32 4294901760, %v4555_v12 }
 0x44c   : > { %4312 = vmatpush.msra.mxu3 %v8044_v21  ;;  %v4506_v21 = vand.u32 4294901760, %v8163_v19  ;;  %4616 = vmatpush.msrb.mxu0 %v8200_v43  ;;  %v4520_v14 = vand.u32 4294901760, %v4519_v40  ;;  %v4543_v60 = vsub.f32 %v8221_v17, %v4542_v11 }
 0x44d   : > { %v4054_v48 = vadd.f32 %v4053_v25, %v4052_v50  ;;  %4672 = vmatpush.msrb.mxu1 %v8233_v49  ;;  %v4441_v50 = vld [vmem:[#allocation3 + $0x20] sm:$0xff]  ;;  %v4440_v25 = vld [vmem:[#allocation3 + $0x18] sm:$0xff] }
 0x44e   : > { %4314 = vmatpush.msra.mxu3 %v8049_v63  ;;  %v4501_v63 = vsub.f32 %v8155_v37, %v4500_v8  ;;  %4619 = vmatpush.msrb.mxu0 %v8211_v3  ;;  %v4544_v36 = vand.u32 4294901760, %v4543_v60  ;;  %v8290_v26 = vand.u32 4294901760, %v4440_v25 }
 0x44f   : > { %v4093_v54 = vsel %vm4092_vm10, %v4054_v48, %v4091_v44  ;;  %v4550_v44 = vand.u32 4294901760, %v4549_v58  ;;  %v8288_v48 = vand.u32 4294901760, %v4441_v50  ;;  %4674 = vmatpush.msrb.mxu1 %v8286_v35 }
 0x450   : > { %v4127_v0 = vand.u32 4294901760, %v4093_v54  ;;  %4316 = vmatpush.msra.mxu3 %v8076_v28  ;;  %v4507_v28 = vsub.f32 %v8163_v19, %v4506_v21  ;;  %4622 = vmatpush.msrb.mxu0 %v8221_v17  ;;  %v4502_v41 = vand.u32 4294901760, %v4501_v63 }
 0x451   : > { %v8296_v13 = vsub.f32 %v4441_v50, %v8288_v48  ;;  %4676 = vmatpush.msrb.mxu1 %v8288_v48 }
 0x452   : > { %v4128_v2 = vsub.f32 %v4093_v54, %v4127_v0  ;;  %4233 = vmatmul.f32.vlgmr.msrb.gmra.mxu3 %v4127_v0  ;;  %4395 = vmatmul.f32.vlgmr.msra.gmra.mxu0 %v4127_v0  ;;  %v4508_v57 = vand.u32 4294901760, %v4507_v28  ;;  %v8293_v54 = vsub.f32 %v4442_v55, %v8286_v35  ;;  %v4438_v28 = vld [vmem:[#allocation3 + $0x8] sm:$0xff] }
 0x453   : > { %4432 = vmatmul.f32.vlgmr.msra.gmra.mxu1 %v4127_v0  ;;  %4318 = vmatpush.msra.mxu3 %v8080_v22  ;;  %v4513_v22 = vsub.f32 %v8172_v47, %v4512_v27  ;;  %v8299_v0 = vsub.f32 %v4440_v25, %v8290_v26  ;;  %v4566_v63 = vand.u32 4294901760, %v8296_v13 }
 0x454   : > { %v4129_v20 = vand.u32 4294901760, %v4128_v2  ;;  %4625 = vmatpush.msrb.mxu0 %v8231_v56  ;;  %4678 = vmatpush.msrb.mxu1 %v8290_v26 }
 0x455   : > { %4320 = vmatpush.msra.mxu3 %v8089_v7  ;;  %v4530_v7 = vand.u32 4294901760, %v8200_v43  ;;  %v4514_v52 = vand.u32 4294901760, %v4513_v22  ;;  %v4572_v32 = vand.u32 4294901760, %v8299_v0  ;;  %v8310_v22 = vand.u32 4294901760, %v4438_v28 }
 0x456   : > { %v4130_v46 = vsub.f32 %v4128_v2, %v4129_v20  ;;  %4628 = vmatpush.msrb.mxu0 %v8250_v18  ;;  %v4567_v40 = vsub.f32 %v8296_v13, %v4566_v63 }
 0x457   : > { %4322 = vmatpush.msra.mxu3 %v8106_v16  ;;  %v4525_v16 = vsub.f32 %v8190_v9, %v4524_v15  ;;  %v4531_v42 = vsub.f32 %v8200_v43, %v4530_v7 }
 0x458   : > { %v4131_v33 = vand.u32 4294901760, %v4130_v46  ;;  %v4437_v46 = vld [vmem:[#allocation3] sm:$0xff]  ;;  %4631 = vmatpush.msrb.mxu0 %v8293_v54  ;;  %v4568_v39 = vand.u32 4294901760, %v4567_v40 }
 0x459   : > { %4503 = vmatpush.msrb.mxu3 %v4502_v41  ;;  %v4526_v59 = vand.u32 4294901760, %v4525_v16  ;;  %v4532_v4 = vand.u32 4294901760, %v4531_v42 }
 0x45a   : > { %4132 = vmatmul.f32.vlgmr.msrb.gmra.mxu2 %v4131_v33  ;;  %4326 = vmatmul.f32.vlgmr.msra.gmra.mxu3 %v4129_v20  ;;  %v4439_v20 = vld [vmem:[#allocation3 + $0x10] sm:$0xff]  ;;  %v8312_v33 = vand.u32 4294901760, %v4437_v46 }
 0x45b   : > { %4458 = vmatpush.msrb.mxu2 %v8148_v53  ;;  %4509 = vmatpush.msrb.mxu3 %v4508_v57  ;;  %v8308_v41 = vand.u32 4294901760, %v4439_v20 }
 0x45c   : > { %4634 = vmatpush.msrb.mxu0 %v8296_v13  ;;  %v4589_v42 = vsub.f32 %v4437_v46, %v8312_v33 }
 0x45d   : > { %4460 = vmatpush.msrb.mxu2 %v8150_v34  ;;  %4515 = vmatpush.msrb.mxu3 %v4514_v52  ;;  %v4573_v52 = vsub.f32 %v8299_v0, %v4572_v32  ;;  %v4577_v16 = vsub.f32 %v4439_v20, %v8308_v41 }
 0x45e   : > { %4637 = vmatpush.msrb.mxu0 %v8299_v0  ;;  %4680 = vmatpush.msrb.mxu1 %v8308_v41 }
 0x45f   : > { %4462 = vmatpush.msrb.mxu2 %v8157_v62  ;;  %4521 = vmatpush.msrb.mxu3 %v4520_v14  ;;  %v4583_v14 = vsub.f32 %v4438_v28, %v8310_v22  ;;  %v4574_v58 = vand.u32 4294901760, %v4573_v52 }
 0x460   : > { %4640 = vmatpush.msrb.mxu0 %v4577_v16  ;;  %4682 = vmatpush.msrb.mxu1 %v8310_v22 }
 0x461   : > { %4464 = vmatpush.msrb.mxu2 %v8165_v5  ;;  %4527 = vmatpush.msrb.mxu3 %v4526_v59  ;;  %v4584_v60 = vand.u32 4294901760, %v4583_v14 }
 0x462   : > { %4287 = vmatmul.f32.vlgmr.msra.gmra.mxu2 %v4128_v2  ;;  %v4560_v2 = vand.u32 4294901760, %v8293_v54  ;;  %4643 = vmatpush.msrb.mxu0 %v4583_v14 }
 0x463   : > { %4466 = vmatpush.msrb.mxu2 %v8174_v23  ;;  %4533 = vmatpush.msrb.mxu3 %v4532_v4  ;;  %v4578_v4 = vand.u32 4294901760, %v4577_v16  ;;  %v4585_v12 = vsub.f32 %v4583_v14, %v4584_v60 }
 0x464   : > { %v4561_v57 = vsub.f32 %v8293_v54, %v4560_v2  ;;  %4684 = vmatpush.msrb.mxu1 %v8312_v33  ;;  %4646 = vmatpush.msrb.mxu0 %v4589_v42 }
 0x465   : > { %4468 = vmatpush.msrb.mxu2 %v8183_v51  ;;  %4539 = vmatpush.msrb.mxu3 %v4538_v38  ;;  %v4590_v38 = vand.u32 4294901760, %v4589_v42  ;;  %v4586_v55 = vand.u32 4294901760, %v4585_v12 }
 0x466   : > { %v4562_v59 = vand.u32 4294901760, %v4561_v57 }
 0x467   : > { %4470 = vmatpush.msrb.mxu2 %v8196_v45  ;;  %4545 = vmatpush.msrb.mxu3 %v4544_v36  ;;  %v4579_v36 = vsub.f32 %v4577_v16, %v4578_v4 }
 0x469   : > { %4472 = vmatpush.msrb.mxu2 %v8205_v1  ;;  %4551 = vmatpush.msrb.mxu3 %v4550_v44  ;;  %v4591_v44 = vsub.f32 %v4589_v42, %v4590_v38 }
 0x46b   : > { %4474 = vmatpush.msrb.mxu2 %v8213_v6  ;;  %4557 = vmatpush.msrb.mxu3 %v4556_v30  ;;  %v4580_v30 = vand.u32 4294901760, %v4579_v36  ;;  %v4592_v50 = vand.u32 4294901760, %v4591_v44 }
 0x46d   : > { %4476 = vmatpush.msrb.mxu2 %v8233_v49  ;;  %4563 = vmatpush.msrb.mxu3 %v4562_v59 }
 0x46f   : > { %4478 = vmatpush.msrb.mxu2 %v8286_v35  ;;  %4569 = vmatpush.msrb.mxu3 %v4568_v39 }
 0x471   : > { %4480 = vmatpush.msrb.mxu2 %v8288_v48  ;;  %4575 = vmatpush.msrb.mxu3 %v4574_v58 }
 0x473   : > { %4482 = vmatpush.msrb.mxu2 %v8290_v26  ;;  %4581 = vmatpush.msrb.mxu3 %v4580_v30 }
 0x475   : > { %4484 = vmatpush.msrb.mxu2 %v8308_v41  ;;  %4587 = vmatpush.msrb.mxu3 %v4586_v55 }
 0x477   : > { %4486 = vmatpush.msrb.mxu2 %v8310_v22  ;;  %4593 = vmatpush.msrb.mxu3 %v4592_v50 }
 0x479   : > { %4488 = vmatpush.msrb.mxu2 %v8312_v33  ;;  %4762 = vmatpush.msra.mxu3 %v8148_v53  ;;  %v4986_v53 = vld [vmem:[%s8422_s5] sm:$0xff] }
 0x47b   : > { %4695 = vmatpush.msra.mxu2 %v4500_v8  ;;  %4764 = vmatpush.msra.mxu3 %v8150_v34  ;;  %v4071_v34 = vperm.slane %v4986_v53, 4 }
 0x47d   : > { %4699 = vmatpush.msra.mxu2 %v4506_v21  ;;  %4766 = vmatpush.msra.mxu3 %v8157_v62 }
 0x47f   : > { %4703 = vmatpush.msra.mxu2 %v4512_v27  ;;  %4768 = vmatpush.msra.mxu3 %v8165_v5 }
 0x481   : > { %4707 = vmatpush.msra.mxu2 %v4518_v31  ;;  %4770 = vmatpush.msra.mxu3 %v8174_v23  ;;  %v4983_v31 = vld [vmem:[%s8423_s6] ss:$0 sm:$0xff] }
 0x483   : > { %4711 = vmatpush.msra.mxu2 %v4524_v15  ;;  %4772 = vmatpush.msra.mxu3 %v8183_v51 }
 0x485   : > { %4715 = vmatpush.msra.mxu2 %v4530_v7  ;;  %4774 = vmatpush.msra.mxu3 %v8196_v45 }
 0x487   : > { %4719 = vmatpush.msra.mxu2 %v4536_v61  ;;  %4776 = vmatpush.msra.mxu3 %v8205_v1 }
 0x489   : > { %4723 = vmatpush.msra.mxu2 %v4542_v11  ;;  %4778 = vmatpush.msra.mxu3 %v8213_v6 }
 0x48b   : > { %4727 = vmatpush.msra.mxu2 %v4548_v24  ;;  %4780 = vmatpush.msra.mxu3 %v8233_v49 }
 0x48d   : > { %4731 = vmatpush.msra.mxu2 %v4554_v29  ;;  %4782 = vmatpush.msra.mxu3 %v8286_v35 }
 0x48f   : > { %4735 = vmatpush.msra.mxu2 %v4560_v2  ;;  %4784 = vmatpush.msra.mxu3 %v8288_v48 }
 0x491   : > { %4739 = vmatpush.msra.mxu2 %v4566_v63  ;;  %4786 = vmatpush.msra.mxu3 %v8290_v26 }
 0x493   : > { %4743 = vmatpush.msra.mxu2 %v4572_v32  ;;  %4788 = vmatpush.msra.mxu3 %v8308_v41 }
 0x495   : > { %4747 = vmatpush.msra.mxu2 %v4578_v4  ;;  %4790 = vmatpush.msra.mxu3 %v8310_v22 }
 0x497   : > { %4751 = vmatpush.msra.mxu2 %v4584_v60  ;;  %4792 = vmatpush.msra.mxu3 %v8312_v33 }
 0x499   : > { %4755 = vmatpush.msra.mxu2 %v4590_v38 }
 0x4cf   : > { %v4396_v9 = vpop.f32.mrf.mxu0 }
 0x4d0   : > { %v4433_v8 = vpop.f32.mrf.mxu1 }
 0x4d5   : > { %v4234_v37 = vpop.f32.mrf.mxu3 }
 0x4dd   : > { %v4133_v62 = vpop.f32.mrf.mxu2  ;;  %v4327_v10 = vpop.f32.mrf.mxu3 }
 0x4de   : > { %v4134_v19 = vadd.f32 %v4133_v62, %v4071_v34 }
 0x4e0   : > { %v4235_v5 = vadd.f32 %v4234_v37, %v4134_v19 }
 0x4e5   : > { %v4288_v47 = vpop.f32.mrf.mxu2 }
 0x4e6   : > { %v4289_v23 = vadd.f32 %v4288_v47, %v4235_v5 }
 0x4e8   : > { %v4328_v51 = vadd.f32 %v4327_v10, %v4289_v23 }
 0x4ea   : > { %v4397_v45 = vadd.f32 %v4396_v9, %v4328_v51 }
 0x4ec   : > { %v4434_v43 = vadd.f32 %v4433_v8, %v4397_v45 }
 0x4ee   : > { %v4436_v1 = vmax.f32 %v4434_v43, 0.0 }
 0x4f0   : > { %v4489_v21 = vand.u32 4294901760, %v4436_v1 }
 0x4f2   : > { %v4490_v3 = vsub.f32 %v4436_v1, %v4489_v21  ;;  %4595 = vmatmul.f32.vlgmr.msrb.gmra.mxu3 %v4489_v21 }
 0x4f4   : > { %4649 = vmatmul.f32.vlgmr.msrb.gmra.mxu0 %v4490_v3  ;;  %v4491_v6 = vand.u32 4294901760, %v4490_v3 }
 0x4f6   : > { %4688 = vmatmul.f32.vlgmr.msrb.gmra.mxu1 %v4491_v6  ;;  %v4492_v27 = vsub.f32 %v4490_v3, %v4491_v6 }
 0x4f8   : > { %v4493_v17 = vand.u32 4294901760, %v4492_v27 }
 0x4fa   : > { %4494 = vmatmul.f32.vlgmr.msrb.gmra.mxu2 %v4493_v17  ;;  %4794 = vmatmul.f32.vlgmr.msra.gmra.mxu3 %v4489_v21 }
 0x502   : > { %4757 = vmatmul.f32.vlgmr.msra.gmra.mxu2 %v4489_v21 }
 0x571   : > { %v4650_v18 = vpop.f32.mrf.mxu0 }
 0x573   : > { %v4689_v11 = vpop.f32.mrf.mxu1 }
 0x575   : > { %v4596_v56 = vpop.f32.mrf.mxu3 }
 0x57d   : > { %v4495_v49 = vpop.f32.mrf.mxu2  ;;  %v4795_v35 = vpop.f32.mrf.mxu3 }
 0x57e   : > { %v4496_v15 = vadd.f32 %v4983_v31, %v4495_v49 }
 0x580   : > { %v4597_v7 = vadd.f32 %v4596_v56, %v4496_v15 }
 0x582   : > { %v4651_v61 = vadd.f32 %v4650_v18, %v4597_v7 }
 0x584   : > { %v4690_v24 = vadd.f32 %v4689_v11, %v4651_v61 }
 0x585   : > { %v4758_v29 = vpop.f32.mrf.mxu2 }
 0x586   : > { %v4759_v25 = vadd.f32 %v4758_v29, %v4690_v24 }
 0x588   : > { %v4796_v48 = vadd.f32 %v4795_v35, %v4759_v25 }
 0x58a   : > { %4798 = vst [vmem:[%s289_s8] sm:$0xff] %v4796_v48 }
 0x58b   : > { %5044 = shalt.err (!%p5041_p8)
}
 0x58c   : > { %4934 = dma.vmem_to_hbm [thread:$0]  (%p5167_p5), %s4813_s9, 128, %s4815_s13, %s4800_s28  }
 0x58d PF: > { %p4946_p9 = scmp.ge.s32.totalorder %s5083_s27, 2  ;;  %s4826_s29 = sand.u32 1, %s5071_s24  }
 0x58e   : > { %s4827_s21 = scalar_lea.sflag [#allocation5], %s4826_s29 }
 0x58f   : > { %p4941_p10 = pnand %p4946_p9, %p5171_p6 }
 0x591   : > { %p4942_p11 = pneg %p4941_p10 }
 0x593   : > { %5066 = dma.done.wait (%p4942_p11), %s4827_s21, 128  }
 0x594   : > { %5068 = vsyncadd (%p4942_p11), %s4827_s21, 4294967168  ;;  %p18_p12 = scmp.ge.s32.totalorder %s5154_s30, 4   ;;  %s8712_s24 = smov %s5075_s25 }
 0x595   : > { %s8713_s25 = smov %s5079_s26  ;;  %s8714_s26 = smov %s5165_s10 }
 0x596   : > { %s8715_s27 = smov %s5154_s30  ;;  %20 = sbr.rel (!%p18_p12) target bundleno = 4 (0x4), region = 126 }
 0x59b   :  { %4833 = vsyncpa [#allocation4], 1 }
 0x59c   :  { %4835 = vsyncpa [#allocation4 + $0x1], 1 }
 0x59d   :  { %4836 = vsyncpa [#allocation5], 1 }
 0x59e   :  { %4838 = vsyncpa [#allocation5 + $0x1], 1 }

</bundles_post_ra>
